<compile_context>
chip_gen: v7x
topology: tpu7x:2x2x1
jax: 0.10.0
libtpu: 0.0.40
codegen_flags: <defaults>
</compile_context>

<pallas_src>
import math
import functools

import jax
import jax.numpy as jnp
from jax.experimental import pallas as pl
from jax.experimental.pallas import tpu as pltpu


# ------------------------------ in-kernel helpers ------------------------------

def _mm(a, w_bf16):
    """Matmul with bf16 operands, f32 accumulation (MXU-friendly)."""
    return jnp.dot(a.astype(jnp.bfloat16), w_bf16,
                   preferred_element_type=jnp.float32)


def _ln_apply(x, gb):
    """LayerNorm; gb is (2, E): row 0 = gamma, row 1 = beta.  eps matches PyTorch."""
    g = gb[0:1]
    b = gb[1:2]
    mean = jnp.mean(x, axis=-1, keepdims=True)
    var = jnp.mean(jnp.square(x - mean), axis=-1, keepdims=True)
    return (x - mean) * jax.lax.rsqrt(var + 1e-5) * g + b


def _block_bias(Mq, Mk, q_len, k_len, n_batch, causal):
    """Additive bias (1, Mq, Mk): 0 where query row and key col belong to the same
    batch block (and, if causal, col <= row), -1e30 elsewhere.  Built from iota +
    comparisons only (no integer division) so it lowers cleanly on all TPU gens."""
    r = jax.lax.broadcasted_iota(jnp.int32, (Mq, Mk), 0)
    c = jax.lax.broadcasted_iota(jnp.int32, (Mq, Mk), 1)
    ok = r < 0                                           # all-False, right shape
    for b in range(n_batch):                             # n_batch is small & static
        ok = ok | (((r >= b * q_len) & (r < (b + 1) * q_len))
                   & ((c >= b * k_len) & (c < (b + 1) * k_len)))
    if causal:
        ok = ok & (c <= r)      # inside one block, flattened col<=row == causal
    return jnp.where(ok, 0.0, -1e30).astype(jnp.float32)[None]


def _mha(q, k, v, bias, num_heads):
    """Head-batched attention on flattened (rows = batch*seq) bf16 slabs.

    q: (Mq, E) bf16, k/v: (Mk, E) bf16, bias: (1, Mq, Mk) f32 additive (block-diag /
    causal / padding already folded in).  Per-head contexts are assembled with one
    lane concatenate; no VMEM scratch, no masked partial stores."""
    Mq, E = q.shape
    hd = E // num_heads
    scale = 1.0 / math.sqrt(hd)
    qh = jnp.stack([q[:, h * hd:(h + 1) * hd] for h in range(num_heads)], axis=0)
    kh = jnp.stack([k[:, h * hd:(h + 1) * hd] for h in range(num_heads)], axis=0)
    vh = jnp.stack([v[:, h * hd:(h + 1) * hd] for h in range(num_heads)], axis=0)
    s = jnp.einsum('hqd,hkd->hqk', qh, kh,
                   preferred_element_type=jnp.float32) * scale          # (H, Mq, Mk)
    s = s + bias                                                        # -1e30 masking
    s = s - jnp.max(s, axis=-1, keepdims=True)
    p = jnp.exp(s)
    p = p * pl.reciprocal(jnp.sum(p, axis=-1, keepdims=True), approx=True)
    ctx = jnp.einsum('hqk,hkd->hqd', p.astype(jnp.bfloat16), vh,
                     preferred_element_type=jnp.float32)                # (H, Mq, hd)
    return jnp.concatenate([ctx[h] for h in range(num_heads)], axis=-1)  # (Mq, E) f32


# --------------------------------- fused kernel ---------------------------------

def _transformer_kernel(pad_row_ref, x_ref, y_ref,
                        e_wqkv, e_bqkv, e_wo, e_bo,
                        e_w1, e_b1, e_w2, e_b2,
                        e_ln1, e_ln2, e_norm,
                        d_swqkv, d_sbqkv, d_swo, d_sbo,
                        d_cwqkv, d_cbqkv, d_cwo, d_cbo,
                        d_w1, d_b1, d_w2, d_b2,
                        d_ln1, d_ln2, d_ln3, d_norm,
                        fcw, fcb,
                        o_ref, *, num_heads, n_batch, src_len, trg_len):
    E = x_ref.shape[-1]
    Ms = n_batch * src_len
    Mt = n_batch * trg_len

    x = x_ref[...]                        # (N*Ls, E) f32 — whole batch, M-dim flattened
    y = y_ref[...]                        # (N*Lt, E) f32

    # masks built once per call, in-kernel (no per-step DMA)
    enc_bias = _block_bias(Ms, Ms, src_len, src_len, n_batch, False) \
        + pad_row_ref[...][None]          # + key-padding bias, broadcast over rows
    dec_bias = _block_bias(Mt, Mt, trg_len, trg_len, n_batch, True)
    crs_bias = _block_bias(Mt, Ms, trg_len, src_len, n_batch, False)
    # (reference model passes no memory_key_padding_mask, so cross-attn has no pad mask)

    # ------------------------------- encoder stack -------------------------------
    for l in range(e_wqkv.shape[0]):
        qkv = (_mm(x, e_wqkv[l]) + e_bqkv[l]).astype(jnp.bfloat16)      # (Ms, 3E)
        a = _mha(qkv[:, :E], qkv[:, E:2 * E], qkv[:, 2 * E:], enc_bias, num_heads)
        a = _mm(a, e_wo[l]) + e_bo[l]
        x = _ln_apply(x + a, e_ln1[l])
        h = jnp.maximum(_mm(x, e_w1[l]) + e_b1[l], 0.0).astype(jnp.bfloat16)
        f = _mm(h, e_w2[l]) + e_b2[l]
        x = _ln_apply(x + f, e_ln2[l])
    mem = _ln_apply(x, e_norm[...])                                     # final enc norm
    mem_b = mem.astype(jnp.bfloat16)      # cast once; memory never leaves VMEM

    # ------------------------------- decoder stack -------------------------------
    for l in range(d_swqkv.shape[0]):
        # masked self-attention
        qkv = (_mm(y, d_swqkv[l]) + d_sbqkv[l]).astype(jnp.bfloat16)    # (Mt, 3E)
        a = _mha(qkv[:, :E], qkv[:, E:2 * E], qkv[:, 2 * E:], dec_bias, num_heads)
        a = _mm(a, d_swo[l]) + d_sbo[l]
        y = _ln_apply(y + a, d_ln1[l])
        # cross-attention
        cw = d_cwqkv[l]
        cb = d_cbqkv[l]
        q = (_mm(y, cw[:, :E]) + cb[:, :E]).astype(jnp.bfloat16)        # (Mt, E)
        kv = (_mm(mem_b, cw[:, E:]) + cb[:, E:]).astype(jnp.bfloat16)   # (Ms, 2E)
        c = _mha(q, kv[:, :E], kv[:, E:], crs_bias, num_heads)
        c = _mm(c, d_cwo[l]) + d_cbo[l]
        y = _ln_apply(y + c, d_ln2[l])
        # feed-forward
        h = jnp.maximum(_mm(y, d_w1[l]) + d_b1[l], 0.0).astype(jnp.bfloat16)
        f = _mm(h, d_w2[l]) + d_b2[l]
        y = _ln_apply(y + f, d_ln3[l])

    y = _ln_apply(y, d_norm[...])                                       # final dec norm
    # lane-dense output projection: V is zero-padded to a multiple of 128 lanes
    o_ref[...] = _mm(y, fcw[...]) + fcb[...]


# --------------------------------- pallas wrapper --------------------------------

def _full_spec(a):
    nd = a.ndim
    return pl.BlockSpec(a.shape, lambda b, _nd=nd: (0,) * _nd)


def _run_transformer(enc, dec, fc_w, fc_b, x, y, pad_row, *,
                     num_heads, n_batch, src_len, trg_len):
    Vpad = fc_w.shape[-1]
    ops = [pad_row, x, y,
           enc["wqkv"], enc["bqkv"], enc["wo"], enc["bo"],
           enc["w1"], enc["b1"], enc["w2"], enc["b2"],
           enc["ln1"], enc["ln2"], enc["norm"],
           dec["swqkv"], dec["sbqkv"], dec["swo"], dec["sbo"],
           dec["cwqkv"], dec["cbqkv"], dec["cwo"], dec["cbo"],
           dec["w1"], dec["b1"], dec["w2"], dec["b2"],
           dec["ln1"], dec["ln2"], dec["ln3"], dec["norm"],
           fc_w, fc_b]
    return pl.pallas_call(
        functools.partial(_transformer_kernel, num_heads=num_heads,
                          n_batch=n_batch, src_len=src_len, trg_len=trg_len),
        grid=(1,),                      # collapsed: one step covers the whole batch
        out_shape=jax.ShapeDtypeStruct((n_batch * trg_len, Vpad), jnp.float32),
        in_specs=[_full_spec(a) for a in ops],
        out_specs=pl.BlockSpec((n_batch * trg_len, Vpad), lambda b: (0, 0)),
        compiler_params=pltpu.CompilerParams(dimension_semantics=("arbitrary",)),
    )(*ops)


@functools.partial(jax.jit, static_argnames=("num_heads", "src_pad_idx"))
def seq2seq_forward(params, src, trg, *, num_heads, src_pad_idx):
    """src, trg: (L, N) int32 (seq-major, PyTorch batch_first=False). Returns (Lt, N, V)."""
    Ls, N = src.shape
    Lt, _ = trg.shape
    pe = params["pe"]
    E = pe.shape[-1]

    # TODO(synk): nn.Dropout omitted (inference); embedding gather stays in XLA glue.
    x = (jnp.take(params["src_emb"], src.T, axis=0) + pe[None, :Ls, :]).reshape(N * Ls, E)
    y = (jnp.take(params["trg_emb"], trg.T, axis=0) + pe[None, :Lt, :]).reshape(N * Lt, E)

    # key-padding bias row for the flattened source rows (-1e30 keeps softmax NaN-free)
    pad_row = jnp.where(src.T.reshape(1, N * Ls) == src_pad_idx,
                        -1e30, 0.0).astype(jnp.float32)

    # lane-dense output projection: pad V up to a multiple of 128
    V = params["fc_w"].shape[-1]
    Vpad = ((V + 127) // 128) * 128
    fc_w = jnp.pad(params["fc_w"], ((0, 0), (0, Vpad - V)))
    fc_b = jnp.pad(params["fc_b"], ((0, 0), (0, Vpad - V)))

    logits = _run_transformer(params["enc"], params["dec"], fc_w, fc_b, x, y, pad_row,
                              num_heads=num_heads, n_batch=N, src_len=Ls, trg_len=Lt)
    logits = logits.reshape(N, Lt, Vpad)[:, :, :V]          # un-pad in XLA
    return jnp.transpose(logits, (1, 0, 2))                 # (Lt, N, V)


# ------------------------------ deterministic init ------------------------------

def make_keygen(seed):
    state = {"k": jax.random.PRNGKey(seed)}

    def nxt():
        state["k"], sub = jax.random.split(state["k"])
        return sub

    return nxt


def _w(kg, shape, scale=0.05, dtype=jnp.bfloat16):
    # matmul weights stored pre-transposed as (in, out) and in bf16
    return (scale * jax.random.normal(kg(), shape, jnp.float32)).astype(dtype)


def _ln_params(E):
    return jnp.stack([jnp.ones((E,), jnp.float32), jnp.zeros((E,), jnp.float32)])


def _ln_stack(nl, E):
    return jnp.tile(_ln_params(E)[None], (nl, 1, 1))


def _enc_params(kg, nl, E, F):
    return {
        "wqkv": _w(kg, (nl, E, 3 * E)), "bqkv": jnp.zeros((nl, 1, 3 * E), jnp.float32),
        "wo": _w(kg, (nl, E, E)), "bo": jnp.zeros((nl, 1, E), jnp.float32),
        "w1": _w(kg, (nl, E, F)), "b1": jnp.zeros((nl, 1, F), jnp.float32),
        "w2": _w(kg, (nl, F, E)), "b2": jnp.zeros((nl, 1, E), jnp.float32),
        "ln1": _ln_stack(nl, E), "ln2": _ln_stack(nl, E),
        "norm": _ln_params(E),
    }


def _dec_params(kg, nl, E, F):
    return {
        "swqkv": _w(kg, (nl, E, 3 * E)), "sbqkv": jnp.zeros((nl, 1, 3 * E), jnp.float32),
        "swo": _w(kg, (nl, E, E)), "sbo": jnp.zeros((nl, 1, E), jnp.float32),
        "cwqkv": _w(kg, (nl, E, 3 * E)), "cbqkv": jnp.zeros((nl, 1, 3 * E), jnp.float32),
        "cwo": _w(kg, (nl, E, E)), "cbo": jnp.zeros((nl, 1, E), jnp.float32),
        "w1": _w(kg, (nl, E, F)), "b1": jnp.zeros((nl, 1, F), jnp.float32),
        "w2": _w(kg, (nl, F, E)), "b2": jnp.zeros((nl, 1, E), jnp.float32),
        "ln1": _ln_stack(nl, E), "ln2": _ln_stack(nl, E), "ln3": _ln_stack(nl, E),
        "norm": _ln_params(E),
    }


def create_positional_encoding(max_len, E):
    pos = jnp.arange(max_len, dtype=jnp.float32)[:, None]
    div = jnp.exp(jnp.arange(0, E, 2, dtype=jnp.float32) * (-math.log(10000.0) / E))
    pe = jnp.zeros((max_len, E), jnp.float32)
    pe = pe.at[:, 0::2].set(jnp.sin(pos * div))
    pe = pe.at[:, 1::2].set(jnp.cos(pos * div))
    return pe


def init_params(seed, E, src_vocab, trg_vocab, num_enc, num_dec, F, max_len):
    kg = make_keygen(seed)
    return {
        "src_emb": _w(kg, (src_vocab, E), scale=1.0, dtype=jnp.float32),
        "trg_emb": _w(kg, (trg_vocab, E), scale=1.0, dtype=jnp.float32),
        "pe": create_positional_encoding(max_len, E),
        "enc": _enc_params(kg, num_enc, E, F),
        "dec": _dec_params(kg, num_dec, E, F),
        "fc_w": _w(kg, (E, trg_vocab)),
        "fc_b": jnp.zeros((1, trg_vocab), jnp.float32),
    }


# --------------------------------------- main -----------------------------------

if __name__ == "__main__":
    EMBED = 32          # embedding_size
    HEADS = 4           # num_heads
    FFN = 64            # forward_expansion (dim_feedforward)
    SRC_VOCAB = 50
    TRG_VOCAB = 60
    PAD_IDX = 1
    NUM_ENC = 2
    NUM_DEC = 2
    MAX_LEN = 16
    SRC_LEN, TRG_LEN, BATCH = 8, 8, 2

    params = init_params(42, EMBED, SRC_VOCAB, TRG_VOCAB, NUM_ENC, NUM_DEC, FFN, MAX_LEN)

    key = jax.random.PRNGKey(0)
    k_src, k_trg = jax.random.split(key)
    src = jax.random.randint(k_src, (SRC_LEN, BATCH), 0, SRC_VOCAB, dtype=jnp.int32)
    src = src.at[6:, 0].set(PAD_IDX)   # a couple of pad tokens to exercise the padding mask
    trg = jax.random.randint(k_trg, (TRG_LEN, BATCH), 0, TRG_VOCAB, dtype=jnp.int32)

    out = seq2seq_forward(params, src, trg, num_heads=HEADS, src_pad_idx=PAD_IDX)
    out = jax.block_until_ready(out)

    assert out.shape == (TRG_LEN, BATCH, TRG_VOCAB), out.shape
    assert bool(jnp.all(jnp.isfinite(out)))
    print("KERNEL_OK")
</pallas_src>

<mosaic_0001>
module attributes {stable_mosaic.version = 11 : i64} {
  func.func @_transformer_kernel(%arg0: i32, %arg1: memref<1x16xf32, #tpu.memory_space<vmem>>, %arg2: memref<16x32xf32, #tpu.memory_space<vmem>>, %arg3: memref<16x32xf32, #tpu.memory_space<vmem>>, %arg4: memref<2x32x96xbf16, #tpu.memory_space<vmem>>, %arg5: memref<2x1x96xf32, #tpu.memory_space<vmem>>, %arg6: memref<2x32x32xbf16, #tpu.memory_space<vmem>>, %arg7: memref<2x1x32xf32, #tpu.memory_space<vmem>>, %arg8: memref<2x32x64xbf16, #tpu.memory_space<vmem>>, %arg9: memref<2x1x64xf32, #tpu.memory_space<vmem>>, %arg10: memref<2x64x32xbf16, #tpu.memory_space<vmem>>, %arg11: memref<2x1x32xf32, #tpu.memory_space<vmem>>, %arg12: memref<2x2x32xf32, #tpu.memory_space<vmem>>, %arg13: memref<2x2x32xf32, #tpu.memory_space<vmem>>, %arg14: memref<2x32xf32, #tpu.memory_space<vmem>>, %arg15: memref<2x32x96xbf16, #tpu.memory_space<vmem>>, %arg16: memref<2x1x96xf32, #tpu.memory_space<vmem>>, %arg17: memref<2x32x32xbf16, #tpu.memory_space<vmem>>, %arg18: memref<2x1x32xf32, #tpu.memory_space<vmem>>, %arg19: memref<2x32x96xbf16, #tpu.memory_space<vmem>>, %arg20: memref<2x1x96xf32, #tpu.memory_space<vmem>>, %arg21: memref<2x32x32xbf16, #tpu.memory_space<vmem>>, %arg22: memref<2x1x32xf32, #tpu.memory_space<vmem>>, %arg23: memref<2x32x64xbf16, #tpu.memory_space<vmem>>, %arg24: memref<2x1x64xf32, #tpu.memory_space<vmem>>, %arg25: memref<2x64x32xbf16, #tpu.memory_space<vmem>>, %arg26: memref<2x1x32xf32, #tpu.memory_space<vmem>>, %arg27: memref<2x2x32xf32, #tpu.memory_space<vmem>>, %arg28: memref<2x2x32xf32, #tpu.memory_space<vmem>>, %arg29: memref<2x2x32xf32, #tpu.memory_space<vmem>>, %arg30: memref<2x32xf32, #tpu.memory_space<vmem>>, %arg31: memref<32x128xbf16, #tpu.memory_space<vmem>>, %arg32: memref<1x128xf32, #tpu.memory_space<vmem>>, %arg33: memref<16x128xf32, #tpu.memory_space<vmem>>) attributes {dimension_semantics = [#tpu.dimension_semantics<arbitrary>], iteration_bounds = array<i64: 1>, scalar_prefetch = 0 : i64, scratch_operands = 0 : i64, tpu.core_type = #tpu.core_type<tc>, window_params = [{pipeline_mode = #tpu.pipeline_mode<synchronous>, transform_indices = @transform_0, window_bounds = array<i64: 1, 16>}, {pipeline_mode = #tpu.pipeline_mode<synchronous>, transform_indices = @transform_1, window_bounds = array<i64: 16, 32>}, {pipeline_mode = #tpu.pipeline_mode<synchronous>, transform_indices = @transform_2, window_bounds = array<i64: 16, 32>}, {pipeline_mode = #tpu.pipeline_mode<synchronous>, transform_indices = @transform_3, window_bounds = array<i64: 2, 32, 96>}, {pipeline_mode = #tpu.pipeline_mode<synchronous>, transform_indices = @transform_4, window_bounds = array<i64: 2, 1, 96>}, {pipeline_mode = #tpu.pipeline_mode<synchronous>, transform_indices = @transform_5, window_bounds = array<i64: 2, 32, 32>}, {pipeline_mode = #tpu.pipeline_mode<synchronous>, transform_indices = @transform_6, window_bounds = array<i64: 2, 1, 32>}, {pipeline_mode = #tpu.pipeline_mode<synchronous>, transform_indices = @transform_7, window_bounds = array<i64: 2, 32, 64>}, {pipeline_mode = #tpu.pipeline_mode<synchronous>, transform_indices = @transform_8, window_bounds = array<i64: 2, 1, 64>}, {pipeline_mode = #tpu.pipeline_mode<synchronous>, transform_indices = @transform_9, window_bounds = array<i64: 2, 64, 32>}, {pipeline_mode = #tpu.pipeline_mode<synchronous>, transform_indices = @transform_10, window_bounds = array<i64: 2, 1, 32>}, {pipeline_mode = #tpu.pipeline_mode<synchronous>, transform_indices = @transform_11, window_bounds = array<i64: 2, 2, 32>}, {pipeline_mode = #tpu.pipeline_mode<synchronous>, transform_indices = @transform_12, window_bounds = array<i64: 2, 2, 32>}, {pipeline_mode = #tpu.pipeline_mode<synchronous>, transform_indices = @transform_13, window_bounds = array<i64: 2, 32>}, {pipeline_mode = #tpu.pipeline_mode<synchronous>, transform_indices = @transform_14, window_bounds = array<i64: 2, 32, 96>}, {pipeline_mode = #tpu.pipeline_mode<synchronous>, transform_indices = @transform_15, window_bounds = array<i64: 2, 1, 96>}, {pipeline_mode = #tpu.pipeline_mode<synchronous>, transform_indices = @transform_16, window_bounds = array<i64: 2, 32, 32>}, {pipeline_mode = #tpu.pipeline_mode<synchronous>, transform_indices = @transform_17, window_bounds = array<i64: 2, 1, 32>}, {pipeline_mode = #tpu.pipeline_mode<synchronous>, transform_indices = @transform_18, window_bounds = array<i64: 2, 32, 96>}, {pipeline_mode = #tpu.pipeline_mode<synchronous>, transform_indices = @transform_19, window_bounds = array<i64: 2, 1, 96>}, {pipeline_mode = #tpu.pipeline_mode<synchronous>, transform_indices = @transform_20, window_bounds = array<i64: 2, 32, 32>}, {pipeline_mode = #tpu.pipeline_mode<synchronous>, transform_indices = @transform_21, window_bounds = array<i64: 2, 1, 32>}, {pipeline_mode = #tpu.pipeline_mode<synchronous>, transform_indices = @transform_22, window_bounds = array<i64: 2, 32, 64>}, {pipeline_mode = #tpu.pipeline_mode<synchronous>, transform_indices = @transform_23, window_bounds = array<i64: 2, 1, 64>}, {pipeline_mode = #tpu.pipeline_mode<synchronous>, transform_indices = @transform_24, window_bounds = array<i64: 2, 64, 32>}, {pipeline_mode = #tpu.pipeline_mode<synchronous>, transform_indices = @transform_25, window_bounds = array<i64: 2, 1, 32>}, {pipeline_mode = #tpu.pipeline_mode<synchronous>, transform_indices = @transform_26, window_bounds = array<i64: 2, 2, 32>}, {pipeline_mode = #tpu.pipeline_mode<synchronous>, transform_indices = @transform_27, window_bounds = array<i64: 2, 2, 32>}, {pipeline_mode = #tpu.pipeline_mode<synchronous>, transform_indices = @transform_28, window_bounds = array<i64: 2, 2, 32>}, {pipeline_mode = #tpu.pipeline_mode<synchronous>, transform_indices = @transform_29, window_bounds = array<i64: 2, 32>}, {pipeline_mode = #tpu.pipeline_mode<synchronous>, transform_indices = @transform_30, window_bounds = array<i64: 32, 128>}, {pipeline_mode = #tpu.pipeline_mode<synchronous>, transform_indices = @transform_31, window_bounds = array<i64: 1, 128>}, {pipeline_mode = #tpu.pipeline_mode<synchronous>, transform_indices = @transform_32, window_bounds = array<i64: 16, 128>}]} {
    %c0 = arith.constant 0 : index
    %c0_0 = arith.constant 0 : index
    %0 = vector.load %arg2[%c0, %c0_0] : memref<16x32xf32, #tpu.memory_space<vmem>>, vector<16x32xf32>
    %c0_1 = arith.constant 0 : index
    %c0_2 = arith.constant 0 : index
    %1 = vector.load %arg3[%c0_1, %c0_2] : memref<16x32xf32, #tpu.memory_space<vmem>>, vector<16x32xf32>
    %2 = tpu.iota {dimensions = array<i32: 0>} : vector<16x16xi32>
    %3 = tpu.iota {dimensions = array<i32: 1>} : vector<16x16xi32>
    %c0_i32 = arith.constant 0 : i32
    %4 = vector.broadcast %c0_i32 : i32 to vector<16x16xi32>
    %5 = arith.cmpi slt, %2, %4 : vector<16x16xi32>
    %c0_i32_3 = arith.constant 0 : i32
    %6 = vector.broadcast %c0_i32_3 : i32 to vector<16x16xi32>
    %7 = arith.cmpi sge, %2, %6 : vector<16x16xi32>
    %c8_i32 = arith.constant 8 : i32
    %8 = vector.broadcast %c8_i32 : i32 to vector<16x16xi32>
    %9 = arith.cmpi slt, %2, %8 : vector<16x16xi32>
    %10 = arith.andi %7, %9 : vector<16x16xi1>
    %c0_i32_4 = arith.constant 0 : i32
    %11 = vector.broadcast %c0_i32_4 : i32 to vector<16x16xi32>
    %12 = arith.cmpi sge, %3, %11 : vector<16x16xi32>
    %c8_i32_5 = arith.constant 8 : i32
    %13 = vector.broadcast %c8_i32_5 : i32 to vector<16x16xi32>
    %14 = arith.cmpi slt, %3, %13 : vector<16x16xi32>
    %15 = arith.andi %12, %14 : vector<16x16xi1>
    %16 = arith.andi %10, %15 : vector<16x16xi1>
    %17 = arith.ori %5, %16 : vector<16x16xi1>
    %c8_i32_6 = arith.constant 8 : i32
    %18 = vector.broadcast %c8_i32_6 : i32 to vector<16x16xi32>
    %19 = arith.cmpi sge, %2, %18 : vector<16x16xi32>
    %c16_i32 = arith.constant 16 : i32
    %20 = vector.broadcast %c16_i32 : i32 to vector<16x16xi32>
    %21 = arith.cmpi slt, %2, %20 : vector<16x16xi32>
    %22 = arith.andi %19, %21 : vector<16x16xi1>
    %c8_i32_7 = arith.constant 8 : i32
    %23 = vector.broadcast %c8_i32_7 : i32 to vector<16x16xi32>
    %24 = arith.cmpi sge, %3, %23 : vector<16x16xi32>
    %c16_i32_8 = arith.constant 16 : i32
    %25 = vector.broadcast %c16_i32_8 : i32 to vector<16x16xi32>
    %26 = arith.cmpi slt, %3, %25 : vector<16x16xi32>
    %27 = arith.andi %24, %26 : vector<16x16xi1>
    %28 = arith.andi %22, %27 : vector<16x16xi1>
    %29 = arith.ori %17, %28 : vector<16x16xi1>
    %cst = arith.constant 0.000000e+00 : f32
    %cst_9 = arith.constant -1.000000e+30 : f32
    %30 = vector.broadcast %cst : f32 to vector<16x16xf32>
    %31 = vector.broadcast %cst_9 : f32 to vector<16x16xf32>
    %32 = arith.select %29, %30, %31 : vector<16x16xi1>, vector<16x16xf32>
    %33 = vector.shape_cast %32 : vector<16x16xf32> to vector<1x16x16xf32>
    %c0_10 = arith.constant 0 : index
    %c0_11 = arith.constant 0 : index
    %34 = vector.load %arg1[%c0_10, %c0_11] : memref<1x16xf32, #tpu.memory_space<vmem>>, vector<1x16xf32>
    %35 = vector.shape_cast %34 : vector<1x16xf32> to vector<1x1x16xf32>
    %36 = vector.broadcast %35 : vector<1x1x16xf32> to vector<1x16x16xf32>
    %37 = arith.addf %33, %36 : vector<1x16x16xf32>
    %38 = tpu.iota {dimensions = array<i32: 0>} : vector<16x16xi32>
    %39 = tpu.iota {dimensions = array<i32: 1>} : vector<16x16xi32>
    %c0_i32_12 = arith.constant 0 : i32
    %40 = vector.broadcast %c0_i32_12 : i32 to vector<16x16xi32>
    %41 = arith.cmpi slt, %38, %40 : vector<16x16xi32>
    %c0_i32_13 = arith.constant 0 : i32
    %42 = vector.broadcast %c0_i32_13 : i32 to vector<16x16xi32>
    %43 = arith.cmpi sge, %38, %42 : vector<16x16xi32>
    %c8_i32_14 = arith.constant 8 : i32
    %44 = vector.broadcast %c8_i32_14 : i32 to vector<16x16xi32>
    %45 = arith.cmpi slt, %38, %44 : vector<16x16xi32>
    %46 = arith.andi %43, %45 : vector<16x16xi1>
    %c0_i32_15 = arith.constant 0 : i32
    %47 = vector.broadcast %c0_i32_15 : i32 to vector<16x16xi32>
    %48 = arith.cmpi sge, %39, %47 : vector<16x16xi32>
    %c8_i32_16 = arith.constant 8 : i32
    %49 = vector.broadcast %c8_i32_16 : i32 to vector<16x16xi32>
    %50 = arith.cmpi slt, %39, %49 : vector<16x16xi32>
    %51 = arith.andi %48, %50 : vector<16x16xi1>
    %52 = arith.andi %46, %51 : vector<16x16xi1>
    %53 = arith.ori %41, %52 : vector<16x16xi1>
    %c8_i32_17 = arith.constant 8 : i32
    %54 = vector.broadcast %c8_i32_17 : i32 to vector<16x16xi32>
    %55 = arith.cmpi sge, %38, %54 : vector<16x16xi32>
    %c16_i32_18 = arith.constant 16 : i32
    %56 = vector.broadcast %c16_i32_18 : i32 to vector<16x16xi32>
    %57 = arith.cmpi slt, %38, %56 : vector<16x16xi32>
    %58 = arith.andi %55, %57 : vector<16x16xi1>
    %c8_i32_19 = arith.constant 8 : i32
    %59 = vector.broadcast %c8_i32_19 : i32 to vector<16x16xi32>
    %60 = arith.cmpi sge, %39, %59 : vector<16x16xi32>
    %c16_i32_20 = arith.constant 16 : i32
    %61 = vector.broadcast %c16_i32_20 : i32 to vector<16x16xi32>
    %62 = arith.cmpi slt, %39, %61 : vector<16x16xi32>
    %63 = arith.andi %60, %62 : vector<16x16xi1>
    %64 = arith.andi %58, %63 : vector<16x16xi1>
    %65 = arith.ori %53, %64 : vector<16x16xi1>
    %66 = arith.cmpi sle, %39, %38 : vector<16x16xi32>
    %67 = arith.andi %65, %66 : vector<16x16xi1>
    %cst_21 = arith.constant 0.000000e+00 : f32
    %cst_22 = arith.constant -1.000000e+30 : f32
    %68 = vector.broadcast %cst_21 : f32 to vector<16x16xf32>
    %69 = vector.broadcast %cst_22 : f32 to vector<16x16xf32>
    %70 = arith.select %67, %68, %69 : vector<16x16xi1>, vector<16x16xf32>
    %71 = vector.shape_cast %70 : vector<16x16xf32> to vector<1x16x16xf32>
    %72 = tpu.iota {dimensions = array<i32: 0>} : vector<16x16xi32>
    %73 = tpu.iota {dimensions = array<i32: 1>} : vector<16x16xi32>
    %c0_i32_23 = arith.constant 0 : i32
    %74 = vector.broadcast %c0_i32_23 : i32 to vector<16x16xi32>
    %75 = arith.cmpi slt, %72, %74 : vector<16x16xi32>
    %c0_i32_24 = arith.constant 0 : i32
    %76 = vector.broadcast %c0_i32_24 : i32 to vector<16x16xi32>
    %77 = arith.cmpi sge, %72, %76 : vector<16x16xi32>
    %c8_i32_25 = arith.constant 8 : i32
    %78 = vector.broadcast %c8_i32_25 : i32 to vector<16x16xi32>
    %79 = arith.cmpi slt, %72, %78 : vector<16x16xi32>
    %80 = arith.andi %77, %79 : vector<16x16xi1>
    %c0_i32_26 = arith.constant 0 : i32
    %81 = vector.broadcast %c0_i32_26 : i32 to vector<16x16xi32>
    %82 = arith.cmpi sge, %73, %81 : vector<16x16xi32>
    %c8_i32_27 = arith.constant 8 : i32
    %83 = vector.broadcast %c8_i32_27 : i32 to vector<16x16xi32>
    %84 = arith.cmpi slt, %73, %83 : vector<16x16xi32>
    %85 = arith.andi %82, %84 : vector<16x16xi1>
    %86 = arith.andi %80, %85 : vector<16x16xi1>
    %87 = arith.ori %75, %86 : vector<16x16xi1>
    %c8_i32_28 = arith.constant 8 : i32
    %88 = vector.broadcast %c8_i32_28 : i32 to vector<16x16xi32>
    %89 = arith.cmpi sge, %72, %88 : vector<16x16xi32>
    %c16_i32_29 = arith.constant 16 : i32
    %90 = vector.broadcast %c16_i32_29 : i32 to vector<16x16xi32>
    %91 = arith.cmpi slt, %72, %90 : vector<16x16xi32>
    %92 = arith.andi %89, %91 : vector<16x16xi1>
    %c8_i32_30 = arith.constant 8 : i32
    %93 = vector.broadcast %c8_i32_30 : i32 to vector<16x16xi32>
    %94 = arith.cmpi sge, %73, %93 : vector<16x16xi32>
    %c16_i32_31 = arith.constant 16 : i32
    %95 = vector.broadcast %c16_i32_31 : i32 to vector<16x16xi32>
    %96 = arith.cmpi slt, %73, %95 : vector<16x16xi32>
    %97 = arith.andi %94, %96 : vector<16x16xi1>
    %98 = arith.andi %92, %97 : vector<16x16xi1>
    %99 = arith.ori %87, %98 : vector<16x16xi1>
    %cst_32 = arith.constant 0.000000e+00 : f32
    %cst_33 = arith.constant -1.000000e+30 : f32
    %100 = vector.broadcast %cst_32 : f32 to vector<16x16xf32>
    %101 = vector.broadcast %cst_33 : f32 to vector<16x16xf32>
    %102 = arith.select %99, %100, %101 : vector<16x16xi1>, vector<16x16xf32>
    %103 = vector.shape_cast %102 : vector<16x16xf32> to vector<1x16x16xf32>
    %c0_34 = arith.constant 0 : index
    %c0_35 = arith.constant 0 : index
    %c0_36 = arith.constant 0 : index
    %104 = vector.load %arg4[%c0_34, %c0_35, %c0_36] : memref<2x32x96xbf16, #tpu.memory_space<vmem>>, vector<1x32x96xbf16>
    %105 = vector.shape_cast %104 : vector<1x32x96xbf16> to vector<32x96xbf16>
    %106 = arith.truncf %0 : vector<16x32xf32> to vector<16x32xbf16>
    %cst_37 = arith.constant dense<0.000000e+00> : vector<16x96xf32>
    %107 = tpu.matmul %106, %105, %cst_37 {dimension_numbers = #tpu.dot_dimension_numbers<[1], [0], [0], [1], [0, 0, 1, 1], [], []>} : vector<16x32xbf16>, vector<32x96xbf16>, vector<16x96xf32> -> vector<16x96xf32>
    %c0_38 = arith.constant 0 : index
    %c0_39 = arith.constant 0 : index
    %c0_40 = arith.constant 0 : index
    %108 = vector.load %arg5[%c0_38, %c0_39, %c0_40] : memref<2x1x96xf32, #tpu.memory_space<vmem>>, vector<1x1x96xf32>
    %109 = vector.shape_cast %108 : vector<1x1x96xf32> to vector<1x96xf32>
    %110 = vector.broadcast %109 : vector<1x96xf32> to vector<16x96xf32>
    %111 = arith.addf %107, %110 : vector<16x96xf32>
    %112 = arith.truncf %111 : vector<16x96xf32> to vector<16x96xbf16>
    %113 = vector.extract_strided_slice %112 {offsets = [0, 0], sizes = [16, 32], strides = [1, 1]} : vector<16x96xbf16> to vector<16x32xbf16>
    %114 = vector.extract_strided_slice %112 {offsets = [0, 32], sizes = [16, 32], strides = [1, 1]} : vector<16x96xbf16> to vector<16x32xbf16>
    %115 = vector.extract_strided_slice %112 {offsets = [0, 64], sizes = [16, 32], strides = [1, 1]} : vector<16x96xbf16> to vector<16x32xbf16>
    %116 = vector.extract_strided_slice %113 {offsets = [0, 0], sizes = [16, 8], strides = [1, 1]} : vector<16x32xbf16> to vector<16x8xbf16>
    %117 = vector.extract_strided_slice %113 {offsets = [0, 8], sizes = [16, 8], strides = [1, 1]} : vector<16x32xbf16> to vector<16x8xbf16>
    %118 = vector.extract_strided_slice %113 {offsets = [0, 16], sizes = [16, 8], strides = [1, 1]} : vector<16x32xbf16> to vector<16x8xbf16>
    %119 = vector.extract_strided_slice %113 {offsets = [0, 24], sizes = [16, 8], strides = [1, 1]} : vector<16x32xbf16> to vector<16x8xbf16>
    %120 = vector.shape_cast %116 : vector<16x8xbf16> to vector<1x16x8xbf16>
    %121 = vector.shape_cast %117 : vector<16x8xbf16> to vector<1x16x8xbf16>
    %122 = vector.shape_cast %118 : vector<16x8xbf16> to vector<1x16x8xbf16>
    %123 = vector.shape_cast %119 : vector<16x8xbf16> to vector<1x16x8xbf16>
    %124 = tpu.concatenate %120, %121, %122, %123 in 0 : vector<1x16x8xbf16>, vector<1x16x8xbf16>, vector<1x16x8xbf16>, vector<1x16x8xbf16> -> vector<4x16x8xbf16>
    %125 = vector.extract_strided_slice %114 {offsets = [0, 0], sizes = [16, 8], strides = [1, 1]} : vector<16x32xbf16> to vector<16x8xbf16>
    %126 = vector.extract_strided_slice %114 {offsets = [0, 8], sizes = [16, 8], strides = [1, 1]} : vector<16x32xbf16> to vector<16x8xbf16>
    %127 = vector.extract_strided_slice %114 {offsets = [0, 16], sizes = [16, 8], strides = [1, 1]} : vector<16x32xbf16> to vector<16x8xbf16>
    %128 = vector.extract_strided_slice %114 {offsets = [0, 24], sizes = [16, 8], strides = [1, 1]} : vector<16x32xbf16> to vector<16x8xbf16>
    %129 = vector.shape_cast %125 : vector<16x8xbf16> to vector<1x16x8xbf16>
    %130 = vector.shape_cast %126 : vector<16x8xbf16> to vector<1x16x8xbf16>
    %131 = vector.shape_cast %127 : vector<16x8xbf16> to vector<1x16x8xbf16>
    %132 = vector.shape_cast %128 : vector<16x8xbf16> to vector<1x16x8xbf16>
    %133 = tpu.concatenate %129, %130, %131, %132 in 0 : vector<1x16x8xbf16>, vector<1x16x8xbf16>, vector<1x16x8xbf16>, vector<1x16x8xbf16> -> vector<4x16x8xbf16>
    %134 = vector.extract_strided_slice %115 {offsets = [0, 0], sizes = [16, 8], strides = [1, 1]} : vector<16x32xbf16> to vector<16x8xbf16>
    %135 = vector.extract_strided_slice %115 {offsets = [0, 8], sizes = [16, 8], strides = [1, 1]} : vector<16x32xbf16> to vector<16x8xbf16>
    %136 = vector.extract_strided_slice %115 {offsets = [0, 16], sizes = [16, 8], strides = [1, 1]} : vector<16x32xbf16> to vector<16x8xbf16>
    %137 = vector.extract_strided_slice %115 {offsets = [0, 24], sizes = [16, 8], strides = [1, 1]} : vector<16x32xbf16> to vector<16x8xbf16>
    %138 = vector.shape_cast %134 : vector<16x8xbf16> to vector<1x16x8xbf16>
    %139 = vector.shape_cast %135 : vector<16x8xbf16> to vector<1x16x8xbf16>
    %140 = vector.shape_cast %136 : vector<16x8xbf16> to vector<1x16x8xbf16>
    %141 = vector.shape_cast %137 : vector<16x8xbf16> to vector<1x16x8xbf16>
    %142 = tpu.concatenate %138, %139, %140, %141 in 0 : vector<1x16x8xbf16>, vector<1x16x8xbf16>, vector<1x16x8xbf16>, vector<1x16x8xbf16> -> vector<4x16x8xbf16>
    "tpu.trace_start"() <{level = 10 : i32, message = "hqd,hkd->hqk"}> : () -> ()
    %cst_41 = arith.constant dense<0.000000e+00> : vector<4x16x16xf32>
    %143 = tpu.matmul %124, %133, %cst_41 {dimension_numbers = #tpu.dot_dimension_numbers<[2], [2], [1], [1], [0, 0, 0, 1, 1, 1], [0], [0]>} : vector<4x16x8xbf16>, vector<4x16x8xbf16>, vector<4x16x16xf32> -> vector<4x16x16xf32>
    "tpu.trace_stop"() : () -> ()
    %cst_42 = arith.constant 0.353553385 : f32
    %144 = vector.broadcast %cst_42 : f32 to vector<4x16x16xf32>
    %145 = arith.mulf %143, %144 : vector<4x16x16xf32>
    %146 = vector.broadcast %37 : vector<1x16x16xf32> to vector<4x16x16xf32>
    %147 = arith.addf %145, %146 : vector<4x16x16xf32>
    %cst_43 = arith.constant dense<0xFF800000> : vector<4x16xf32>
    %148 = vector.multi_reduction <maximumf>, %147, %cst_43 [2] : vector<4x16x16xf32> to vector<4x16xf32>
    %149 = vector.shape_cast %148 : vector<4x16xf32> to vector<4x16x1xf32>
    %150 = vector.broadcast %149 : vector<4x16x1xf32> to vector<4x16x16xf32>
    %151 = arith.subf %147, %150 : vector<4x16x16xf32>
    %152 = math.exp %151 : vector<4x16x16xf32>
    %cst_44 = arith.constant dense<0.000000e+00> : vector<4x16xf32>
    %153 = vector.multi_reduction <add>, %152, %cst_44 [2] : vector<4x16x16xf32> to vector<4x16xf32>
    %154 = vector.shape_cast %153 : vector<4x16xf32> to vector<4x16x1xf32>
    %155 = tpu.reciprocal %154 {approx = true} : vector<4x16x1xf32> -> vector<4x16x1xf32>
    %156 = vector.broadcast %155 : vector<4x16x1xf32> to vector<4x16x16xf32>
    %157 = arith.mulf %152, %156 : vector<4x16x16xf32>
    %158 = arith.truncf %157 : vector<4x16x16xf32> to vector<4x16x16xbf16>
    "tpu.trace_start"() <{level = 10 : i32, message = "hqk,hkd->hqd"}> : () -> ()
    %cst_45 = arith.constant dense<0.000000e+00> : vector<4x16x8xf32>
    %159 = tpu.matmul %158, %142, %cst_45 {dimension_numbers = #tpu.dot_dimension_numbers<[2], [1], [1], [2], [0, 0, 0, 1, 1, 2], [0], [0]>} : vector<4x16x16xbf16>, vector<4x16x8xbf16>, vector<4x16x8xf32> -> vector<4x16x8xf32>
    "tpu.trace_stop"() : () -> ()
    %160 = vector.extract_strided_slice %159 {offsets = [0, 0, 0], sizes = [1, 16, 8], strides = [1, 1, 1]} : vector<4x16x8xf32> to vector<1x16x8xf32>
    %161 = vector.shape_cast %160 : vector<1x16x8xf32> to vector<16x8xf32>
    %162 = vector.extract_strided_slice %159 {offsets = [1, 0, 0], sizes = [1, 16, 8], strides = [1, 1, 1]} : vector<4x16x8xf32> to vector<1x16x8xf32>
    %163 = vector.shape_cast %162 : vector<1x16x8xf32> to vector<16x8xf32>
    %164 = vector.extract_strided_slice %159 {offsets = [2, 0, 0], sizes = [1, 16, 8], strides = [1, 1, 1]} : vector<4x16x8xf32> to vector<1x16x8xf32>
    %165 = vector.shape_cast %164 : vector<1x16x8xf32> to vector<16x8xf32>
    %166 = vector.extract_strided_slice %159 {offsets = [3, 0, 0], sizes = [1, 16, 8], strides = [1, 1, 1]} : vector<4x16x8xf32> to vector<1x16x8xf32>
    %167 = vector.shape_cast %166 : vector<1x16x8xf32> to vector<16x8xf32>
    %168 = tpu.concatenate %161, %163, %165, %167 in 1 : vector<16x8xf32>, vector<16x8xf32>, vector<16x8xf32>, vector<16x8xf32> -> vector<16x32xf32>
    %c0_46 = arith.constant 0 : index
    %c0_47 = arith.constant 0 : index
    %c0_48 = arith.constant 0 : index
    %169 = vector.load %arg6[%c0_46, %c0_47, %c0_48] : memref<2x32x32xbf16, #tpu.memory_space<vmem>>, vector<1x32x32xbf16>
    %170 = vector.shape_cast %169 : vector<1x32x32xbf16> to vector<32x32xbf16>
    %171 = arith.truncf %168 : vector<16x32xf32> to vector<16x32xbf16>
    %cst_49 = arith.constant dense<0.000000e+00> : vector<16x32xf32>
    %172 = tpu.matmul %171, %170, %cst_49 {dimension_numbers = #tpu.dot_dimension_numbers<[1], [0], [0], [1], [0, 0, 1, 1], [], []>} : vector<16x32xbf16>, vector<32x32xbf16>, vector<16x32xf32> -> vector<16x32xf32>
    %c0_50 = arith.constant 0 : index
    %c0_51 = arith.constant 0 : index
    %c0_52 = arith.constant 0 : index
    %173 = vector.load %arg7[%c0_50, %c0_51, %c0_52] : memref<2x1x32xf32, #tpu.memory_space<vmem>>, vector<1x1x32xf32>
    %174 = vector.shape_cast %173 : vector<1x1x32xf32> to vector<1x32xf32>
    %175 = vector.broadcast %174 : vector<1x32xf32> to vector<16x32xf32>
    %176 = arith.addf %172, %175 : vector<16x32xf32>
    %177 = arith.addf %0, %176 : vector<16x32xf32>
    %c0_53 = arith.constant 0 : index
    %c0_54 = arith.constant 0 : index
    %c0_55 = arith.constant 0 : index
    %178 = vector.load %arg12[%c0_53, %c0_54, %c0_55] : memref<2x2x32xf32, #tpu.memory_space<vmem>>, vector<1x2x32xf32>
    %179 = vector.shape_cast %178 : vector<1x2x32xf32> to vector<2x32xf32>
    %180 = vector.extract_strided_slice %179 {offsets = [0, 0], sizes = [1, 32], strides = [1, 1]} : vector<2x32xf32> to vector<1x32xf32>
    %181 = vector.extract_strided_slice %179 {offsets = [1, 0], sizes = [1, 32], strides = [1, 1]} : vector<2x32xf32> to vector<1x32xf32>
    %cst_56 = arith.constant dense<0.000000e+00> : vector<16xf32>
    %182 = vector.multi_reduction <add>, %177, %cst_56 [1] : vector<16x32xf32> to vector<16xf32>
    %183 = vector.shape_cast %182 : vector<16xf32> to vector<16x1xf32>
    %cst_57 = arith.constant 3.200000e+01 : f32
    %184 = vector.broadcast %cst_57 : f32 to vector<16x1xf32>
    %185 = arith.divf %183, %184 : vector<16x1xf32>
    %186 = vector.broadcast %185 : vector<16x1xf32> to vector<16x32xf32>
    %187 = arith.subf %177, %186 : vector<16x32xf32>
    %188 = arith.mulf %187, %187 : vector<16x32xf32>
    %cst_58 = arith.constant dense<0.000000e+00> : vector<16xf32>
    %189 = vector.multi_reduction <add>, %188, %cst_58 [1] : vector<16x32xf32> to vector<16xf32>
    %190 = vector.shape_cast %189 : vector<16xf32> to vector<16x1xf32>
    %cst_59 = arith.constant 3.200000e+01 : f32
    %191 = vector.broadcast %cst_59 : f32 to vector<16x1xf32>
    %192 = arith.divf %190, %191 : vector<16x1xf32>
    %193 = vector.broadcast %185 : vector<16x1xf32> to vector<16x32xf32>
    %194 = arith.subf %177, %193 : vector<16x32xf32>
    %cst_60 = arith.constant 9.99999974E-6 : f32
    %195 = vector.broadcast %cst_60 : f32 to vector<16x1xf32>
    %196 = arith.addf %192, %195 : vector<16x1xf32>
    %197 = math.rsqrt %196 : vector<16x1xf32>
    %198 = vector.broadcast %197 : vector<16x1xf32> to vector<16x32xf32>
    %199 = arith.mulf %194, %198 : vector<16x32xf32>
    %200 = vector.broadcast %180 : vector<1x32xf32> to vector<16x32xf32>
    %201 = arith.mulf %199, %200 : vector<16x32xf32>
    %202 = vector.broadcast %181 : vector<1x32xf32> to vector<16x32xf32>
    %203 = arith.addf %201, %202 : vector<16x32xf32>
    %c0_61 = arith.constant 0 : index
    %c0_62 = arith.constant 0 : index
    %c0_63 = arith.constant 0 : index
    %204 = vector.load %arg8[%c0_61, %c0_62, %c0_63] : memref<2x32x64xbf16, #tpu.memory_space<vmem>>, vector<1x32x64xbf16>
    %205 = vector.shape_cast %204 : vector<1x32x64xbf16> to vector<32x64xbf16>
    %206 = arith.truncf %203 : vector<16x32xf32> to vector<16x32xbf16>
    %cst_64 = arith.constant dense<0.000000e+00> : vector<16x64xf32>
    %207 = tpu.matmul %206, %205, %cst_64 {dimension_numbers = #tpu.dot_dimension_numbers<[1], [0], [0], [1], [0, 0, 1, 1], [], []>} : vector<16x32xbf16>, vector<32x64xbf16>, vector<16x64xf32> -> vector<16x64xf32>
    %c0_65 = arith.constant 0 : index
    %c0_66 = arith.constant 0 : index
    %c0_67 = arith.constant 0 : index
    %208 = vector.load %arg9[%c0_65, %c0_66, %c0_67] : memref<2x1x64xf32, #tpu.memory_space<vmem>>, vector<1x1x64xf32>
    %209 = vector.shape_cast %208 : vector<1x1x64xf32> to vector<1x64xf32>
    %210 = vector.broadcast %209 : vector<1x64xf32> to vector<16x64xf32>
    %211 = arith.addf %207, %210 : vector<16x64xf32>
    %cst_68 = arith.constant 0.000000e+00 : f32
    %212 = vector.broadcast %cst_68 : f32 to vector<16x64xf32>
    %213 = arith.maximumf %211, %212 : vector<16x64xf32>
    %214 = arith.truncf %213 : vector<16x64xf32> to vector<16x64xbf16>
    %c0_69 = arith.constant 0 : index
    %c0_70 = arith.constant 0 : index
    %c0_71 = arith.constant 0 : index
    %215 = vector.load %arg10[%c0_69, %c0_70, %c0_71] : memref<2x64x32xbf16, #tpu.memory_space<vmem>>, vector<1x64x32xbf16>
    %216 = vector.shape_cast %215 : vector<1x64x32xbf16> to vector<64x32xbf16>
    %cst_72 = arith.constant dense<0.000000e+00> : vector<16x32xf32>
    %217 = tpu.matmul %214, %216, %cst_72 {dimension_numbers = #tpu.dot_dimension_numbers<[1], [0], [0], [1], [0, 0, 1, 1], [], []>} : vector<16x64xbf16>, vector<64x32xbf16>, vector<16x32xf32> -> vector<16x32xf32>
    %c0_73 = arith.constant 0 : index
    %c0_74 = arith.constant 0 : index
    %c0_75 = arith.constant 0 : index
    %218 = vector.load %arg11[%c0_73, %c0_74, %c0_75] : memref<2x1x32xf32, #tpu.memory_space<vmem>>, vector<1x1x32xf32>
    %219 = vector.shape_cast %218 : vector<1x1x32xf32> to vector<1x32xf32>
    %220 = vector.broadcast %219 : vector<1x32xf32> to vector<16x32xf32>
    %221 = arith.addf %217, %220 : vector<16x32xf32>
    %222 = arith.addf %203, %221 : vector<16x32xf32>
    %c0_76 = arith.constant 0 : index
    %c0_77 = arith.constant 0 : index
    %c0_78 = arith.constant 0 : index
    %223 = vector.load %arg13[%c0_76, %c0_77, %c0_78] : memref<2x2x32xf32, #tpu.memory_space<vmem>>, vector<1x2x32xf32>
    %224 = vector.shape_cast %223 : vector<1x2x32xf32> to vector<2x32xf32>
    %225 = vector.extract_strided_slice %224 {offsets = [0, 0], sizes = [1, 32], strides = [1, 1]} : vector<2x32xf32> to vector<1x32xf32>
    %226 = vector.extract_strided_slice %224 {offsets = [1, 0], sizes = [1, 32], strides = [1, 1]} : vector<2x32xf32> to vector<1x32xf32>
    %cst_79 = arith.constant dense<0.000000e+00> : vector<16xf32>
    %227 = vector.multi_reduction <add>, %222, %cst_79 [1] : vector<16x32xf32> to vector<16xf32>
    %228 = vector.shape_cast %227 : vector<16xf32> to vector<16x1xf32>
    %cst_80 = arith.constant 3.200000e+01 : f32
    %229 = vector.broadcast %cst_80 : f32 to vector<16x1xf32>
    %230 = arith.divf %228, %229 : vector<16x1xf32>
    %231 = vector.broadcast %230 : vector<16x1xf32> to vector<16x32xf32>
    %232 = arith.subf %222, %231 : vector<16x32xf32>
    %233 = arith.mulf %232, %232 : vector<16x32xf32>
    %cst_81 = arith.constant dense<0.000000e+00> : vector<16xf32>
    %234 = vector.multi_reduction <add>, %233, %cst_81 [1] : vector<16x32xf32> to vector<16xf32>
    %235 = vector.shape_cast %234 : vector<16xf32> to vector<16x1xf32>
    %cst_82 = arith.constant 3.200000e+01 : f32
    %236 = vector.broadcast %cst_82 : f32 to vector<16x1xf32>
    %237 = arith.divf %235, %236 : vector<16x1xf32>
    %238 = vector.broadcast %230 : vector<16x1xf32> to vector<16x32xf32>
    %239 = arith.subf %222, %238 : vector<16x32xf32>
    %cst_83 = arith.constant 9.99999974E-6 : f32
    %240 = vector.broadcast %cst_83 : f32 to vector<16x1xf32>
    %241 = arith.addf %237, %240 : vector<16x1xf32>
    %242 = math.rsqrt %241 : vector<16x1xf32>
    %243 = vector.broadcast %242 : vector<16x1xf32> to vector<16x32xf32>
    %244 = arith.mulf %239, %243 : vector<16x32xf32>
    %245 = vector.broadcast %225 : vector<1x32xf32> to vector<16x32xf32>
    %246 = arith.mulf %244, %245 : vector<16x32xf32>
    %247 = vector.broadcast %226 : vector<1x32xf32> to vector<16x32xf32>
    %248 = arith.addf %246, %247 : vector<16x32xf32>
    %c1 = arith.constant 1 : index
    %c0_84 = arith.constant 0 : index
    %c0_85 = arith.constant 0 : index
    %249 = vector.load %arg4[%c1, %c0_84, %c0_85] : memref<2x32x96xbf16, #tpu.memory_space<vmem>>, vector<1x32x96xbf16>
    %250 = vector.shape_cast %249 : vector<1x32x96xbf16> to vector<32x96xbf16>
    %251 = arith.truncf %248 : vector<16x32xf32> to vector<16x32xbf16>
    %cst_86 = arith.constant dense<0.000000e+00> : vector<16x96xf32>
    %252 = tpu.matmul %251, %250, %cst_86 {dimension_numbers = #tpu.dot_dimension_numbers<[1], [0], [0], [1], [0, 0, 1, 1], [], []>} : vector<16x32xbf16>, vector<32x96xbf16>, vector<16x96xf32> -> vector<16x96xf32>
    %c1_87 = arith.constant 1 : index
    %c0_88 = arith.constant 0 : index
    %c0_89 = arith.constant 0 : index
    %253 = vector.load %arg5[%c1_87, %c0_88, %c0_89] : memref<2x1x96xf32, #tpu.memory_space<vmem>>, vector<1x1x96xf32>
    %254 = vector.shape_cast %253 : vector<1x1x96xf32> to vector<1x96xf32>
    %255 = vector.broadcast %254 : vector<1x96xf32> to vector<16x96xf32>
    %256 = arith.addf %252, %255 : vector<16x96xf32>
    %257 = arith.truncf %256 : vector<16x96xf32> to vector<16x96xbf16>
    %258 = vector.extract_strided_slice %257 {offsets = [0, 0], sizes = [16, 32], strides = [1, 1]} : vector<16x96xbf16> to vector<16x32xbf16>
    %259 = vector.extract_strided_slice %257 {offsets = [0, 32], sizes = [16, 32], strides = [1, 1]} : vector<16x96xbf16> to vector<16x32xbf16>
    %260 = vector.extract_strided_slice %257 {offsets = [0, 64], sizes = [16, 32], strides = [1, 1]} : vector<16x96xbf16> to vector<16x32xbf16>
    %261 = vector.extract_strided_slice %258 {offsets = [0, 0], sizes = [16, 8], strides = [1, 1]} : vector<16x32xbf16> to vector<16x8xbf16>
    %262 = vector.extract_strided_slice %258 {offsets = [0, 8], sizes = [16, 8], strides = [1, 1]} : vector<16x32xbf16> to vector<16x8xbf16>
    %263 = vector.extract_strided_slice %258 {offsets = [0, 16], sizes = [16, 8], strides = [1, 1]} : vector<16x32xbf16> to vector<16x8xbf16>
    %264 = vector.extract_strided_slice %258 {offsets = [0, 24], sizes = [16, 8], strides = [1, 1]} : vector<16x32xbf16> to vector<16x8xbf16>
    %265 = vector.shape_cast %261 : vector<16x8xbf16> to vector<1x16x8xbf16>
    %266 = vector.shape_cast %262 : vector<16x8xbf16> to vector<1x16x8xbf16>
    %267 = vector.shape_cast %263 : vector<16x8xbf16> to vector<1x16x8xbf16>
    %268 = vector.shape_cast %264 : vector<16x8xbf16> to vector<1x16x8xbf16>
    %269 = tpu.concatenate %265, %266, %267, %268 in 0 : vector<1x16x8xbf16>, vector<1x16x8xbf16>, vector<1x16x8xbf16>, vector<1x16x8xbf16> -> vector<4x16x8xbf16>
    %270 = vector.extract_strided_slice %259 {offsets = [0, 0], sizes = [16, 8], strides = [1, 1]} : vector<16x32xbf16> to vector<16x8xbf16>
    %271 = vector.extract_strided_slice %259 {offsets = [0, 8], sizes = [16, 8], strides = [1, 1]} : vector<16x32xbf16> to vector<16x8xbf16>
    %272 = vector.extract_strided_slice %259 {offsets = [0, 16], sizes = [16, 8], strides = [1, 1]} : vector<16x32xbf16> to vector<16x8xbf16>
    %273 = vector.extract_strided_slice %259 {offsets = [0, 24], sizes = [16, 8], strides = [1, 1]} : vector<16x32xbf16> to vector<16x8xbf16>
    %274 = vector.shape_cast %270 : vector<16x8xbf16> to vector<1x16x8xbf16>
    %275 = vector.shape_cast %271 : vector<16x8xbf16> to vector<1x16x8xbf16>
    %276 = vector.shape_cast %272 : vector<16x8xbf16> to vector<1x16x8xbf16>
    %277 = vector.shape_cast %273 : vector<16x8xbf16> to vector<1x16x8xbf16>
    %278 = tpu.concatenate %274, %275, %276, %277 in 0 : vector<1x16x8xbf16>, vector<1x16x8xbf16>, vector<1x16x8xbf16>, vector<1x16x8xbf16> -> vector<4x16x8xbf16>
    %279 = vector.extract_strided_slice %260 {offsets = [0, 0], sizes = [16, 8], strides = [1, 1]} : vector<16x32xbf16> to vector<16x8xbf16>
    %280 = vector.extract_strided_slice %260 {offsets = [0, 8], sizes = [16, 8], strides = [1, 1]} : vector<16x32xbf16> to vector<16x8xbf16>
    %281 = vector.extract_strided_slice %260 {offsets = [0, 16], sizes = [16, 8], strides = [1, 1]} : vector<16x32xbf16> to vector<16x8xbf16>
    %282 = vector.extract_strided_slice %260 {offsets = [0, 24], sizes = [16, 8], strides = [1, 1]} : vector<16x32xbf16> to vector<16x8xbf16>
    %283 = vector.shape_cast %279 : vector<16x8xbf16> to vector<1x16x8xbf16>
    %284 = vector.shape_cast %280 : vector<16x8xbf16> to vector<1x16x8xbf16>
    %285 = vector.shape_cast %281 : vector<16x8xbf16> to vector<1x16x8xbf16>
    %286 = vector.shape_cast %282 : vector<16x8xbf16> to vector<1x16x8xbf16>
    %287 = tpu.concatenate %283, %284, %285, %286 in 0 : vector<1x16x8xbf16>, vector<1x16x8xbf16>, vector<1x16x8xbf16>, vector<1x16x8xbf16> -> vector<4x16x8xbf16>
    "tpu.trace_start"() <{level = 10 : i32, message = "hqd,hkd->hqk"}> : () -> ()
    %cst_90 = arith.constant dense<0.000000e+00> : vector<4x16x16xf32>
    %288 = tpu.matmul %269, %278, %cst_90 {dimension_numbers = #tpu.dot_dimension_numbers<[2], [2], [1], [1], [0, 0, 0, 1, 1, 1], [0], [0]>} : vector<4x16x8xbf16>, vector<4x16x8xbf16>, vector<4x16x16xf32> -> vector<4x16x16xf32>
    "tpu.trace_stop"() : () -> ()
    %cst_91 = arith.constant 0.353553385 : f32
    %289 = vector.broadcast %cst_91 : f32 to vector<4x16x16xf32>
    %290 = arith.mulf %288, %289 : vector<4x16x16xf32>
    %291 = vector.broadcast %37 : vector<1x16x16xf32> to vector<4x16x16xf32>
    %292 = arith.addf %290, %291 : vector<4x16x16xf32>
    %cst_92 = arith.constant dense<0xFF800000> : vector<4x16xf32>
    %293 = vector.multi_reduction <maximumf>, %292, %cst_92 [2] : vector<4x16x16xf32> to vector<4x16xf32>
    %294 = vector.shape_cast %293 : vector<4x16xf32> to vector<4x16x1xf32>
    %295 = vector.broadcast %294 : vector<4x16x1xf32> to vector<4x16x16xf32>
    %296 = arith.subf %292, %295 : vector<4x16x16xf32>
    %297 = math.exp %296 : vector<4x16x16xf32>
    %cst_93 = arith.constant dense<0.000000e+00> : vector<4x16xf32>
    %298 = vector.multi_reduction <add>, %297, %cst_93 [2] : vector<4x16x16xf32> to vector<4x16xf32>
    %299 = vector.shape_cast %298 : vector<4x16xf32> to vector<4x16x1xf32>
    %300 = tpu.reciprocal %299 {approx = true} : vector<4x16x1xf32> -> vector<4x16x1xf32>
    %301 = vector.broadcast %300 : vector<4x16x1xf32> to vector<4x16x16xf32>
    %302 = arith.mulf %297, %301 : vector<4x16x16xf32>
    %303 = arith.truncf %302 : vector<4x16x16xf32> to vector<4x16x16xbf16>
    "tpu.trace_start"() <{level = 10 : i32, message = "hqk,hkd->hqd"}> : () -> ()
    %cst_94 = arith.constant dense<0.000000e+00> : vector<4x16x8xf32>
    %304 = tpu.matmul %303, %287, %cst_94 {dimension_numbers = #tpu.dot_dimension_numbers<[2], [1], [1], [2], [0, 0, 0, 1, 1, 2], [0], [0]>} : vector<4x16x16xbf16>, vector<4x16x8xbf16>, vector<4x16x8xf32> -> vector<4x16x8xf32>
    "tpu.trace_stop"() : () -> ()
    %305 = vector.extract_strided_slice %304 {offsets = [0, 0, 0], sizes = [1, 16, 8], strides = [1, 1, 1]} : vector<4x16x8xf32> to vector<1x16x8xf32>
    %306 = vector.shape_cast %305 : vector<1x16x8xf32> to vector<16x8xf32>
    %307 = vector.extract_strided_slice %304 {offsets = [1, 0, 0], sizes = [1, 16, 8], strides = [1, 1, 1]} : vector<4x16x8xf32> to vector<1x16x8xf32>
    %308 = vector.shape_cast %307 : vector<1x16x8xf32> to vector<16x8xf32>
    %309 = vector.extract_strided_slice %304 {offsets = [2, 0, 0], sizes = [1, 16, 8], strides = [1, 1, 1]} : vector<4x16x8xf32> to vector<1x16x8xf32>
    %310 = vector.shape_cast %309 : vector<1x16x8xf32> to vector<16x8xf32>
    %311 = vector.extract_strided_slice %304 {offsets = [3, 0, 0], sizes = [1, 16, 8], strides = [1, 1, 1]} : vector<4x16x8xf32> to vector<1x16x8xf32>
    %312 = vector.shape_cast %311 : vector<1x16x8xf32> to vector<16x8xf32>
    %313 = tpu.concatenate %306, %308, %310, %312 in 1 : vector<16x8xf32>, vector<16x8xf32>, vector<16x8xf32>, vector<16x8xf32> -> vector<16x32xf32>
    %c1_95 = arith.constant 1 : index
    %c0_96 = arith.constant 0 : index
    %c0_97 = arith.constant 0 : index
    %314 = vector.load %arg6[%c1_95, %c0_96, %c0_97] : memref<2x32x32xbf16, #tpu.memory_space<vmem>>, vector<1x32x32xbf16>
    %315 = vector.shape_cast %314 : vector<1x32x32xbf16> to vector<32x32xbf16>
    %316 = arith.truncf %313 : vector<16x32xf32> to vector<16x32xbf16>
    %cst_98 = arith.constant dense<0.000000e+00> : vector<16x32xf32>
    %317 = tpu.matmul %316, %315, %cst_98 {dimension_numbers = #tpu.dot_dimension_numbers<[1], [0], [0], [1], [0, 0, 1, 1], [], []>} : vector<16x32xbf16>, vector<32x32xbf16>, vector<16x32xf32> -> vector<16x32xf32>
    %c1_99 = arith.constant 1 : index
    %c0_100 = arith.constant 0 : index
    %c0_101 = arith.constant 0 : index
    %318 = vector.load %arg7[%c1_99, %c0_100, %c0_101] : memref<2x1x32xf32, #tpu.memory_space<vmem>>, vector<1x1x32xf32>
    %319 = vector.shape_cast %318 : vector<1x1x32xf32> to vector<1x32xf32>
    %320 = vector.broadcast %319 : vector<1x32xf32> to vector<16x32xf32>
    %321 = arith.addf %317, %320 : vector<16x32xf32>
    %322 = arith.addf %248, %321 : vector<16x32xf32>
    %c1_102 = arith.constant 1 : index
    %c0_103 = arith.constant 0 : index
    %c0_104 = arith.constant 0 : index
    %323 = vector.load %arg12[%c1_102, %c0_103, %c0_104] : memref<2x2x32xf32, #tpu.memory_space<vmem>>, vector<1x2x32xf32>
    %324 = vector.shape_cast %323 : vector<1x2x32xf32> to vector<2x32xf32>
    %325 = vector.extract_strided_slice %324 {offsets = [0, 0], sizes = [1, 32], strides = [1, 1]} : vector<2x32xf32> to vector<1x32xf32>
    %326 = vector.extract_strided_slice %324 {offsets = [1, 0], sizes = [1, 32], strides = [1, 1]} : vector<2x32xf32> to vector<1x32xf32>
    %cst_105 = arith.constant dense<0.000000e+00> : vector<16xf32>
    %327 = vector.multi_reduction <add>, %322, %cst_105 [1] : vector<16x32xf32> to vector<16xf32>
    %328 = vector.shape_cast %327 : vector<16xf32> to vector<16x1xf32>
    %cst_106 = arith.constant 3.200000e+01 : f32
    %329 = vector.broadcast %cst_106 : f32 to vector<16x1xf32>
    %330 = arith.divf %328, %329 : vector<16x1xf32>
    %331 = vector.broadcast %330 : vector<16x1xf32> to vector<16x32xf32>
    %332 = arith.subf %322, %331 : vector<16x32xf32>
    %333 = arith.mulf %332, %332 : vector<16x32xf32>
    %cst_107 = arith.constant dense<0.000000e+00> : vector<16xf32>
    %334 = vector.multi_reduction <add>, %333, %cst_107 [1] : vector<16x32xf32> to vector<16xf32>
    %335 = vector.shape_cast %334 : vector<16xf32> to vector<16x1xf32>
    %cst_108 = arith.constant 3.200000e+01 : f32
    %336 = vector.broadcast %cst_108 : f32 to vector<16x1xf32>
    %337 = arith.divf %335, %336 : vector<16x1xf32>
    %338 = vector.broadcast %330 : vector<16x1xf32> to vector<16x32xf32>
    %339 = arith.subf %322, %338 : vector<16x32xf32>
    %cst_109 = arith.constant 9.99999974E-6 : f32
    %340 = vector.broadcast %cst_109 : f32 to vector<16x1xf32>
    %341 = arith.addf %337, %340 : vector<16x1xf32>
    %342 = math.rsqrt %341 : vector<16x1xf32>
    %343 = vector.broadcast %342 : vector<16x1xf32> to vector<16x32xf32>
    %344 = arith.mulf %339, %343 : vector<16x32xf32>
    %345 = vector.broadcast %325 : vector<1x32xf32> to vector<16x32xf32>
    %346 = arith.mulf %344, %345 : vector<16x32xf32>
    %347 = vector.broadcast %326 : vector<1x32xf32> to vector<16x32xf32>
    %348 = arith.addf %346, %347 : vector<16x32xf32>
    %c1_110 = arith.constant 1 : index
    %c0_111 = arith.constant 0 : index
    %c0_112 = arith.constant 0 : index
    %349 = vector.load %arg8[%c1_110, %c0_111, %c0_112] : memref<2x32x64xbf16, #tpu.memory_space<vmem>>, vector<1x32x64xbf16>
    %350 = vector.shape_cast %349 : vector<1x32x64xbf16> to vector<32x64xbf16>
    %351 = arith.truncf %348 : vector<16x32xf32> to vector<16x32xbf16>
    %cst_113 = arith.constant dense<0.000000e+00> : vector<16x64xf32>
    %352 = tpu.matmul %351, %350, %cst_113 {dimension_numbers = #tpu.dot_dimension_numbers<[1], [0], [0], [1], [0, 0, 1, 1], [], []>} : vector<16x32xbf16>, vector<32x64xbf16>, vector<16x64xf32> -> vector<16x64xf32>
    %c1_114 = arith.constant 1 : index
    %c0_115 = arith.constant 0 : index
    %c0_116 = arith.constant 0 : index
    %353 = vector.load %arg9[%c1_114, %c0_115, %c0_116] : memref<2x1x64xf32, #tpu.memory_space<vmem>>, vector<1x1x64xf32>
    %354 = vector.shape_cast %353 : vector<1x1x64xf32> to vector<1x64xf32>
    %355 = vector.broadcast %354 : vector<1x64xf32> to vector<16x64xf32>
    %356 = arith.addf %352, %355 : vector<16x64xf32>
    %cst_117 = arith.constant 0.000000e+00 : f32
    %357 = vector.broadcast %cst_117 : f32 to vector<16x64xf32>
    %358 = arith.maximumf %356, %357 : vector<16x64xf32>
    %359 = arith.truncf %358 : vector<16x64xf32> to vector<16x64xbf16>
    %c1_118 = arith.constant 1 : index
    %c0_119 = arith.constant 0 : index
    %c0_120 = arith.constant 0 : index
    %360 = vector.load %arg10[%c1_118, %c0_119, %c0_120] : memref<2x64x32xbf16, #tpu.memory_space<vmem>>, vector<1x64x32xbf16>
    %361 = vector.shape_cast %360 : vector<1x64x32xbf16> to vector<64x32xbf16>
    %cst_121 = arith.constant dense<0.000000e+00> : vector<16x32xf32>
    %362 = tpu.matmul %359, %361, %cst_121 {dimension_numbers = #tpu.dot_dimension_numbers<[1], [0], [0], [1], [0, 0, 1, 1], [], []>} : vector<16x64xbf16>, vector<64x32xbf16>, vector<16x32xf32> -> vector<16x32xf32>
    %c1_122 = arith.constant 1 : index
    %c0_123 = arith.constant 0 : index
    %c0_124 = arith.constant 0 : index
    %363 = vector.load %arg11[%c1_122, %c0_123, %c0_124] : memref<2x1x32xf32, #tpu.memory_space<vmem>>, vector<1x1x32xf32>
    %364 = vector.shape_cast %363 : vector<1x1x32xf32> to vector<1x32xf32>
    %365 = vector.broadcast %364 : vector<1x32xf32> to vector<16x32xf32>
    %366 = arith.addf %362, %365 : vector<16x32xf32>
    %367 = arith.addf %348, %366 : vector<16x32xf32>
    %c1_125 = arith.constant 1 : index
    %c0_126 = arith.constant 0 : index
    %c0_127 = arith.constant 0 : index
    %368 = vector.load %arg13[%c1_125, %c0_126, %c0_127] : memref<2x2x32xf32, #tpu.memory_space<vmem>>, vector<1x2x32xf32>
    %369 = vector.shape_cast %368 : vector<1x2x32xf32> to vector<2x32xf32>
    %370 = vector.extract_strided_slice %369 {offsets = [0, 0], sizes = [1, 32], strides = [1, 1]} : vector<2x32xf32> to vector<1x32xf32>
    %371 = vector.extract_strided_slice %369 {offsets = [1, 0], sizes = [1, 32], strides = [1, 1]} : vector<2x32xf32> to vector<1x32xf32>
    %cst_128 = arith.constant dense<0.000000e+00> : vector<16xf32>
    %372 = vector.multi_reduction <add>, %367, %cst_128 [1] : vector<16x32xf32> to vector<16xf32>
    %373 = vector.shape_cast %372 : vector<16xf32> to vector<16x1xf32>
    %cst_129 = arith.constant 3.200000e+01 : f32
    %374 = vector.broadcast %cst_129 : f32 to vector<16x1xf32>
    %375 = arith.divf %373, %374 : vector<16x1xf32>
    %376 = vector.broadcast %375 : vector<16x1xf32> to vector<16x32xf32>
    %377 = arith.subf %367, %376 : vector<16x32xf32>
    %378 = arith.mulf %377, %377 : vector<16x32xf32>
    %cst_130 = arith.constant dense<0.000000e+00> : vector<16xf32>
    %379 = vector.multi_reduction <add>, %378, %cst_130 [1] : vector<16x32xf32> to vector<16xf32>
    %380 = vector.shape_cast %379 : vector<16xf32> to vector<16x1xf32>
    %cst_131 = arith.constant 3.200000e+01 : f32
    %381 = vector.broadcast %cst_131 : f32 to vector<16x1xf32>
    %382 = arith.divf %380, %381 : vector<16x1xf32>
    %383 = vector.broadcast %375 : vector<16x1xf32> to vector<16x32xf32>
    %384 = arith.subf %367, %383 : vector<16x32xf32>
    %cst_132 = arith.constant 9.99999974E-6 : f32
    %385 = vector.broadcast %cst_132 : f32 to vector<16x1xf32>
    %386 = arith.addf %382, %385 : vector<16x1xf32>
    %387 = math.rsqrt %386 : vector<16x1xf32>
    %388 = vector.broadcast %387 : vector<16x1xf32> to vector<16x32xf32>
    %389 = arith.mulf %384, %388 : vector<16x32xf32>
    %390 = vector.broadcast %370 : vector<1x32xf32> to vector<16x32xf32>
    %391 = arith.mulf %389, %390 : vector<16x32xf32>
    %392 = vector.broadcast %371 : vector<1x32xf32> to vector<16x32xf32>
    %393 = arith.addf %391, %392 : vector<16x32xf32>
    %c0_133 = arith.constant 0 : index
    %c0_134 = arith.constant 0 : index
    %394 = vector.load %arg14[%c0_133, %c0_134] : memref<2x32xf32, #tpu.memory_space<vmem>>, vector<2x32xf32>
    %395 = vector.extract_strided_slice %394 {offsets = [0, 0], sizes = [1, 32], strides = [1, 1]} : vector<2x32xf32> to vector<1x32xf32>
    %396 = vector.extract_strided_slice %394 {offsets = [1, 0], sizes = [1, 32], strides = [1, 1]} : vector<2x32xf32> to vector<1x32xf32>
    %cst_135 = arith.constant dense<0.000000e+00> : vector<16xf32>
    %397 = vector.multi_reduction <add>, %393, %cst_135 [1] : vector<16x32xf32> to vector<16xf32>
    %398 = vector.shape_cast %397 : vector<16xf32> to vector<16x1xf32>
    %cst_136 = arith.constant 3.200000e+01 : f32
    %399 = vector.broadcast %cst_136 : f32 to vector<16x1xf32>
    %400 = arith.divf %398, %399 : vector<16x1xf32>
    %401 = vector.broadcast %400 : vector<16x1xf32> to vector<16x32xf32>
    %402 = arith.subf %393, %401 : vector<16x32xf32>
    %403 = arith.mulf %402, %402 : vector<16x32xf32>
    %cst_137 = arith.constant dense<0.000000e+00> : vector<16xf32>
    %404 = vector.multi_reduction <add>, %403, %cst_137 [1] : vector<16x32xf32> to vector<16xf32>
    %405 = vector.shape_cast %404 : vector<16xf32> to vector<16x1xf32>
    %cst_138 = arith.constant 3.200000e+01 : f32
    %406 = vector.broadcast %cst_138 : f32 to vector<16x1xf32>
    %407 = arith.divf %405, %406 : vector<16x1xf32>
    %408 = vector.broadcast %400 : vector<16x1xf32> to vector<16x32xf32>
    %409 = arith.subf %393, %408 : vector<16x32xf32>
    %cst_139 = arith.constant 9.99999974E-6 : f32
    %410 = vector.broadcast %cst_139 : f32 to vector<16x1xf32>
    %411 = arith.addf %407, %410 : vector<16x1xf32>
    %412 = math.rsqrt %411 : vector<16x1xf32>
    %413 = vector.broadcast %412 : vector<16x1xf32> to vector<16x32xf32>
    %414 = arith.mulf %409, %413 : vector<16x32xf32>
    %415 = vector.broadcast %395 : vector<1x32xf32> to vector<16x32xf32>
    %416 = arith.mulf %414, %415 : vector<16x32xf32>
    %417 = vector.broadcast %396 : vector<1x32xf32> to vector<16x32xf32>
    %418 = arith.addf %416, %417 : vector<16x32xf32>
    %419 = arith.truncf %418 : vector<16x32xf32> to vector<16x32xbf16>
    %c0_140 = arith.constant 0 : index
    %c0_141 = arith.constant 0 : index
    %c0_142 = arith.constant 0 : index
    %420 = vector.load %arg15[%c0_140, %c0_141, %c0_142] : memref<2x32x96xbf16, #tpu.memory_space<vmem>>, vector<1x32x96xbf16>
    %421 = vector.shape_cast %420 : vector<1x32x96xbf16> to vector<32x96xbf16>
    %422 = arith.truncf %1 : vector<16x32xf32> to vector<16x32xbf16>
    %cst_143 = arith.constant dense<0.000000e+00> : vector<16x96xf32>
    %423 = tpu.matmul %422, %421, %cst_143 {dimension_numbers = #tpu.dot_dimension_numbers<[1], [0], [0], [1], [0, 0, 1, 1], [], []>} : vector<16x32xbf16>, vector<32x96xbf16>, vector<16x96xf32> -> vector<16x96xf32>
    %c0_144 = arith.constant 0 : index
    %c0_145 = arith.constant 0 : index
    %c0_146 = arith.constant 0 : index
    %424 = vector.load %arg16[%c0_144, %c0_145, %c0_146] : memref<2x1x96xf32, #tpu.memory_space<vmem>>, vector<1x1x96xf32>
    %425 = vector.shape_cast %424 : vector<1x1x96xf32> to vector<1x96xf32>
    %426 = vector.broadcast %425 : vector<1x96xf32> to vector<16x96xf32>
    %427 = arith.addf %423, %426 : vector<16x96xf32>
    %428 = arith.truncf %427 : vector<16x96xf32> to vector<16x96xbf16>
    %429 = vector.extract_strided_slice %428 {offsets = [0, 0], sizes = [16, 32], strides = [1, 1]} : vector<16x96xbf16> to vector<16x32xbf16>
    %430 = vector.extract_strided_slice %428 {offsets = [0, 32], sizes = [16, 32], strides = [1, 1]} : vector<16x96xbf16> to vector<16x32xbf16>
    %431 = vector.extract_strided_slice %428 {offsets = [0, 64], sizes = [16, 32], strides = [1, 1]} : vector<16x96xbf16> to vector<16x32xbf16>
    %432 = vector.extract_strided_slice %429 {offsets = [0, 0], sizes = [16, 8], strides = [1, 1]} : vector<16x32xbf16> to vector<16x8xbf16>
    %433 = vector.extract_strided_slice %429 {offsets = [0, 8], sizes = [16, 8], strides = [1, 1]} : vector<16x32xbf16> to vector<16x8xbf16>
    %434 = vector.extract_strided_slice %429 {offsets = [0, 16], sizes = [16, 8], strides = [1, 1]} : vector<16x32xbf16> to vector<16x8xbf16>
    %435 = vector.extract_strided_slice %429 {offsets = [0, 24], sizes = [16, 8], strides = [1, 1]} : vector<16x32xbf16> to vector<16x8xbf16>
    %436 = vector.shape_cast %432 : vector<16x8xbf16> to vector<1x16x8xbf16>
    %437 = vector.shape_cast %433 : vector<16x8xbf16> to vector<1x16x8xbf16>
    %438 = vector.shape_cast %434 : vector<16x8xbf16> to vector<1x16x8xbf16>
    %439 = vector.shape_cast %435 : vector<16x8xbf16> to vector<1x16x8xbf16>
    %440 = tpu.concatenate %436, %437, %438, %439 in 0 : vector<1x16x8xbf16>, vector<1x16x8xbf16>, vector<1x16x8xbf16>, vector<1x16x8xbf16> -> vector<4x16x8xbf16>
    %441 = vector.extract_strided_slice %430 {offsets = [0, 0], sizes = [16, 8], strides = [1, 1]} : vector<16x32xbf16> to vector<16x8xbf16>
    %442 = vector.extract_strided_slice %430 {offsets = [0, 8], sizes = [16, 8], strides = [1, 1]} : vector<16x32xbf16> to vector<16x8xbf16>
    %443 = vector.extract_strided_slice %430 {offsets = [0, 16], sizes = [16, 8], strides = [1, 1]} : vector<16x32xbf16> to vector<16x8xbf16>
    %444 = vector.extract_strided_slice %430 {offsets = [0, 24], sizes = [16, 8], strides = [1, 1]} : vector<16x32xbf16> to vector<16x8xbf16>
    %445 = vector.shape_cast %441 : vector<16x8xbf16> to vector<1x16x8xbf16>
    %446 = vector.shape_cast %442 : vector<16x8xbf16> to vector<1x16x8xbf16>
    %447 = vector.shape_cast %443 : vector<16x8xbf16> to vector<1x16x8xbf16>
    %448 = vector.shape_cast %444 : vector<16x8xbf16> to vector<1x16x8xbf16>
    %449 = tpu.concatenate %445, %446, %447, %448 in 0 : vector<1x16x8xbf16>, vector<1x16x8xbf16>, vector<1x16x8xbf16>, vector<1x16x8xbf16> -> vector<4x16x8xbf16>
    %450 = vector.extract_strided_slice %431 {offsets = [0, 0], sizes = [16, 8], strides = [1, 1]} : vector<16x32xbf16> to vector<16x8xbf16>
    %451 = vector.extract_strided_slice %431 {offsets = [0, 8], sizes = [16, 8], strides = [1, 1]} : vector<16x32xbf16> to vector<16x8xbf16>
    %452 = vector.extract_strided_slice %431 {offsets = [0, 16], sizes = [16, 8], strides = [1, 1]} : vector<16x32xbf16> to vector<16x8xbf16>
    %453 = vector.extract_strided_slice %431 {offsets = [0, 24], sizes = [16, 8], strides = [1, 1]} : vector<16x32xbf16> to vector<16x8xbf16>
    %454 = vector.shape_cast %450 : vector<16x8xbf16> to vector<1x16x8xbf16>
    %455 = vector.shape_cast %451 : vector<16x8xbf16> to vector<1x16x8xbf16>
    %456 = vector.shape_cast %452 : vector<16x8xbf16> to vector<1x16x8xbf16>
    %457 = vector.shape_cast %453 : vector<16x8xbf16> to vector<1x16x8xbf16>
    %458 = tpu.concatenate %454, %455, %456, %457 in 0 : vector<1x16x8xbf16>, vector<1x16x8xbf16>, vector<1x16x8xbf16>, vector<1x16x8xbf16> -> vector<4x16x8xbf16>
    "tpu.trace_start"() <{level = 10 : i32, message = "hqd,hkd->hqk"}> : () -> ()
    %cst_147 = arith.constant dense<0.000000e+00> : vector<4x16x16xf32>
    %459 = tpu.matmul %440, %449, %cst_147 {dimension_numbers = #tpu.dot_dimension_numbers<[2], [2], [1], [1], [0, 0, 0, 1, 1, 1], [0], [0]>} : vector<4x16x8xbf16>, vector<4x16x8xbf16>, vector<4x16x16xf32> -> vector<4x16x16xf32>
    "tpu.trace_stop"() : () -> ()
    %cst_148 = arith.constant 0.353553385 : f32
    %460 = vector.broadcast %cst_148 : f32 to vector<4x16x16xf32>
    %461 = arith.mulf %459, %460 : vector<4x16x16xf32>
    %462 = vector.broadcast %71 : vector<1x16x16xf32> to vector<4x16x16xf32>
    %463 = arith.addf %461, %462 : vector<4x16x16xf32>
    %cst_149 = arith.constant dense<0xFF800000> : vector<4x16xf32>
    %464 = vector.multi_reduction <maximumf>, %463, %cst_149 [2] : vector<4x16x16xf32> to vector<4x16xf32>
    %465 = vector.shape_cast %464 : vector<4x16xf32> to vector<4x16x1xf32>
    %466 = vector.broadcast %465 : vector<4x16x1xf32> to vector<4x16x16xf32>
    %467 = arith.subf %463, %466 : vector<4x16x16xf32>
    %468 = math.exp %467 : vector<4x16x16xf32>
    %cst_150 = arith.constant dense<0.000000e+00> : vector<4x16xf32>
    %469 = vector.multi_reduction <add>, %468, %cst_150 [2] : vector<4x16x16xf32> to vector<4x16xf32>
    %470 = vector.shape_cast %469 : vector<4x16xf32> to vector<4x16x1xf32>
    %471 = tpu.reciprocal %470 {approx = true} : vector<4x16x1xf32> -> vector<4x16x1xf32>
    %472 = vector.broadcast %471 : vector<4x16x1xf32> to vector<4x16x16xf32>
    %473 = arith.mulf %468, %472 : vector<4x16x16xf32>
    %474 = arith.truncf %473 : vector<4x16x16xf32> to vector<4x16x16xbf16>
    "tpu.trace_start"() <{level = 10 : i32, message = "hqk,hkd->hqd"}> : () -> ()
    %cst_151 = arith.constant dense<0.000000e+00> : vector<4x16x8xf32>
    %475 = tpu.matmul %474, %458, %cst_151 {dimension_numbers = #tpu.dot_dimension_numbers<[2], [1], [1], [2], [0, 0, 0, 1, 1, 2], [0], [0]>} : vector<4x16x16xbf16>, vector<4x16x8xbf16>, vector<4x16x8xf32> -> vector<4x16x8xf32>
    "tpu.trace_stop"() : () -> ()
    %476 = vector.extract_strided_slice %475 {offsets = [0, 0, 0], sizes = [1, 16, 8], strides = [1, 1, 1]} : vector<4x16x8xf32> to vector<1x16x8xf32>
    %477 = vector.shape_cast %476 : vector<1x16x8xf32> to vector<16x8xf32>
    %478 = vector.extract_strided_slice %475 {offsets = [1, 0, 0], sizes = [1, 16, 8], strides = [1, 1, 1]} : vector<4x16x8xf32> to vector<1x16x8xf32>
    %479 = vector.shape_cast %478 : vector<1x16x8xf32> to vector<16x8xf32>
    %480 = vector.extract_strided_slice %475 {offsets = [2, 0, 0], sizes = [1, 16, 8], strides = [1, 1, 1]} : vector<4x16x8xf32> to vector<1x16x8xf32>
    %481 = vector.shape_cast %480 : vector<1x16x8xf32> to vector<16x8xf32>
    %482 = vector.extract_strided_slice %475 {offsets = [3, 0, 0], sizes = [1, 16, 8], strides = [1, 1, 1]} : vector<4x16x8xf32> to vector<1x16x8xf32>
    %483 = vector.shape_cast %482 : vector<1x16x8xf32> to vector<16x8xf32>
    %484 = tpu.concatenate %477, %479, %481, %483 in 1 : vector<16x8xf32>, vector<16x8xf32>, vector<16x8xf32>, vector<16x8xf32> -> vector<16x32xf32>
    %c0_152 = arith.constant 0 : index
    %c0_153 = arith.constant 0 : index
    %c0_154 = arith.constant 0 : index
    %485 = vector.load %arg17[%c0_152, %c0_153, %c0_154] : memref<2x32x32xbf16, #tpu.memory_space<vmem>>, vector<1x32x32xbf16>
    %486 = vector.shape_cast %485 : vector<1x32x32xbf16> to vector<32x32xbf16>
    %487 = arith.truncf %484 : vector<16x32xf32> to vector<16x32xbf16>
    %cst_155 = arith.constant dense<0.000000e+00> : vector<16x32xf32>
    %488 = tpu.matmul %487, %486, %cst_155 {dimension_numbers = #tpu.dot_dimension_numbers<[1], [0], [0], [1], [0, 0, 1, 1], [], []>} : vector<16x32xbf16>, vector<32x32xbf16>, vector<16x32xf32> -> vector<16x32xf32>
    %c0_156 = arith.constant 0 : index
    %c0_157 = arith.constant 0 : index
    %c0_158 = arith.constant 0 : index
    %489 = vector.load %arg18[%c0_156, %c0_157, %c0_158] : memref<2x1x32xf32, #tpu.memory_space<vmem>>, vector<1x1x32xf32>
    %490 = vector.shape_cast %489 : vector<1x1x32xf32> to vector<1x32xf32>
    %491 = vector.broadcast %490 : vector<1x32xf32> to vector<16x32xf32>
    %492 = arith.addf %488, %491 : vector<16x32xf32>
    %493 = arith.addf %1, %492 : vector<16x32xf32>
    %c0_159 = arith.constant 0 : index
    %c0_160 = arith.constant 0 : index
    %c0_161 = arith.constant 0 : index
    %494 = vector.load %arg27[%c0_159, %c0_160, %c0_161] : memref<2x2x32xf32, #tpu.memory_space<vmem>>, vector<1x2x32xf32>
    %495 = vector.shape_cast %494 : vector<1x2x32xf32> to vector<2x32xf32>
    %496 = vector.extract_strided_slice %495 {offsets = [0, 0], sizes = [1, 32], strides = [1, 1]} : vector<2x32xf32> to vector<1x32xf32>
    %497 = vector.extract_strided_slice %495 {offsets = [1, 0], sizes = [1, 32], strides = [1, 1]} : vector<2x32xf32> to vector<1x32xf32>
    %cst_162 = arith.constant dense<0.000000e+00> : vector<16xf32>
    %498 = vector.multi_reduction <add>, %493, %cst_162 [1] : vector<16x32xf32> to vector<16xf32>
    %499 = vector.shape_cast %498 : vector<16xf32> to vector<16x1xf32>
    %cst_163 = arith.constant 3.200000e+01 : f32
    %500 = vector.broadcast %cst_163 : f32 to vector<16x1xf32>
    %501 = arith.divf %499, %500 : vector<16x1xf32>
    %502 = vector.broadcast %501 : vector<16x1xf32> to vector<16x32xf32>
    %503 = arith.subf %493, %502 : vector<16x32xf32>
    %504 = arith.mulf %503, %503 : vector<16x32xf32>
    %cst_164 = arith.constant dense<0.000000e+00> : vector<16xf32>
    %505 = vector.multi_reduction <add>, %504, %cst_164 [1] : vector<16x32xf32> to vector<16xf32>
    %506 = vector.shape_cast %505 : vector<16xf32> to vector<16x1xf32>
    %cst_165 = arith.constant 3.200000e+01 : f32
    %507 = vector.broadcast %cst_165 : f32 to vector<16x1xf32>
    %508 = arith.divf %506, %507 : vector<16x1xf32>
    %509 = vector.broadcast %501 : vector<16x1xf32> to vector<16x32xf32>
    %510 = arith.subf %493, %509 : vector<16x32xf32>
    %cst_166 = arith.constant 9.99999974E-6 : f32
    %511 = vector.broadcast %cst_166 : f32 to vector<16x1xf32>
    %512 = arith.addf %508, %511 : vector<16x1xf32>
    %513 = math.rsqrt %512 : vector<16x1xf32>
    %514 = vector.broadcast %513 : vector<16x1xf32> to vector<16x32xf32>
    %515 = arith.mulf %510, %514 : vector<16x32xf32>
    %516 = vector.broadcast %496 : vector<1x32xf32> to vector<16x32xf32>
    %517 = arith.mulf %515, %516 : vector<16x32xf32>
    %518 = vector.broadcast %497 : vector<1x32xf32> to vector<16x32xf32>
    %519 = arith.addf %517, %518 : vector<16x32xf32>
    %c0_167 = arith.constant 0 : index
    %c0_168 = arith.constant 0 : index
    %c0_169 = arith.constant 0 : index
    %520 = vector.load %arg19[%c0_167, %c0_168, %c0_169] : memref<2x32x96xbf16, #tpu.memory_space<vmem>>, vector<1x32x96xbf16>
    %521 = vector.shape_cast %520 : vector<1x32x96xbf16> to vector<32x96xbf16>
    %c0_170 = arith.constant 0 : index
    %c0_171 = arith.constant 0 : index
    %c0_172 = arith.constant 0 : index
    %522 = vector.load %arg20[%c0_170, %c0_171, %c0_172] : memref<2x1x96xf32, #tpu.memory_space<vmem>>, vector<1x1x96xf32>
    %523 = vector.shape_cast %522 : vector<1x1x96xf32> to vector<1x96xf32>
    %524 = vector.extract_strided_slice %521 {offsets = [0, 0], sizes = [32, 32], strides = [1, 1]} : vector<32x96xbf16> to vector<32x32xbf16>
    %525 = arith.truncf %519 : vector<16x32xf32> to vector<16x32xbf16>
    %cst_173 = arith.constant dense<0.000000e+00> : vector<16x32xf32>
    %526 = tpu.matmul %525, %524, %cst_173 {dimension_numbers = #tpu.dot_dimension_numbers<[1], [0], [0], [1], [0, 0, 1, 1], [], []>} : vector<16x32xbf16>, vector<32x32xbf16>, vector<16x32xf32> -> vector<16x32xf32>
    %527 = vector.extract_strided_slice %523 {offsets = [0, 0], sizes = [1, 32], strides = [1, 1]} : vector<1x96xf32> to vector<1x32xf32>
    %528 = vector.broadcast %527 : vector<1x32xf32> to vector<16x32xf32>
    %529 = arith.addf %526, %528 : vector<16x32xf32>
    %530 = arith.truncf %529 : vector<16x32xf32> to vector<16x32xbf16>
    %531 = vector.extract_strided_slice %521 {offsets = [0, 32], sizes = [32, 64], strides = [1, 1]} : vector<32x96xbf16> to vector<32x64xbf16>
    %cst_174 = arith.constant dense<0.000000e+00> : vector<16x64xf32>
    %532 = tpu.matmul %419, %531, %cst_174 {dimension_numbers = #tpu.dot_dimension_numbers<[1], [0], [0], [1], [0, 0, 1, 1], [], []>} : vector<16x32xbf16>, vector<32x64xbf16>, vector<16x64xf32> -> vector<16x64xf32>
    %533 = vector.extract_strided_slice %523 {offsets = [0, 32], sizes = [1, 64], strides = [1, 1]} : vector<1x96xf32> to vector<1x64xf32>
    %534 = vector.broadcast %533 : vector<1x64xf32> to vector<16x64xf32>
    %535 = arith.addf %532, %534 : vector<16x64xf32>
    %536 = arith.truncf %535 : vector<16x64xf32> to vector<16x64xbf16>
    %537 = vector.extract_strided_slice %536 {offsets = [0, 0], sizes = [16, 32], strides = [1, 1]} : vector<16x64xbf16> to vector<16x32xbf16>
    %538 = vector.extract_strided_slice %536 {offsets = [0, 32], sizes = [16, 32], strides = [1, 1]} : vector<16x64xbf16> to vector<16x32xbf16>
    %539 = vector.extract_strided_slice %530 {offsets = [0, 0], sizes = [16, 8], strides = [1, 1]} : vector<16x32xbf16> to vector<16x8xbf16>
    %540 = vector.extract_strided_slice %530 {offsets = [0, 8], sizes = [16, 8], strides = [1, 1]} : vector<16x32xbf16> to vector<16x8xbf16>
    %541 = vector.extract_strided_slice %530 {offsets = [0, 16], sizes = [16, 8], strides = [1, 1]} : vector<16x32xbf16> to vector<16x8xbf16>
    %542 = vector.extract_strided_slice %530 {offsets = [0, 24], sizes = [16, 8], strides = [1, 1]} : vector<16x32xbf16> to vector<16x8xbf16>
    %543 = vector.shape_cast %539 : vector<16x8xbf16> to vector<1x16x8xbf16>
    %544 = vector.shape_cast %540 : vector<16x8xbf16> to vector<1x16x8xbf16>
    %545 = vector.shape_cast %541 : vector<16x8xbf16> to vector<1x16x8xbf16>
    %546 = vector.shape_cast %542 : vector<16x8xbf16> to vector<1x16x8xbf16>
    %547 = tpu.concatenate %543, %544, %545, %546 in 0 : vector<1x16x8xbf16>, vector<1x16x8xbf16>, vector<1x16x8xbf16>, vector<1x16x8xbf16> -> vector<4x16x8xbf16>
    %548 = vector.extract_strided_slice %537 {offsets = [0, 0], sizes = [16, 8], strides = [1, 1]} : vector<16x32xbf16> to vector<16x8xbf16>
    %549 = vector.extract_strided_slice %537 {offsets = [0, 8], sizes = [16, 8], strides = [1, 1]} : vector<16x32xbf16> to vector<16x8xbf16>
    %550 = vector.extract_strided_slice %537 {offsets = [0, 16], sizes = [16, 8], strides = [1, 1]} : vector<16x32xbf16> to vector<16x8xbf16>
    %551 = vector.extract_strided_slice %537 {offsets = [0, 24], sizes = [16, 8], strides = [1, 1]} : vector<16x32xbf16> to vector<16x8xbf16>
    %552 = vector.shape_cast %548 : vector<16x8xbf16> to vector<1x16x8xbf16>
    %553 = vector.shape_cast %549 : vector<16x8xbf16> to vector<1x16x8xbf16>
    %554 = vector.shape_cast %550 : vector<16x8xbf16> to vector<1x16x8xbf16>
    %555 = vector.shape_cast %551 : vector<16x8xbf16> to vector<1x16x8xbf16>
    %556 = tpu.concatenate %552, %553, %554, %555 in 0 : vector<1x16x8xbf16>, vector<1x16x8xbf16>, vector<1x16x8xbf16>, vector<1x16x8xbf16> -> vector<4x16x8xbf16>
    %557 = vector.extract_strided_slice %538 {offsets = [0, 0], sizes = [16, 8], strides = [1, 1]} : vector<16x32xbf16> to vector<16x8xbf16>
    %558 = vector.extract_strided_slice %538 {offsets = [0, 8], sizes = [16, 8], strides = [1, 1]} : vector<16x32xbf16> to vector<16x8xbf16>
    %559 = vector.extract_strided_slice %538 {offsets = [0, 16], sizes = [16, 8], strides = [1, 1]} : vector<16x32xbf16> to vector<16x8xbf16>
    %560 = vector.extract_strided_slice %538 {offsets = [0, 24], sizes = [16, 8], strides = [1, 1]} : vector<16x32xbf16> to vector<16x8xbf16>
    %561 = vector.shape_cast %557 : vector<16x8xbf16> to vector<1x16x8xbf16>
    %562 = vector.shape_cast %558 : vector<16x8xbf16> to vector<1x16x8xbf16>
    %563 = vector.shape_cast %559 : vector<16x8xbf16> to vector<1x16x8xbf16>
    %564 = vector.shape_cast %560 : vector<16x8xbf16> to vector<1x16x8xbf16>
    %565 = tpu.concatenate %561, %562, %563, %564 in 0 : vector<1x16x8xbf16>, vector<1x16x8xbf16>, vector<1x16x8xbf16>, vector<1x16x8xbf16> -> vector<4x16x8xbf16>
    "tpu.trace_start"() <{level = 10 : i32, message = "hqd,hkd->hqk"}> : () -> ()
    %cst_175 = arith.constant dense<0.000000e+00> : vector<4x16x16xf32>
    %566 = tpu.matmul %547, %556, %cst_175 {dimension_numbers = #tpu.dot_dimension_numbers<[2], [2], [1], [1], [0, 0, 0, 1, 1, 1], [0], [0]>} : vector<4x16x8xbf16>, vector<4x16x8xbf16>, vector<4x16x16xf32> -> vector<4x16x16xf32>
    "tpu.trace_stop"() : () -> ()
    %cst_176 = arith.constant 0.353553385 : f32
    %567 = vector.broadcast %cst_176 : f32 to vector<4x16x16xf32>
    %568 = arith.mulf %566, %567 : vector<4x16x16xf32>
    %569 = vector.broadcast %103 : vector<1x16x16xf32> to vector<4x16x16xf32>
    %570 = arith.addf %568, %569 : vector<4x16x16xf32>
    %cst_177 = arith.constant dense<0xFF800000> : vector<4x16xf32>
    %571 = vector.multi_reduction <maximumf>, %570, %cst_177 [2] : vector<4x16x16xf32> to vector<4x16xf32>
    %572 = vector.shape_cast %571 : vector<4x16xf32> to vector<4x16x1xf32>
    %573 = vector.broadcast %572 : vector<4x16x1xf32> to vector<4x16x16xf32>
    %574 = arith.subf %570, %573 : vector<4x16x16xf32>
    %575 = math.exp %574 : vector<4x16x16xf32>
    %cst_178 = arith.constant dense<0.000000e+00> : vector<4x16xf32>
    %576 = vector.multi_reduction <add>, %575, %cst_178 [2] : vector<4x16x16xf32> to vector<4x16xf32>
    %577 = vector.shape_cast %576 : vector<4x16xf32> to vector<4x16x1xf32>
    %578 = tpu.reciprocal %577 {approx = true} : vector<4x16x1xf32> -> vector<4x16x1xf32>
    %579 = vector.broadcast %578 : vector<4x16x1xf32> to vector<4x16x16xf32>
    %580 = arith.mulf %575, %579 : vector<4x16x16xf32>
    %581 = arith.truncf %580 : vector<4x16x16xf32> to vector<4x16x16xbf16>
    "tpu.trace_start"() <{level = 10 : i32, message = "hqk,hkd->hqd"}> : () -> ()
    %cst_179 = arith.constant dense<0.000000e+00> : vector<4x16x8xf32>
    %582 = tpu.matmul %581, %565, %cst_179 {dimension_numbers = #tpu.dot_dimension_numbers<[2], [1], [1], [2], [0, 0, 0, 1, 1, 2], [0], [0]>} : vector<4x16x16xbf16>, vector<4x16x8xbf16>, vector<4x16x8xf32> -> vector<4x16x8xf32>
    "tpu.trace_stop"() : () -> ()
    %583 = vector.extract_strided_slice %582 {offsets = [0, 0, 0], sizes = [1, 16, 8], strides = [1, 1, 1]} : vector<4x16x8xf32> to vector<1x16x8xf32>
    %584 = vector.shape_cast %583 : vector<1x16x8xf32> to vector<16x8xf32>
    %585 = vector.extract_strided_slice %582 {offsets = [1, 0, 0], sizes = [1, 16, 8], strides = [1, 1, 1]} : vector<4x16x8xf32> to vector<1x16x8xf32>
    %586 = vector.shape_cast %585 : vector<1x16x8xf32> to vector<16x8xf32>
    %587 = vector.extract_strided_slice %582 {offsets = [2, 0, 0], sizes = [1, 16, 8], strides = [1, 1, 1]} : vector<4x16x8xf32> to vector<1x16x8xf32>
    %588 = vector.shape_cast %587 : vector<1x16x8xf32> to vector<16x8xf32>
    %589 = vector.extract_strided_slice %582 {offsets = [3, 0, 0], sizes = [1, 16, 8], strides = [1, 1, 1]} : vector<4x16x8xf32> to vector<1x16x8xf32>
    %590 = vector.shape_cast %589 : vector<1x16x8xf32> to vector<16x8xf32>
    %591 = tpu.concatenate %584, %586, %588, %590 in 1 : vector<16x8xf32>, vector<16x8xf32>, vector<16x8xf32>, vector<16x8xf32> -> vector<16x32xf32>
    %c0_180 = arith.constant 0 : index
    %c0_181 = arith.constant 0 : index
    %c0_182 = arith.constant 0 : index
    %592 = vector.load %arg21[%c0_180, %c0_181, %c0_182] : memref<2x32x32xbf16, #tpu.memory_space<vmem>>, vector<1x32x32xbf16>
    %593 = vector.shape_cast %592 : vector<1x32x32xbf16> to vector<32x32xbf16>
    %594 = arith.truncf %591 : vector<16x32xf32> to vector<16x32xbf16>
    %cst_183 = arith.constant dense<0.000000e+00> : vector<16x32xf32>
    %595 = tpu.matmul %594, %593, %cst_183 {dimension_numbers = #tpu.dot_dimension_numbers<[1], [0], [0], [1], [0, 0, 1, 1], [], []>} : vector<16x32xbf16>, vector<32x32xbf16>, vector<16x32xf32> -> vector<16x32xf32>
    %c0_184 = arith.constant 0 : index
    %c0_185 = arith.constant 0 : index
    %c0_186 = arith.constant 0 : index
    %596 = vector.load %arg22[%c0_184, %c0_185, %c0_186] : memref<2x1x32xf32, #tpu.memory_space<vmem>>, vector<1x1x32xf32>
    %597 = vector.shape_cast %596 : vector<1x1x32xf32> to vector<1x32xf32>
    %598 = vector.broadcast %597 : vector<1x32xf32> to vector<16x32xf32>
    %599 = arith.addf %595, %598 : vector<16x32xf32>
    %600 = arith.addf %519, %599 : vector<16x32xf32>
    %c0_187 = arith.constant 0 : index
    %c0_188 = arith.constant 0 : index
    %c0_189 = arith.constant 0 : index
    %601 = vector.load %arg28[%c0_187, %c0_188, %c0_189] : memref<2x2x32xf32, #tpu.memory_space<vmem>>, vector<1x2x32xf32>
    %602 = vector.shape_cast %601 : vector<1x2x32xf32> to vector<2x32xf32>
    %603 = vector.extract_strided_slice %602 {offsets = [0, 0], sizes = [1, 32], strides = [1, 1]} : vector<2x32xf32> to vector<1x32xf32>
    %604 = vector.extract_strided_slice %602 {offsets = [1, 0], sizes = [1, 32], strides = [1, 1]} : vector<2x32xf32> to vector<1x32xf32>
    %cst_190 = arith.constant dense<0.000000e+00> : vector<16xf32>
    %605 = vector.multi_reduction <add>, %600, %cst_190 [1] : vector<16x32xf32> to vector<16xf32>
    %606 = vector.shape_cast %605 : vector<16xf32> to vector<16x1xf32>
    %cst_191 = arith.constant 3.200000e+01 : f32
    %607 = vector.broadcast %cst_191 : f32 to vector<16x1xf32>
    %608 = arith.divf %606, %607 : vector<16x1xf32>
    %609 = vector.broadcast %608 : vector<16x1xf32> to vector<16x32xf32>
    %610 = arith.subf %600, %609 : vector<16x32xf32>
    %611 = arith.mulf %610, %610 : vector<16x32xf32>
    %cst_192 = arith.constant dense<0.000000e+00> : vector<16xf32>
    %612 = vector.multi_reduction <add>, %611, %cst_192 [1] : vector<16x32xf32> to vector<16xf32>
    %613 = vector.shape_cast %612 : vector<16xf32> to vector<16x1xf32>
    %cst_193 = arith.constant 3.200000e+01 : f32
    %614 = vector.broadcast %cst_193 : f32 to vector<16x1xf32>
    %615 = arith.divf %613, %614 : vector<16x1xf32>
    %616 = vector.broadcast %608 : vector<16x1xf32> to vector<16x32xf32>
    %617 = arith.subf %600, %616 : vector<16x32xf32>
    %cst_194 = arith.constant 9.99999974E-6 : f32
    %618 = vector.broadcast %cst_194 : f32 to vector<16x1xf32>
    %619 = arith.addf %615, %618 : vector<16x1xf32>
    %620 = math.rsqrt %619 : vector<16x1xf32>
    %621 = vector.broadcast %620 : vector<16x1xf32> to vector<16x32xf32>
    %622 = arith.mulf %617, %621 : vector<16x32xf32>
    %623 = vector.broadcast %603 : vector<1x32xf32> to vector<16x32xf32>
    %624 = arith.mulf %622, %623 : vector<16x32xf32>
    %625 = vector.broadcast %604 : vector<1x32xf32> to vector<16x32xf32>
    %626 = arith.addf %624, %625 : vector<16x32xf32>
    %c0_195 = arith.constant 0 : index
    %c0_196 = arith.constant 0 : index
    %c0_197 = arith.constant 0 : index
    %627 = vector.load %arg23[%c0_195, %c0_196, %c0_197] : memref<2x32x64xbf16, #tpu.memory_space<vmem>>, vector<1x32x64xbf16>
    %628 = vector.shape_cast %627 : vector<1x32x64xbf16> to vector<32x64xbf16>
    %629 = arith.truncf %626 : vector<16x32xf32> to vector<16x32xbf16>
    %cst_198 = arith.constant dense<0.000000e+00> : vector<16x64xf32>
    %630 = tpu.matmul %629, %628, %cst_198 {dimension_numbers = #tpu.dot_dimension_numbers<[1], [0], [0], [1], [0, 0, 1, 1], [], []>} : vector<16x32xbf16>, vector<32x64xbf16>, vector<16x64xf32> -> vector<16x64xf32>
    %c0_199 = arith.constant 0 : index
    %c0_200 = arith.constant 0 : index
    %c0_201 = arith.constant 0 : index
    %631 = vector.load %arg24[%c0_199, %c0_200, %c0_201] : memref<2x1x64xf32, #tpu.memory_space<vmem>>, vector<1x1x64xf32>
    %632 = vector.shape_cast %631 : vector<1x1x64xf32> to vector<1x64xf32>
    %633 = vector.broadcast %632 : vector<1x64xf32> to vector<16x64xf32>
    %634 = arith.addf %630, %633 : vector<16x64xf32>
    %cst_202 = arith.constant 0.000000e+00 : f32
    %635 = vector.broadcast %cst_202 : f32 to vector<16x64xf32>
    %636 = arith.maximumf %634, %635 : vector<16x64xf32>
    %637 = arith.truncf %636 : vector<16x64xf32> to vector<16x64xbf16>
    %c0_203 = arith.constant 0 : index
    %c0_204 = arith.constant 0 : index
    %c0_205 = arith.constant 0 : index
    %638 = vector.load %arg25[%c0_203, %c0_204, %c0_205] : memref<2x64x32xbf16, #tpu.memory_space<vmem>>, vector<1x64x32xbf16>
    %639 = vector.shape_cast %638 : vector<1x64x32xbf16> to vector<64x32xbf16>
    %cst_206 = arith.constant dense<0.000000e+00> : vector<16x32xf32>
    %640 = tpu.matmul %637, %639, %cst_206 {dimension_numbers = #tpu.dot_dimension_numbers<[1], [0], [0], [1], [0, 0, 1, 1], [], []>} : vector<16x64xbf16>, vector<64x32xbf16>, vector<16x32xf32> -> vector<16x32xf32>
    %c0_207 = arith.constant 0 : index
    %c0_208 = arith.constant 0 : index
    %c0_209 = arith.constant 0 : index
    %641 = vector.load %arg26[%c0_207, %c0_208, %c0_209] : memref<2x1x32xf32, #tpu.memory_space<vmem>>, vector<1x1x32xf32>
    %642 = vector.shape_cast %641 : vector<1x1x32xf32> to vector<1x32xf32>
    %643 = vector.broadcast %642 : vector<1x32xf32> to vector<16x32xf32>
    %644 = arith.addf %640, %643 : vector<16x32xf32>
    %645 = arith.addf %626, %644 : vector<16x32xf32>
    %c0_210 = arith.constant 0 : index
    %c0_211 = arith.constant 0 : index
    %c0_212 = arith.constant 0 : index
    %646 = vector.load %arg29[%c0_210, %c0_211, %c0_212] : memref<2x2x32xf32, #tpu.memory_space<vmem>>, vector<1x2x32xf32>
    %647 = vector.shape_cast %646 : vector<1x2x32xf32> to vector<2x32xf32>
    %648 = vector.extract_strided_slice %647 {offsets = [0, 0], sizes = [1, 32], strides = [1, 1]} : vector<2x32xf32> to vector<1x32xf32>
    %649 = vector.extract_strided_slice %647 {offsets = [1, 0], sizes = [1, 32], strides = [1, 1]} : vector<2x32xf32> to vector<1x32xf32>
    %cst_213 = arith.constant dense<0.000000e+00> : vector<16xf32>
    %650 = vector.multi_reduction <add>, %645, %cst_213 [1] : vector<16x32xf32> to vector<16xf32>
    %651 = vector.shape_cast %650 : vector<16xf32> to vector<16x1xf32>
    %cst_214 = arith.constant 3.200000e+01 : f32
    %652 = vector.broadcast %cst_214 : f32 to vector<16x1xf32>
    %653 = arith.divf %651, %652 : vector<16x1xf32>
    %654 = vector.broadcast %653 : vector<16x1xf32> to vector<16x32xf32>
    %655 = arith.subf %645, %654 : vector<16x32xf32>
    %656 = arith.mulf %655, %655 : vector<16x32xf32>
    %cst_215 = arith.constant dense<0.000000e+00> : vector<16xf32>
    %657 = vector.multi_reduction <add>, %656, %cst_215 [1] : vector<16x32xf32> to vector<16xf32>
    %658 = vector.shape_cast %657 : vector<16xf32> to vector<16x1xf32>
    %cst_216 = arith.constant 3.200000e+01 : f32
    %659 = vector.broadcast %cst_216 : f32 to vector<16x1xf32>
    %660 = arith.divf %658, %659 : vector<16x1xf32>
    %661 = vector.broadcast %653 : vector<16x1xf32> to vector<16x32xf32>
    %662 = arith.subf %645, %661 : vector<16x32xf32>
    %cst_217 = arith.constant 9.99999974E-6 : f32
    %663 = vector.broadcast %cst_217 : f32 to vector<16x1xf32>
    %664 = arith.addf %660, %663 : vector<16x1xf32>
    %665 = math.rsqrt %664 : vector<16x1xf32>
    %666 = vector.broadcast %665 : vector<16x1xf32> to vector<16x32xf32>
    %667 = arith.mulf %662, %666 : vector<16x32xf32>
    %668 = vector.broadcast %648 : vector<1x32xf32> to vector<16x32xf32>
    %669 = arith.mulf %667, %668 : vector<16x32xf32>
    %670 = vector.broadcast %649 : vector<1x32xf32> to vector<16x32xf32>
    %671 = arith.addf %669, %670 : vector<16x32xf32>
    %c1_218 = arith.constant 1 : index
    %c0_219 = arith.constant 0 : index
    %c0_220 = arith.constant 0 : index
    %672 = vector.load %arg15[%c1_218, %c0_219, %c0_220] : memref<2x32x96xbf16, #tpu.memory_space<vmem>>, vector<1x32x96xbf16>
    %673 = vector.shape_cast %672 : vector<1x32x96xbf16> to vector<32x96xbf16>
    %674 = arith.truncf %671 : vector<16x32xf32> to vector<16x32xbf16>
    %cst_221 = arith.constant dense<0.000000e+00> : vector<16x96xf32>
    %675 = tpu.matmul %674, %673, %cst_221 {dimension_numbers = #tpu.dot_dimension_numbers<[1], [0], [0], [1], [0, 0, 1, 1], [], []>} : vector<16x32xbf16>, vector<32x96xbf16>, vector<16x96xf32> -> vector<16x96xf32>
    %c1_222 = arith.constant 1 : index
    %c0_223 = arith.constant 0 : index
    %c0_224 = arith.constant 0 : index
    %676 = vector.load %arg16[%c1_222, %c0_223, %c0_224] : memref<2x1x96xf32, #tpu.memory_space<vmem>>, vector<1x1x96xf32>
    %677 = vector.shape_cast %676 : vector<1x1x96xf32> to vector<1x96xf32>
    %678 = vector.broadcast %677 : vector<1x96xf32> to vector<16x96xf32>
    %679 = arith.addf %675, %678 : vector<16x96xf32>
    %680 = arith.truncf %679 : vector<16x96xf32> to vector<16x96xbf16>
    %681 = vector.extract_strided_slice %680 {offsets = [0, 0], sizes = [16, 32], strides = [1, 1]} : vector<16x96xbf16> to vector<16x32xbf16>
    %682 = vector.extract_strided_slice %680 {offsets = [0, 32], sizes = [16, 32], strides = [1, 1]} : vector<16x96xbf16> to vector<16x32xbf16>
    %683 = vector.extract_strided_slice %680 {offsets = [0, 64], sizes = [16, 32], strides = [1, 1]} : vector<16x96xbf16> to vector<16x32xbf16>
    %684 = vector.extract_strided_slice %681 {offsets = [0, 0], sizes = [16, 8], strides = [1, 1]} : vector<16x32xbf16> to vector<16x8xbf16>
    %685 = vector.extract_strided_slice %681 {offsets = [0, 8], sizes = [16, 8], strides = [1, 1]} : vector<16x32xbf16> to vector<16x8xbf16>
    %686 = vector.extract_strided_slice %681 {offsets = [0, 16], sizes = [16, 8], strides = [1, 1]} : vector<16x32xbf16> to vector<16x8xbf16>
    %687 = vector.extract_strided_slice %681 {offsets = [0, 24], sizes = [16, 8], strides = [1, 1]} : vector<16x32xbf16> to vector<16x8xbf16>
    %688 = vector.shape_cast %684 : vector<16x8xbf16> to vector<1x16x8xbf16>
    %689 = vector.shape_cast %685 : vector<16x8xbf16> to vector<1x16x8xbf16>
    %690 = vector.shape_cast %686 : vector<16x8xbf16> to vector<1x16x8xbf16>
    %691 = vector.shape_cast %687 : vector<16x8xbf16> to vector<1x16x8xbf16>
    %692 = tpu.concatenate %688, %689, %690, %691 in 0 : vector<1x16x8xbf16>, vector<1x16x8xbf16>, vector<1x16x8xbf16>, vector<1x16x8xbf16> -> vector<4x16x8xbf16>
    %693 = vector.extract_strided_slice %682 {offsets = [0, 0], sizes = [16, 8], strides = [1, 1]} : vector<16x32xbf16> to vector<16x8xbf16>
    %694 = vector.extract_strided_slice %682 {offsets = [0, 8], sizes = [16, 8], strides = [1, 1]} : vector<16x32xbf16> to vector<16x8xbf16>
    %695 = vector.extract_strided_slice %682 {offsets = [0, 16], sizes = [16, 8], strides = [1, 1]} : vector<16x32xbf16> to vector<16x8xbf16>
    %696 = vector.extract_strided_slice %682 {offsets = [0, 24], sizes = [16, 8], strides = [1, 1]} : vector<16x32xbf16> to vector<16x8xbf16>
    %697 = vector.shape_cast %693 : vector<16x8xbf16> to vector<1x16x8xbf16>
    %698 = vector.shape_cast %694 : vector<16x8xbf16> to vector<1x16x8xbf16>
    %699 = vector.shape_cast %695 : vector<16x8xbf16> to vector<1x16x8xbf16>
    %700 = vector.shape_cast %696 : vector<16x8xbf16> to vector<1x16x8xbf16>
    %701 = tpu.concatenate %697, %698, %699, %700 in 0 : vector<1x16x8xbf16>, vector<1x16x8xbf16>, vector<1x16x8xbf16>, vector<1x16x8xbf16> -> vector<4x16x8xbf16>
    %702 = vector.extract_strided_slice %683 {offsets = [0, 0], sizes = [16, 8], strides = [1, 1]} : vector<16x32xbf16> to vector<16x8xbf16>
    %703 = vector.extract_strided_slice %683 {offsets = [0, 8], sizes = [16, 8], strides = [1, 1]} : vector<16x32xbf16> to vector<16x8xbf16>
    %704 = vector.extract_strided_slice %683 {offsets = [0, 16], sizes = [16, 8], strides = [1, 1]} : vector<16x32xbf16> to vector<16x8xbf16>
    %705 = vector.extract_strided_slice %683 {offsets = [0, 24], sizes = [16, 8], strides = [1, 1]} : vector<16x32xbf16> to vector<16x8xbf16>
    %706 = vector.shape_cast %702 : vector<16x8xbf16> to vector<1x16x8xbf16>
    %707 = vector.shape_cast %703 : vector<16x8xbf16> to vector<1x16x8xbf16>
    %708 = vector.shape_cast %704 : vector<16x8xbf16> to vector<1x16x8xbf16>
    %709 = vector.shape_cast %705 : vector<16x8xbf16> to vector<1x16x8xbf16>
    %710 = tpu.concatenate %706, %707, %708, %709 in 0 : vector<1x16x8xbf16>, vector<1x16x8xbf16>, vector<1x16x8xbf16>, vector<1x16x8xbf16> -> vector<4x16x8xbf16>
    "tpu.trace_start"() <{level = 10 : i32, message = "hqd,hkd->hqk"}> : () -> ()
    %cst_225 = arith.constant dense<0.000000e+00> : vector<4x16x16xf32>
    %711 = tpu.matmul %692, %701, %cst_225 {dimension_numbers = #tpu.dot_dimension_numbers<[2], [2], [1], [1], [0, 0, 0, 1, 1, 1], [0], [0]>} : vector<4x16x8xbf16>, vector<4x16x8xbf16>, vector<4x16x16xf32> -> vector<4x16x16xf32>
    "tpu.trace_stop"() : () -> ()
    %cst_226 = arith.constant 0.353553385 : f32
    %712 = vector.broadcast %cst_226 : f32 to vector<4x16x16xf32>
    %713 = arith.mulf %711, %712 : vector<4x16x16xf32>
    %714 = vector.broadcast %71 : vector<1x16x16xf32> to vector<4x16x16xf32>
    %715 = arith.addf %713, %714 : vector<4x16x16xf32>
    %cst_227 = arith.constant dense<0xFF800000> : vector<4x16xf32>
    %716 = vector.multi_reduction <maximumf>, %715, %cst_227 [2] : vector<4x16x16xf32> to vector<4x16xf32>
    %717 = vector.shape_cast %716 : vector<4x16xf32> to vector<4x16x1xf32>
    %718 = vector.broadcast %717 : vector<4x16x1xf32> to vector<4x16x16xf32>
    %719 = arith.subf %715, %718 : vector<4x16x16xf32>
    %720 = math.exp %719 : vector<4x16x16xf32>
    %cst_228 = arith.constant dense<0.000000e+00> : vector<4x16xf32>
    %721 = vector.multi_reduction <add>, %720, %cst_228 [2] : vector<4x16x16xf32> to vector<4x16xf32>
    %722 = vector.shape_cast %721 : vector<4x16xf32> to vector<4x16x1xf32>
    %723 = tpu.reciprocal %722 {approx = true} : vector<4x16x1xf32> -> vector<4x16x1xf32>
    %724 = vector.broadcast %723 : vector<4x16x1xf32> to vector<4x16x16xf32>
    %725 = arith.mulf %720, %724 : vector<4x16x16xf32>
    %726 = arith.truncf %725 : vector<4x16x16xf32> to vector<4x16x16xbf16>
    "tpu.trace_start"() <{level = 10 : i32, message = "hqk,hkd->hqd"}> : () -> ()
    %cst_229 = arith.constant dense<0.000000e+00> : vector<4x16x8xf32>
    %727 = tpu.matmul %726, %710, %cst_229 {dimension_numbers = #tpu.dot_dimension_numbers<[2], [1], [1], [2], [0, 0, 0, 1, 1, 2], [0], [0]>} : vector<4x16x16xbf16>, vector<4x16x8xbf16>, vector<4x16x8xf32> -> vector<4x16x8xf32>
    "tpu.trace_stop"() : () -> ()
    %728 = vector.extract_strided_slice %727 {offsets = [0, 0, 0], sizes = [1, 16, 8], strides = [1, 1, 1]} : vector<4x16x8xf32> to vector<1x16x8xf32>
    %729 = vector.shape_cast %728 : vector<1x16x8xf32> to vector<16x8xf32>
    %730 = vector.extract_strided_slice %727 {offsets = [1, 0, 0], sizes = [1, 16, 8], strides = [1, 1, 1]} : vector<4x16x8xf32> to vector<1x16x8xf32>
    %731 = vector.shape_cast %730 : vector<1x16x8xf32> to vector<16x8xf32>
    %732 = vector.extract_strided_slice %727 {offsets = [2, 0, 0], sizes = [1, 16, 8], strides = [1, 1, 1]} : vector<4x16x8xf32> to vector<1x16x8xf32>
    %733 = vector.shape_cast %732 : vector<1x16x8xf32> to vector<16x8xf32>
    %734 = vector.extract_strided_slice %727 {offsets = [3, 0, 0], sizes = [1, 16, 8], strides = [1, 1, 1]} : vector<4x16x8xf32> to vector<1x16x8xf32>
    %735 = vector.shape_cast %734 : vector<1x16x8xf32> to vector<16x8xf32>
    %736 = tpu.concatenate %729, %731, %733, %735 in 1 : vector<16x8xf32>, vector<16x8xf32>, vector<16x8xf32>, vector<16x8xf32> -> vector<16x32xf32>
    %c1_230 = arith.constant 1 : index
    %c0_231 = arith.constant 0 : index
    %c0_232 = arith.constant 0 : index
    %737 = vector.load %arg17[%c1_230, %c0_231, %c0_232] : memref<2x32x32xbf16, #tpu.memory_space<vmem>>, vector<1x32x32xbf16>
    %738 = vector.shape_cast %737 : vector<1x32x32xbf16> to vector<32x32xbf16>
    %739 = arith.truncf %736 : vector<16x32xf32> to vector<16x32xbf16>
    %cst_233 = arith.constant dense<0.000000e+00> : vector<16x32xf32>
    %740 = tpu.matmul %739, %738, %cst_233 {dimension_numbers = #tpu.dot_dimension_numbers<[1], [0], [0], [1], [0, 0, 1, 1], [], []>} : vector<16x32xbf16>, vector<32x32xbf16>, vector<16x32xf32> -> vector<16x32xf32>
    %c1_234 = arith.constant 1 : index
    %c0_235 = arith.constant 0 : index
    %c0_236 = arith.constant 0 : index
    %741 = vector.load %arg18[%c1_234, %c0_235, %c0_236] : memref<2x1x32xf32, #tpu.memory_space<vmem>>, vector<1x1x32xf32>
    %742 = vector.shape_cast %741 : vector<1x1x32xf32> to vector<1x32xf32>
    %743 = vector.broadcast %742 : vector<1x32xf32> to vector<16x32xf32>
    %744 = arith.addf %740, %743 : vector<16x32xf32>
    %745 = arith.addf %671, %744 : vector<16x32xf32>
    %c1_237 = arith.constant 1 : index
    %c0_238 = arith.constant 0 : index
    %c0_239 = arith.constant 0 : index
    %746 = vector.load %arg27[%c1_237, %c0_238, %c0_239] : memref<2x2x32xf32, #tpu.memory_space<vmem>>, vector<1x2x32xf32>
    %747 = vector.shape_cast %746 : vector<1x2x32xf32> to vector<2x32xf32>
    %748 = vector.extract_strided_slice %747 {offsets = [0, 0], sizes = [1, 32], strides = [1, 1]} : vector<2x32xf32> to vector<1x32xf32>
    %749 = vector.extract_strided_slice %747 {offsets = [1, 0], sizes = [1, 32], strides = [1, 1]} : vector<2x32xf32> to vector<1x32xf32>
    %cst_240 = arith.constant dense<0.000000e+00> : vector<16xf32>
    %750 = vector.multi_reduction <add>, %745, %cst_240 [1] : vector<16x32xf32> to vector<16xf32>
    %751 = vector.shape_cast %750 : vector<16xf32> to vector<16x1xf32>
    %cst_241 = arith.constant 3.200000e+01 : f32
    %752 = vector.broadcast %cst_241 : f32 to vector<16x1xf32>
    %753 = arith.divf %751, %752 : vector<16x1xf32>
    %754 = vector.broadcast %753 : vector<16x1xf32> to vector<16x32xf32>
    %755 = arith.subf %745, %754 : vector<16x32xf32>
    %756 = arith.mulf %755, %755 : vector<16x32xf32>
    %cst_242 = arith.constant dense<0.000000e+00> : vector<16xf32>
    %757 = vector.multi_reduction <add>, %756, %cst_242 [1] : vector<16x32xf32> to vector<16xf32>
    %758 = vector.shape_cast %757 : vector<16xf32> to vector<16x1xf32>
    %cst_243 = arith.constant 3.200000e+01 : f32
    %759 = vector.broadcast %cst_243 : f32 to vector<16x1xf32>
    %760 = arith.divf %758, %759 : vector<16x1xf32>
    %761 = vector.broadcast %753 : vector<16x1xf32> to vector<16x32xf32>
    %762 = arith.subf %745, %761 : vector<16x32xf32>
    %cst_244 = arith.constant 9.99999974E-6 : f32
    %763 = vector.broadcast %cst_244 : f32 to vector<16x1xf32>
    %764 = arith.addf %760, %763 : vector<16x1xf32>
    %765 = math.rsqrt %764 : vector<16x1xf32>
    %766 = vector.broadcast %765 : vector<16x1xf32> to vector<16x32xf32>
    %767 = arith.mulf %762, %766 : vector<16x32xf32>
    %768 = vector.broadcast %748 : vector<1x32xf32> to vector<16x32xf32>
    %769 = arith.mulf %767, %768 : vector<16x32xf32>
    %770 = vector.broadcast %749 : vector<1x32xf32> to vector<16x32xf32>
    %771 = arith.addf %769, %770 : vector<16x32xf32>
    %c1_245 = arith.constant 1 : index
    %c0_246 = arith.constant 0 : index
    %c0_247 = arith.constant 0 : index
    %772 = vector.load %arg19[%c1_245, %c0_246, %c0_247] : memref<2x32x96xbf16, #tpu.memory_space<vmem>>, vector<1x32x96xbf16>
    %773 = vector.shape_cast %772 : vector<1x32x96xbf16> to vector<32x96xbf16>
    %c1_248 = arith.constant 1 : index
    %c0_249 = arith.constant 0 : index
    %c0_250 = arith.constant 0 : index
    %774 = vector.load %arg20[%c1_248, %c0_249, %c0_250] : memref<2x1x96xf32, #tpu.memory_space<vmem>>, vector<1x1x96xf32>
    %775 = vector.shape_cast %774 : vector<1x1x96xf32> to vector<1x96xf32>
    %776 = vector.extract_strided_slice %773 {offsets = [0, 0], sizes = [32, 32], strides = [1, 1]} : vector<32x96xbf16> to vector<32x32xbf16>
    %777 = arith.truncf %771 : vector<16x32xf32> to vector<16x32xbf16>
    %cst_251 = arith.constant dense<0.000000e+00> : vector<16x32xf32>
    %778 = tpu.matmul %777, %776, %cst_251 {dimension_numbers = #tpu.dot_dimension_numbers<[1], [0], [0], [1], [0, 0, 1, 1], [], []>} : vector<16x32xbf16>, vector<32x32xbf16>, vector<16x32xf32> -> vector<16x32xf32>
    %779 = vector.extract_strided_slice %775 {offsets = [0, 0], sizes = [1, 32], strides = [1, 1]} : vector<1x96xf32> to vector<1x32xf32>
    %780 = vector.broadcast %779 : vector<1x32xf32> to vector<16x32xf32>
    %781 = arith.addf %778, %780 : vector<16x32xf32>
    %782 = arith.truncf %781 : vector<16x32xf32> to vector<16x32xbf16>
    %783 = vector.extract_strided_slice %773 {offsets = [0, 32], sizes = [32, 64], strides = [1, 1]} : vector<32x96xbf16> to vector<32x64xbf16>
    %cst_252 = arith.constant dense<0.000000e+00> : vector<16x64xf32>
    %784 = tpu.matmul %419, %783, %cst_252 {dimension_numbers = #tpu.dot_dimension_numbers<[1], [0], [0], [1], [0, 0, 1, 1], [], []>} : vector<16x32xbf16>, vector<32x64xbf16>, vector<16x64xf32> -> vector<16x64xf32>
    %785 = vector.extract_strided_slice %775 {offsets = [0, 32], sizes = [1, 64], strides = [1, 1]} : vector<1x96xf32> to vector<1x64xf32>
    %786 = vector.broadcast %785 : vector<1x64xf32> to vector<16x64xf32>
    %787 = arith.addf %784, %786 : vector<16x64xf32>
    %788 = arith.truncf %787 : vector<16x64xf32> to vector<16x64xbf16>
    %789 = vector.extract_strided_slice %788 {offsets = [0, 0], sizes = [16, 32], strides = [1, 1]} : vector<16x64xbf16> to vector<16x32xbf16>
    %790 = vector.extract_strided_slice %788 {offsets = [0, 32], sizes = [16, 32], strides = [1, 1]} : vector<16x64xbf16> to vector<16x32xbf16>
    %791 = vector.extract_strided_slice %782 {offsets = [0, 0], sizes = [16, 8], strides = [1, 1]} : vector<16x32xbf16> to vector<16x8xbf16>
    %792 = vector.extract_strided_slice %782 {offsets = [0, 8], sizes = [16, 8], strides = [1, 1]} : vector<16x32xbf16> to vector<16x8xbf16>
    %793 = vector.extract_strided_slice %782 {offsets = [0, 16], sizes = [16, 8], strides = [1, 1]} : vector<16x32xbf16> to vector<16x8xbf16>
    %794 = vector.extract_strided_slice %782 {offsets = [0, 24], sizes = [16, 8], strides = [1, 1]} : vector<16x32xbf16> to vector<16x8xbf16>
    %795 = vector.shape_cast %791 : vector<16x8xbf16> to vector<1x16x8xbf16>
    %796 = vector.shape_cast %792 : vector<16x8xbf16> to vector<1x16x8xbf16>
    %797 = vector.shape_cast %793 : vector<16x8xbf16> to vector<1x16x8xbf16>
    %798 = vector.shape_cast %794 : vector<16x8xbf16> to vector<1x16x8xbf16>
    %799 = tpu.concatenate %795, %796, %797, %798 in 0 : vector<1x16x8xbf16>, vector<1x16x8xbf16>, vector<1x16x8xbf16>, vector<1x16x8xbf16> -> vector<4x16x8xbf16>
    %800 = vector.extract_strided_slice %789 {offsets = [0, 0], sizes = [16, 8], strides = [1, 1]} : vector<16x32xbf16> to vector<16x8xbf16>
    %801 = vector.extract_strided_slice %789 {offsets = [0, 8], sizes = [16, 8], strides = [1, 1]} : vector<16x32xbf16> to vector<16x8xbf16>
    %802 = vector.extract_strided_slice %789 {offsets = [0, 16], sizes = [16, 8], strides = [1, 1]} : vector<16x32xbf16> to vector<16x8xbf16>
    %803 = vector.extract_strided_slice %789 {offsets = [0, 24], sizes = [16, 8], strides = [1, 1]} : vector<16x32xbf16> to vector<16x8xbf16>
    %804 = vector.shape_cast %800 : vector<16x8xbf16> to vector<1x16x8xbf16>
    %805 = vector.shape_cast %801 : vector<16x8xbf16> to vector<1x16x8xbf16>
    %806 = vector.shape_cast %802 : vector<16x8xbf16> to vector<1x16x8xbf16>
    %807 = vector.shape_cast %803 : vector<16x8xbf16> to vector<1x16x8xbf16>
    %808 = tpu.concatenate %804, %805, %806, %807 in 0 : vector<1x16x8xbf16>, vector<1x16x8xbf16>, vector<1x16x8xbf16>, vector<1x16x8xbf16> -> vector<4x16x8xbf16>
    %809 = vector.extract_strided_slice %790 {offsets = [0, 0], sizes = [16, 8], strides = [1, 1]} : vector<16x32xbf16> to vector<16x8xbf16>
    %810 = vector.extract_strided_slice %790 {offsets = [0, 8], sizes = [16, 8], strides = [1, 1]} : vector<16x32xbf16> to vector<16x8xbf16>
    %811 = vector.extract_strided_slice %790 {offsets = [0, 16], sizes = [16, 8], strides = [1, 1]} : vector<16x32xbf16> to vector<16x8xbf16>
    %812 = vector.extract_strided_slice %790 {offsets = [0, 24], sizes = [16, 8], strides = [1, 1]} : vector<16x32xbf16> to vector<16x8xbf16>
    %813 = vector.shape_cast %809 : vector<16x8xbf16> to vector<1x16x8xbf16>
    %814 = vector.shape_cast %810 : vector<16x8xbf16> to vector<1x16x8xbf16>
    %815 = vector.shape_cast %811 : vector<16x8xbf16> to vector<1x16x8xbf16>
    %816 = vector.shape_cast %812 : vector<16x8xbf16> to vector<1x16x8xbf16>
    %817 = tpu.concatenate %813, %814, %815, %816 in 0 : vector<1x16x8xbf16>, vector<1x16x8xbf16>, vector<1x16x8xbf16>, vector<1x16x8xbf16> -> vector<4x16x8xbf16>
    "tpu.trace_start"() <{level = 10 : i32, message = "hqd,hkd->hqk"}> : () -> ()
    %cst_253 = arith.constant dense<0.000000e+00> : vector<4x16x16xf32>
    %818 = tpu.matmul %799, %808, %cst_253 {dimension_numbers = #tpu.dot_dimension_numbers<[2], [2], [1], [1], [0, 0, 0, 1, 1, 1], [0], [0]>} : vector<4x16x8xbf16>, vector<4x16x8xbf16>, vector<4x16x16xf32> -> vector<4x16x16xf32>
    "tpu.trace_stop"() : () -> ()
    %cst_254 = arith.constant 0.353553385 : f32
    %819 = vector.broadcast %cst_254 : f32 to vector<4x16x16xf32>
    %820 = arith.mulf %818, %819 : vector<4x16x16xf32>
    %821 = vector.broadcast %103 : vector<1x16x16xf32> to vector<4x16x16xf32>
    %822 = arith.addf %820, %821 : vector<4x16x16xf32>
    %cst_255 = arith.constant dense<0xFF800000> : vector<4x16xf32>
    %823 = vector.multi_reduction <maximumf>, %822, %cst_255 [2] : vector<4x16x16xf32> to vector<4x16xf32>
    %824 = vector.shape_cast %823 : vector<4x16xf32> to vector<4x16x1xf32>
    %825 = vector.broadcast %824 : vector<4x16x1xf32> to vector<4x16x16xf32>
    %826 = arith.subf %822, %825 : vector<4x16x16xf32>
    %827 = math.exp %826 : vector<4x16x16xf32>
    %cst_256 = arith.constant dense<0.000000e+00> : vector<4x16xf32>
    %828 = vector.multi_reduction <add>, %827, %cst_256 [2] : vector<4x16x16xf32> to vector<4x16xf32>
    %829 = vector.shape_cast %828 : vector<4x16xf32> to vector<4x16x1xf32>
    %830 = tpu.reciprocal %829 {approx = true} : vector<4x16x1xf32> -> vector<4x16x1xf32>
    %831 = vector.broadcast %830 : vector<4x16x1xf32> to vector<4x16x16xf32>
    %832 = arith.mulf %827, %831 : vector<4x16x16xf32>
    %833 = arith.truncf %832 : vector<4x16x16xf32> to vector<4x16x16xbf16>
    "tpu.trace_start"() <{level = 10 : i32, message = "hqk,hkd->hqd"}> : () -> ()
    %cst_257 = arith.constant dense<0.000000e+00> : vector<4x16x8xf32>
    %834 = tpu.matmul %833, %817, %cst_257 {dimension_numbers = #tpu.dot_dimension_numbers<[2], [1], [1], [2], [0, 0, 0, 1, 1, 2], [0], [0]>} : vector<4x16x16xbf16>, vector<4x16x8xbf16>, vector<4x16x8xf32> -> vector<4x16x8xf32>
    "tpu.trace_stop"() : () -> ()
    %835 = vector.extract_strided_slice %834 {offsets = [0, 0, 0], sizes = [1, 16, 8], strides = [1, 1, 1]} : vector<4x16x8xf32> to vector<1x16x8xf32>
    %836 = vector.shape_cast %835 : vector<1x16x8xf32> to vector<16x8xf32>
    %837 = vector.extract_strided_slice %834 {offsets = [1, 0, 0], sizes = [1, 16, 8], strides = [1, 1, 1]} : vector<4x16x8xf32> to vector<1x16x8xf32>
    %838 = vector.shape_cast %837 : vector<1x16x8xf32> to vector<16x8xf32>
    %839 = vector.extract_strided_slice %834 {offsets = [2, 0, 0], sizes = [1, 16, 8], strides = [1, 1, 1]} : vector<4x16x8xf32> to vector<1x16x8xf32>
    %840 = vector.shape_cast %839 : vector<1x16x8xf32> to vector<16x8xf32>
    %841 = vector.extract_strided_slice %834 {offsets = [3, 0, 0], sizes = [1, 16, 8], strides = [1, 1, 1]} : vector<4x16x8xf32> to vector<1x16x8xf32>
    %842 = vector.shape_cast %841 : vector<1x16x8xf32> to vector<16x8xf32>
    %843 = tpu.concatenate %836, %838, %840, %842 in 1 : vector<16x8xf32>, vector<16x8xf32>, vector<16x8xf32>, vector<16x8xf32> -> vector<16x32xf32>
    %c1_258 = arith.constant 1 : index
    %c0_259 = arith.constant 0 : index
    %c0_260 = arith.constant 0 : index
    %844 = vector.load %arg21[%c1_258, %c0_259, %c0_260] : memref<2x32x32xbf16, #tpu.memory_space<vmem>>, vector<1x32x32xbf16>
    %845 = vector.shape_cast %844 : vector<1x32x32xbf16> to vector<32x32xbf16>
    %846 = arith.truncf %843 : vector<16x32xf32> to vector<16x32xbf16>
    %cst_261 = arith.constant dense<0.000000e+00> : vector<16x32xf32>
    %847 = tpu.matmul %846, %845, %cst_261 {dimension_numbers = #tpu.dot_dimension_numbers<[1], [0], [0], [1], [0, 0, 1, 1], [], []>} : vector<16x32xbf16>, vector<32x32xbf16>, vector<16x32xf32> -> vector<16x32xf32>
    %c1_262 = arith.constant 1 : index
    %c0_263 = arith.constant 0 : index
    %c0_264 = arith.constant 0 : index
    %848 = vector.load %arg22[%c1_262, %c0_263, %c0_264] : memref<2x1x32xf32, #tpu.memory_space<vmem>>, vector<1x1x32xf32>
    %849 = vector.shape_cast %848 : vector<1x1x32xf32> to vector<1x32xf32>
    %850 = vector.broadcast %849 : vector<1x32xf32> to vector<16x32xf32>
    %851 = arith.addf %847, %850 : vector<16x32xf32>
    %852 = arith.addf %771, %851 : vector<16x32xf32>
    %c1_265 = arith.constant 1 : index
    %c0_266 = arith.constant 0 : index
    %c0_267 = arith.constant 0 : index
    %853 = vector.load %arg28[%c1_265, %c0_266, %c0_267] : memref<2x2x32xf32, #tpu.memory_space<vmem>>, vector<1x2x32xf32>
    %854 = vector.shape_cast %853 : vector<1x2x32xf32> to vector<2x32xf32>
    %855 = vector.extract_strided_slice %854 {offsets = [0, 0], sizes = [1, 32], strides = [1, 1]} : vector<2x32xf32> to vector<1x32xf32>
    %856 = vector.extract_strided_slice %854 {offsets = [1, 0], sizes = [1, 32], strides = [1, 1]} : vector<2x32xf32> to vector<1x32xf32>
    %cst_268 = arith.constant dense<0.000000e+00> : vector<16xf32>
    %857 = vector.multi_reduction <add>, %852, %cst_268 [1] : vector<16x32xf32> to vector<16xf32>
    %858 = vector.shape_cast %857 : vector<16xf32> to vector<16x1xf32>
    %cst_269 = arith.constant 3.200000e+01 : f32
    %859 = vector.broadcast %cst_269 : f32 to vector<16x1xf32>
    %860 = arith.divf %858, %859 : vector<16x1xf32>
    %861 = vector.broadcast %860 : vector<16x1xf32> to vector<16x32xf32>
    %862 = arith.subf %852, %861 : vector<16x32xf32>
    %863 = arith.mulf %862, %862 : vector<16x32xf32>
    %cst_270 = arith.constant dense<0.000000e+00> : vector<16xf32>
    %864 = vector.multi_reduction <add>, %863, %cst_270 [1] : vector<16x32xf32> to vector<16xf32>
    %865 = vector.shape_cast %864 : vector<16xf32> to vector<16x1xf32>
    %cst_271 = arith.constant 3.200000e+01 : f32
    %866 = vector.broadcast %cst_271 : f32 to vector<16x1xf32>
    %867 = arith.divf %865, %866 : vector<16x1xf32>
    %868 = vector.broadcast %860 : vector<16x1xf32> to vector<16x32xf32>
    %869 = arith.subf %852, %868 : vector<16x32xf32>
    %cst_272 = arith.constant 9.99999974E-6 : f32
    %870 = vector.broadcast %cst_272 : f32 to vector<16x1xf32>
    %871 = arith.addf %867, %870 : vector<16x1xf32>
    %872 = math.rsqrt %871 : vector<16x1xf32>
    %873 = vector.broadcast %872 : vector<16x1xf32> to vector<16x32xf32>
    %874 = arith.mulf %869, %873 : vector<16x32xf32>
    %875 = vector.broadcast %855 : vector<1x32xf32> to vector<16x32xf32>
    %876 = arith.mulf %874, %875 : vector<16x32xf32>
    %877 = vector.broadcast %856 : vector<1x32xf32> to vector<16x32xf32>
    %878 = arith.addf %876, %877 : vector<16x32xf32>
    %c1_273 = arith.constant 1 : index
    %c0_274 = arith.constant 0 : index
    %c0_275 = arith.constant 0 : index
    %879 = vector.load %arg23[%c1_273, %c0_274, %c0_275] : memref<2x32x64xbf16, #tpu.memory_space<vmem>>, vector<1x32x64xbf16>
    %880 = vector.shape_cast %879 : vector<1x32x64xbf16> to vector<32x64xbf16>
    %881 = arith.truncf %878 : vector<16x32xf32> to vector<16x32xbf16>
    %cst_276 = arith.constant dense<0.000000e+00> : vector<16x64xf32>
    %882 = tpu.matmul %881, %880, %cst_276 {dimension_numbers = #tpu.dot_dimension_numbers<[1], [0], [0], [1], [0, 0, 1, 1], [], []>} : vector<16x32xbf16>, vector<32x64xbf16>, vector<16x64xf32> -> vector<16x64xf32>
    %c1_277 = arith.constant 1 : index
    %c0_278 = arith.constant 0 : index
    %c0_279 = arith.constant 0 : index
    %883 = vector.load %arg24[%c1_277, %c0_278, %c0_279] : memref<2x1x64xf32, #tpu.memory_space<vmem>>, vector<1x1x64xf32>
    %884 = vector.shape_cast %883 : vector<1x1x64xf32> to vector<1x64xf32>
    %885 = vector.broadcast %884 : vector<1x64xf32> to vector<16x64xf32>
    %886 = arith.addf %882, %885 : vector<16x64xf32>
    %cst_280 = arith.constant 0.000000e+00 : f32
    %887 = vector.broadcast %cst_280 : f32 to vector<16x64xf32>
    %888 = arith.maximumf %886, %887 : vector<16x64xf32>
    %889 = arith.truncf %888 : vector<16x64xf32> to vector<16x64xbf16>
    %c1_281 = arith.constant 1 : index
    %c0_282 = arith.constant 0 : index
    %c0_283 = arith.constant 0 : index
    %890 = vector.load %arg25[%c1_281, %c0_282, %c0_283] : memref<2x64x32xbf16, #tpu.memory_space<vmem>>, vector<1x64x32xbf16>
    %891 = vector.shape_cast %890 : vector<1x64x32xbf16> to vector<64x32xbf16>
    %cst_284 = arith.constant dense<0.000000e+00> : vector<16x32xf32>
    %892 = tpu.matmul %889, %891, %cst_284 {dimension_numbers = #tpu.dot_dimension_numbers<[1], [0], [0], [1], [0, 0, 1, 1], [], []>} : vector<16x64xbf16>, vector<64x32xbf16>, vector<16x32xf32> -> vector<16x32xf32>
    %c1_285 = arith.constant 1 : index
    %c0_286 = arith.constant 0 : index
    %c0_287 = arith.constant 0 : index
    %893 = vector.load %arg26[%c1_285, %c0_286, %c0_287] : memref<2x1x32xf32, #tpu.memory_space<vmem>>, vector<1x1x32xf32>
    %894 = vector.shape_cast %893 : vector<1x1x32xf32> to vector<1x32xf32>
    %895 = vector.broadcast %894 : vector<1x32xf32> to vector<16x32xf32>
    %896 = arith.addf %892, %895 : vector<16x32xf32>
    %897 = arith.addf %878, %896 : vector<16x32xf32>
    %c1_288 = arith.constant 1 : index
    %c0_289 = arith.constant 0 : index
    %c0_290 = arith.constant 0 : index
    %898 = vector.load %arg29[%c1_288, %c0_289, %c0_290] : memref<2x2x32xf32, #tpu.memory_space<vmem>>, vector<1x2x32xf32>
    %899 = vector.shape_cast %898 : vector<1x2x32xf32> to vector<2x32xf32>
    %900 = vector.extract_strided_slice %899 {offsets = [0, 0], sizes = [1, 32], strides = [1, 1]} : vector<2x32xf32> to vector<1x32xf32>
    %901 = vector.extract_strided_slice %899 {offsets = [1, 0], sizes = [1, 32], strides = [1, 1]} : vector<2x32xf32> to vector<1x32xf32>
    %cst_291 = arith.constant dense<0.000000e+00> : vector<16xf32>
    %902 = vector.multi_reduction <add>, %897, %cst_291 [1] : vector<16x32xf32> to vector<16xf32>
    %903 = vector.shape_cast %902 : vector<16xf32> to vector<16x1xf32>
    %cst_292 = arith.constant 3.200000e+01 : f32
    %904 = vector.broadcast %cst_292 : f32 to vector<16x1xf32>
    %905 = arith.divf %903, %904 : vector<16x1xf32>
    %906 = vector.broadcast %905 : vector<16x1xf32> to vector<16x32xf32>
    %907 = arith.subf %897, %906 : vector<16x32xf32>
    %908 = arith.mulf %907, %907 : vector<16x32xf32>
    %cst_293 = arith.constant dense<0.000000e+00> : vector<16xf32>
    %909 = vector.multi_reduction <add>, %908, %cst_293 [1] : vector<16x32xf32> to vector<16xf32>
    %910 = vector.shape_cast %909 : vector<16xf32> to vector<16x1xf32>
    %cst_294 = arith.constant 3.200000e+01 : f32
    %911 = vector.broadcast %cst_294 : f32 to vector<16x1xf32>
    %912 = arith.divf %910, %911 : vector<16x1xf32>
    %913 = vector.broadcast %905 : vector<16x1xf32> to vector<16x32xf32>
    %914 = arith.subf %897, %913 : vector<16x32xf32>
    %cst_295 = arith.constant 9.99999974E-6 : f32
    %915 = vector.broadcast %cst_295 : f32 to vector<16x1xf32>
    %916 = arith.addf %912, %915 : vector<16x1xf32>
    %917 = math.rsqrt %916 : vector<16x1xf32>
    %918 = vector.broadcast %917 : vector<16x1xf32> to vector<16x32xf32>
    %919 = arith.mulf %914, %918 : vector<16x32xf32>
    %920 = vector.broadcast %900 : vector<1x32xf32> to vector<16x32xf32>
    %921 = arith.mulf %919, %920 : vector<16x32xf32>
    %922 = vector.broadcast %901 : vector<1x32xf32> to vector<16x32xf32>
    %923 = arith.addf %921, %922 : vector<16x32xf32>
    %c0_296 = arith.constant 0 : index
    %c0_297 = arith.constant 0 : index
    %924 = vector.load %arg30[%c0_296, %c0_297] : memref<2x32xf32, #tpu.memory_space<vmem>>, vector<2x32xf32>
    %925 = vector.extract_strided_slice %924 {offsets = [0, 0], sizes = [1, 32], strides = [1, 1]} : vector<2x32xf32> to vector<1x32xf32>
    %926 = vector.extract_strided_slice %924 {offsets = [1, 0], sizes = [1, 32], strides = [1, 1]} : vector<2x32xf32> to vector<1x32xf32>
    %cst_298 = arith.constant dense<0.000000e+00> : vector<16xf32>
    %927 = vector.multi_reduction <add>, %923, %cst_298 [1] : vector<16x32xf32> to vector<16xf32>
    %928 = vector.shape_cast %927 : vector<16xf32> to vector<16x1xf32>
    %cst_299 = arith.constant 3.200000e+01 : f32
    %929 = vector.broadcast %cst_299 : f32 to vector<16x1xf32>
    %930 = arith.divf %928, %929 : vector<16x1xf32>
    %931 = vector.broadcast %930 : vector<16x1xf32> to vector<16x32xf32>
    %932 = arith.subf %923, %931 : vector<16x32xf32>
    %933 = arith.mulf %932, %932 : vector<16x32xf32>
    %cst_300 = arith.constant dense<0.000000e+00> : vector<16xf32>
    %934 = vector.multi_reduction <add>, %933, %cst_300 [1] : vector<16x32xf32> to vector<16xf32>
    %935 = vector.shape_cast %934 : vector<16xf32> to vector<16x1xf32>
    %cst_301 = arith.constant 3.200000e+01 : f32
    %936 = vector.broadcast %cst_301 : f32 to vector<16x1xf32>
    %937 = arith.divf %935, %936 : vector<16x1xf32>
    %938 = vector.broadcast %930 : vector<16x1xf32> to vector<16x32xf32>
    %939 = arith.subf %923, %938 : vector<16x32xf32>
    %cst_302 = arith.constant 9.99999974E-6 : f32
    %940 = vector.broadcast %cst_302 : f32 to vector<16x1xf32>
    %941 = arith.addf %937, %940 : vector<16x1xf32>
    %942 = math.rsqrt %941 : vector<16x1xf32>
    %943 = vector.broadcast %942 : vector<16x1xf32> to vector<16x32xf32>
    %944 = arith.mulf %939, %943 : vector<16x32xf32>
    %945 = vector.broadcast %925 : vector<1x32xf32> to vector<16x32xf32>
    %946 = arith.mulf %944, %945 : vector<16x32xf32>
    %947 = vector.broadcast %926 : vector<1x32xf32> to vector<16x32xf32>
    %948 = arith.addf %946, %947 : vector<16x32xf32>
    %c0_303 = arith.constant 0 : index
    %c0_304 = arith.constant 0 : index
    %949 = vector.load %arg31[%c0_303, %c0_304] : memref<32x128xbf16, #tpu.memory_space<vmem>>, vector<32x128xbf16>
    %950 = arith.truncf %948 : vector<16x32xf32> to vector<16x32xbf16>
    %cst_305 = arith.constant dense<0.000000e+00> : vector<16x128xf32>
    %951 = tpu.matmul %950, %949, %cst_305 {dimension_numbers = #tpu.dot_dimension_numbers<[1], [0], [0], [1], [0, 0, 1, 1], [], []>} : vector<16x32xbf16>, vector<32x128xbf16>, vector<16x128xf32> -> vector<16x128xf32>
    %c0_306 = arith.constant 0 : index
    %c0_307 = arith.constant 0 : index
    %952 = vector.load %arg32[%c0_306, %c0_307] : memref<1x128xf32, #tpu.memory_space<vmem>>, vector<1x128xf32>
    %953 = vector.broadcast %952 : vector<1x128xf32> to vector<16x128xf32>
    %954 = arith.addf %951, %953 : vector<16x128xf32>
    %c0_308 = arith.constant 0 : index
    %c0_309 = arith.constant 0 : index
    %955 = vector.load %arg33[%c0_308, %c0_309] : memref<16x128xf32, #tpu.memory_space<vmem>>, vector<16x128xf32>
    tpu.vector_store %arg33[%c0_308, %c0_309], %954 {strides = array<i32>} : memref<16x128xf32, #tpu.memory_space<vmem>>, vector<16x128xf32>,
    return
  }
  func.func @transform_0(%arg0: i32) -> (i32, i32) {
    %c0_i32 = arith.constant 0 : i32
    %c0_i32_0 = arith.constant 0 : i32
    %c0_i32_1 = arith.constant 0 : i32
    return %c0_i32, %c0_i32_0 : i32, i32
  }
  func.func @transform_1(%arg0: i32) -> (i32, i32) {
    %c0_i32 = arith.constant 0 : i32
    %c0_i32_0 = arith.constant 0 : i32
    %c0_i32_1 = arith.constant 0 : i32
    return %c0_i32, %c0_i32_0 : i32, i32
  }
  func.func @transform_2(%arg0: i32) -> (i32, i32) {
    %c0_i32 = arith.constant 0 : i32
    %c0_i32_0 = arith.constant 0 : i32
    %c0_i32_1 = arith.constant 0 : i32
    return %c0_i32, %c0_i32_0 : i32, i32
  }
  func.func @transform_3(%arg0: i32) -> (i32, i32, i32) {
    %c0_i32 = arith.constant 0 : i32
    %c0_i32_0 = arith.constant 0 : i32
    %c0_i32_1 = arith.constant 0 : i32
    %c0_i32_2 = arith.constant 0 : i32
    return %c0_i32, %c0_i32_0, %c0_i32_1 : i32, i32, i32
  }
  func.func @transform_4(%arg0: i32) -> (i32, i32, i32) {
    %c0_i32 = arith.constant 0 : i32
    %c0_i32_0 = arith.constant 0 : i32
    %c0_i32_1 = arith.constant 0 : i32
    %c0_i32_2 = arith.constant 0 : i32
    return %c0_i32, %c0_i32_0, %c0_i32_1 : i32, i32, i32
  }
  func.func @transform_5(%arg0: i32) -> (i32, i32, i32) {
    %c0_i32 = arith.constant 0 : i32
    %c0_i32_0 = arith.constant 0 : i32
    %c0_i32_1 = arith.constant 0 : i32
    %c0_i32_2 = arith.constant 0 : i32
    return %c0_i32, %c0_i32_0, %c0_i32_1 : i32, i32, i32
  }
  func.func @transform_6(%arg0: i32) -> (i32, i32, i32) {
    %c0_i32 = arith.constant 0 : i32
    %c0_i32_0 = arith.constant 0 : i32
    %c0_i32_1 = arith.constant 0 : i32
    %c0_i32_2 = arith.constant 0 : i32
    return %c0_i32, %c0_i32_0, %c0_i32_1 : i32, i32, i32
  }
  func.func @transform_7(%arg0: i32) -> (i32, i32, i32) {
    %c0_i32 = arith.constant 0 : i32
    %c0_i32_0 = arith.constant 0 : i32
    %c0_i32_1 = arith.constant 0 : i32
    %c0_i32_2 = arith.constant 0 : i32
    return %c0_i32, %c0_i32_0, %c0_i32_1 : i32, i32, i32
  }
  func.func @transform_8(%arg0: i32) -> (i32, i32, i32) {
    %c0_i32 = arith.constant 0 : i32
    %c0_i32_0 = arith.constant 0 : i32
    %c0_i32_1 = arith.constant 0 : i32
    %c0_i32_2 = arith.constant 0 : i32
    return %c0_i32, %c0_i32_0, %c0_i32_1 : i32, i32, i32
  }
  func.func @transform_9(%arg0: i32) -> (i32, i32, i32) {
    %c0_i32 = arith.constant 0 : i32
    %c0_i32_0 = arith.constant 0 : i32
    %c0_i32_1 = arith.constant 0 : i32
    %c0_i32_2 = arith.constant 0 : i32
    return %c0_i32, %c0_i32_0, %c0_i32_1 : i32, i32, i32
  }
  func.func @transform_10(%arg0: i32) -> (i32, i32, i32) {
    %c0_i32 = arith.constant 0 : i32
    %c0_i32_0 = arith.constant 0 : i32
    %c0_i32_1 = arith.constant 0 : i32
    %c0_i32_2 = arith.constant 0 : i32
    return %c0_i32, %c0_i32_0, %c0_i32_1 : i32, i32, i32
  }
  func.func @transform_11(%arg0: i32) -> (i32, i32, i32) {
    %c0_i32 = arith.constant 0 : i32
    %c0_i32_0 = arith.constant 0 : i32
    %c0_i32_1 = arith.constant 0 : i32
    %c0_i32_2 = arith.constant 0 : i32
    return %c0_i32, %c0_i32_0, %c0_i32_1 : i32, i32, i32
  }
  func.func @transform_12(%arg0: i32) -> (i32, i32, i32) {
    %c0_i32 = arith.constant 0 : i32
    %c0_i32_0 = arith.constant 0 : i32
    %c0_i32_1 = arith.constant 0 : i32
    %c0_i32_2 = arith.constant 0 : i32
    return %c0_i32, %c0_i32_0, %c0_i32_1 : i32, i32, i32
  }
  func.func @transform_13(%arg0: i32) -> (i32, i32) {
    %c0_i32 = arith.constant 0 : i32
    %c0_i32_0 = arith.constant 0 : i32
    %c0_i32_1 = arith.constant 0 : i32
    return %c0_i32, %c0_i32_0 : i32, i32
  }
  func.func @transform_14(%arg0: i32) -> (i32, i32, i32) {
    %c0_i32 = arith.constant 0 : i32
    %c0_i32_0 = arith.constant 0 : i32
    %c0_i32_1 = arith.constant 0 : i32
    %c0_i32_2 = arith.constant 0 : i32
    return %c0_i32, %c0_i32_0, %c0_i32_1 : i32, i32, i32
  }
  func.func @transform_15(%arg0: i32) -> (i32, i32, i32) {
    %c0_i32 = arith.constant 0 : i32
    %c0_i32_0 = arith.constant 0 : i32
    %c0_i32_1 = arith.constant 0 : i32
    %c0_i32_2 = arith.constant 0 : i32
    return %c0_i32, %c0_i32_0, %c0_i32_1 : i32, i32, i32
  }
  func.func @transform_16(%arg0: i32) -> (i32, i32, i32) {
    %c0_i32 = arith.constant 0 : i32
    %c0_i32_0 = arith.constant 0 : i32
    %c0_i32_1 = arith.constant 0 : i32
    %c0_i32_2 = arith.constant 0 : i32
    return %c0_i32, %c0_i32_0, %c0_i32_1 : i32, i32, i32
  }
  func.func @transform_17(%arg0: i32) -> (i32, i32, i32) {
    %c0_i32 = arith.constant 0 : i32
    %c0_i32_0 = arith.constant 0 : i32
    %c0_i32_1 = arith.constant 0 : i32
    %c0_i32_2 = arith.constant 0 : i32
    return %c0_i32, %c0_i32_0, %c0_i32_1 : i32, i32, i32
  }
  func.func @transform_18(%arg0: i32) -> (i32, i32, i32) {
    %c0_i32 = arith.constant 0 : i32
    %c0_i32_0 = arith.constant 0 : i32
    %c0_i32_1 = arith.constant 0 : i32
    %c0_i32_2 = arith.constant 0 : i32
    return %c0_i32, %c0_i32_0, %c0_i32_1 : i32, i32, i32
  }
  func.func @transform_19(%arg0: i32) -> (i32, i32, i32) {
    %c0_i32 = arith.constant 0 : i32
    %c0_i32_0 = arith.constant 0 : i32
    %c0_i32_1 = arith.constant 0 : i32
    %c0_i32_2 = arith.constant 0 : i32
    return %c0_i32, %c0_i32_0, %c0_i32_1 : i32, i32, i32
  }
  func.func @transform_20(%arg0: i32) -> (i32, i32, i32) {
    %c0_i32 = arith.constant 0 : i32
    %c0_i32_0 = arith.constant 0 : i32
    %c0_i32_1 = arith.constant 0 : i32
    %c0_i32_2 = arith.constant 0 : i32
    return %c0_i32, %c0_i32_0, %c0_i32_1 : i32, i32, i32
  }
  func.func @transform_21(%arg0: i32) -> (i32, i32, i32) {
    %c0_i32 = arith.constant 0 : i32
    %c0_i32_0 = arith.constant 0 : i32
    %c0_i32_1 = arith.constant 0 : i32
    %c0_i32_2 = arith.constant 0 : i32
    return %c0_i32, %c0_i32_0, %c0_i32_1 : i32, i32, i32
  }
  func.func @transform_22(%arg0: i32) -> (i32, i32, i32) {
    %c0_i32 = arith.constant 0 : i32
    %c0_i32_0 = arith.constant 0 : i32
    %c0_i32_1 = arith.constant 0 : i32
    %c0_i32_2 = arith.constant 0 : i32
    return %c0_i32, %c0_i32_0, %c0_i32_1 : i32, i32, i32
  }
  func.func @transform_23(%arg0: i32) -> (i32, i32, i32) {
    %c0_i32 = arith.constant 0 : i32
    %c0_i32_0 = arith.constant 0 : i32
    %c0_i32_1 = arith.constant 0 : i32
    %c0_i32_2 = arith.constant 0 : i32
    return %c0_i32, %c0_i32_0, %c0_i32_1 : i32, i32, i32
  }
  func.func @transform_24(%arg0: i32) -> (i32, i32, i32) {
    %c0_i32 = arith.constant 0 : i32
    %c0_i32_0 = arith.constant 0 : i32
    %c0_i32_1 = arith.constant 0 : i32
    %c0_i32_2 = arith.constant 0 : i32
    return %c0_i32, %c0_i32_0, %c0_i32_1 : i32, i32, i32
  }
  func.func @transform_25(%arg0: i32) -> (i32, i32, i32) {
    %c0_i32 = arith.constant 0 : i32
    %c0_i32_0 = arith.constant 0 : i32
    %c0_i32_1 = arith.constant 0 : i32
    %c0_i32_2 = arith.constant 0 : i32
    return %c0_i32, %c0_i32_0, %c0_i32_1 : i32, i32, i32
  }
  func.func @transform_26(%arg0: i32) -> (i32, i32, i32) {
    %c0_i32 = arith.constant 0 : i32
    %c0_i32_0 = arith.constant 0 : i32
    %c0_i32_1 = arith.constant 0 : i32
    %c0_i32_2 = arith.constant 0 : i32
    return %c0_i32, %c0_i32_0, %c0_i32_1 : i32, i32, i32
  }
  func.func @transform_27(%arg0: i32) -> (i32, i32, i32) {
    %c0_i32 = arith.constant 0 : i32
    %c0_i32_0 = arith.constant 0 : i32
    %c0_i32_1 = arith.constant 0 : i32
    %c0_i32_2 = arith.constant 0 : i32
    return %c0_i32, %c0_i32_0, %c0_i32_1 : i32, i32, i32
  }
  func.func @transform_28(%arg0: i32) -> (i32, i32, i32) {
    %c0_i32 = arith.constant 0 : i32
    %c0_i32_0 = arith.constant 0 : i32
    %c0_i32_1 = arith.constant 0 : i32
    %c0_i32_2 = arith.constant 0 : i32
    return %c0_i32, %c0_i32_0, %c0_i32_1 : i32, i32, i32
  }
  func.func @transform_29(%arg0: i32) -> (i32, i32) {
    %c0_i32 = arith.constant 0 : i32
    %c0_i32_0 = arith.constant 0 : i32
    %c0_i32_1 = arith.constant 0 : i32
    return %c0_i32, %c0_i32_0 : i32, i32
  }
  func.func @transform_30(%arg0: i32) -> (i32, i32) {
    %c0_i32 = arith.constant 0 : i32
    %c0_i32_0 = arith.constant 0 : i32
    %c0_i32_1 = arith.constant 0 : i32
    return %c0_i32, %c0_i32_0 : i32, i32
  }
  func.func @transform_31(%arg0: i32) -> (i32, i32) {
    %c0_i32 = arith.constant 0 : i32
    %c0_i32_0 = arith.constant 0 : i32
    %c0_i32_1 = arith.constant 0 : i32
    return %c0_i32, %c0_i32_0 : i32, i32
  }
  func.func @transform_32(%arg0: i32) -> (i32, i32) {
    %c0_i32 = arith.constant 0 : i32
    %c0_i32_0 = arith.constant 0 : i32
    %c0_i32_1 = arith.constant 0 : i32
    return %c0_i32, %c0_i32_0 : i32, i32
  }
}

</mosaic_0001>

<bundles_post_ra>
// kernel: seq2seq_forward.1
= control target key start
LH: loop header
LB: loop body
LE: loop exit
PB: predicated region body
PF: predicated region fallthrough
CT: control target
= control target key end

     0   :  { %v6817_v0 = vmov 0.0   ;;  %s6818_s3 = smov 3   ;;  %vm6819_vm0 = vmmov 0   ;;  %s6820_s7 = smov 1   ;;  %vm213_vm1 = vcmask 261120   ;;  %vm268_vm2 = vcmask 64512   ;;  %s8021_s0 = inlined_call_operand.smem [shape: u32[33], index: -1, kind: input, shape index: {}] }
   0x1   :  { %5909 = vmatprep.subr.bf16.mxu0 %v6817_v0  ;;  %s6866_s6 = sld [smem:[%s8021_s0 + %s6818_s3]]   ;;  %5913 = vmatprep.mubr.msk.bf16.mxu0 %vm6819_vm0, %v6817_v0  ;;  %s6821_s11 = smov 4   ;;  %v139_v25 = vlaneseq  ;;  %v6826_v28 = vmov -1e+30   ;;  %vm479_vm7 = vcmask 130048   ;;  %vm788_vm8 = vcmask 195584  }
   0x2   :  { %s5498_s10 = sld [smem:[%s8021_s0 + %s6820_s7]]   ;;  %5917 = vmatprep.subr.bf16.mxu1 %v6817_v0  ;;  %5919 = vmatprep.mubr.msk.bf16.mxu1 %vm6819_vm0, %v6817_v0  ;;  %s6822_s15 = smov 104   ;;  %vm1011_vm9 = vcmask 523264  }
   0x3   :  { %s6892_s14 = sld [smem:[%s8021_s0 + %s6821_s11]]   ;;  %s6823_s16 = smov 120   ;;  %v6945_v26 = vand.u32 127, %v139_v25 }
   0x4   :  { %s6824_s17 = smov 96   ;;  %s6825_s18 = smov 112  }
   0x5   :  { %s1_s21 = sld [smem:[%s8021_s0]]   ;;  %vm165_vm3 = vcmp.ge.s32.totalorder %v6945_v26, 8  ;;  %vm166_vm4 = vcmp.lt.s32.totalorder %v6945_v26, 16  ;;  %vm153_vm5 = vcmp.lt.s32.totalorder %v6945_v26, 8  ;;  %s6827_s22 = smov 64  }
   0x6   :  { %vm6950_vm6 = vmand %vm165_vm3, %vm166_vm4  ;;  %v6957_v29 = vsel %vm153_vm5, 0.0, %v6826_v28  ;;  %s6828_s23 = smov 16   ;;  %s6829_s27 = smov 24  }
   0x7   :  { %v6527_v1 = vld [vmem:[%s6866_s6] sm:$0xff]   ;;  %v6528_v2 = vld [vmem:[%s6866_s6 + $0x8] sm:$0xff]   ;;  %v6962_v31 = vsel %vm6950_vm6, 0.0, %v6826_v28  ;;  %s7022_s26 = sld [smem:[%s8021_s0 + %s6828_s23]]   ;;  %s6830_s1 = smov 5  }
   0x8   :  { %5910 = vmatpush3.bf16.msra.mxu0 %v6527_v1  ;;  %v6878_v3 = vld [vmem:[%s5498_s10] sm:$0xff]  ;;  %v6880_v4 = vld [vmem:[%s5498_s10 + $0x8] sm:$0xff]  ;;  %s7028_s30 = sld [smem:[%s8021_s0 + %s6829_s27]]   ;;  %s6831_s5 = smov 8  }
   0x9   :  { %5911 = vmatprep.subr.bf16.mxu0 %v6817_v0  ;;  %v193_v5 = vpack.c.bf16 %v6880_v4, %v6878_v3  ;;  %v5531_v6 = vld [vmem:[%s6892_s14] ss:$0 sm:$0xff]  ;;  %s7033_s4 = sld [smem:[%s8021_s0 + %s6830_s1]]   ;;  %s6832_s7 = smov 6  }
   0xa   :  { %s7054_s10 = sld [smem:[%s8021_s0 + %s6832_s7]]   ;;  %s6833_s11 = smov 7  }
   0xb   :  { %v5530_v30 = vld [vmem:[%s1_s21] ss:$0 sm:$0xff]  ;;  %s7066_s19 = sld [smem:[%s8021_s0 + %s6833_s11]]   ;;  %s6834_s20 = smov 9  }
   0xc   :  { %5912 = vmatpush3.bf16.msra.mxu0 %v6528_v2  ;;  %v6965_v32 = vadd.f32 %v5530_v30, %v6957_v29  ;;  %v6968_v36 = vadd.f32 %v5530_v30, %v6962_v31  ;;  %s7075_s25 = sld [smem:[%s8021_s0 + %s6834_s20]]   ;;  %s6835_s28 = smov 11  }
   0xd   :  { %5923 = vmatprep.subr.bf16.mxu0 %v6817_v0  ;;  %s7084_s2 = sld [smem:[%s8021_s0 + %s6835_s28]]   ;;  %s6836_s9 = smov 10  }
   0xe   :  { %s7109_s8 = sld [smem:[%s8021_s0 + %s6831_s5]]   ;;  %s6837_s20 = smov 12  }
   0xf   :  { %5914 = vmatmul.mubr.msk.bf16.vlgmr.msra.gmra.mrb[0].mxu0 %vm213_vm1, %v193_v5  ;;  %s7118_s13 = sld [smem:[%s8021_s0 + %s6836_s9]]   ;;  %s6844_s29 = smov 13  }
  0x10   :  { %5925 = vmatprep.mubr.msk.bf16.mxu0 %vm6819_vm0, %v6817_v0  ;;  %s7132_s28 = sld [smem:[%s8021_s0 + %s6837_s20]]   ;;  %s6842_s20 = smov 18  }
  0x11   :  { %s6845_s7 = smov 26   ;;  %s6846_s12 = smov 20  }
  0x12   :  { %s7620_s24 = sld [smem:[%s8021_s0 + %s6846_s12]]   ;;  %s6848_s1 = smov 22  }
  0x13   :  { %s6849_s9 = smov 27   ;;  %s6850_s21 = smov 23  }
  0xe2   :  { %v251_v7 = vpop.f32.mrb[0].mxu0 }
  0xe3   :  { %v5915_v8 = vpop.f32.mrb[1].mxu0  ;;  %v252_v10 = vadd.f32 %v5531_v6, %v251_v7 }
  0xe4   :  { %v254_v9 = vpop.f32.mrb[2].mxu0 }
  0xe5   :  { %v255_v11 = vadd.f32 %v5531_v6, %v254_v9  ;;  %v5916_v12 = vpop.f32.mrb[3].mxu0 }
  0xe7   :  { %v6895_v13 = vpack.c.bf16 %v255_v11, %v252_v10 }
  0xe9   :  { %264 = vrot.lane.b32.xlu1 %v6895_v13, %s6822_s15  ;;  %260 = vrot.lane.b32.xlu0 %v6895_v13, %s6823_s16 }
  0xed   :  { %266 = vrot.lane.b32.xlu1 %v6895_v13, %s6824_s17  ;;  %262 = vrot.lane.b32.xlu0 %v6895_v13, %s6825_s18 }
 0x15b   :  { %v6905_v14 = vpop.permute.xlu1 %264  ;;  %v6907_v15 = vpop.permute.xlu0 %260 }
 0x15c   :  { %316 = vrot.lane.b32.xlu0 %v6907_v15, %s6824_s17 }
 0x15f   :  { %v267_v16 = vpop.permute.xlu1 %266  ;;  %v6911_v17 = vpop.permute.xlu0 %262 }
 0x160   :  { %414 = vrot.lane.b32.xlu0 %v6905_v14, %s6824_s17  ;;  %365 = vrot.lane.b32.xlu1 %v6911_v17, %s6824_s17  ;;  %v273_v18 = vsel %vm268_vm2, %v267_v16, 0 }
 0x161   :  { %5918 = vmatpush3.bf16.xpose.msra.mxu1 %v273_v18 }
 0x162   :  { %5929 = vmatprep.subr.bf16.mxu1 %v6817_v0 }
 0x168   :  { %5920 = vmatmul.mubr.msk.bf16.vlgmr.msra.gmra.mrb[0].mxu1 %vm268_vm2, %v6895_v13 }
 0x169   :  { %5931 = vmatprep.mubr.msk.bf16.mxu1 %vm6819_vm0, %v6817_v0 }
 0x1ce   :  { %v317_v19 = vpop.permute.xlu0 %316 }
 0x1cf   :  { %v322_v20 = vsel %vm268_vm2, %v317_v19, 0 }
 0x1d0   :  { %5924 = vmatpush3.bf16.xpose.msra.mxu0 %v322_v20 }
 0x1d1   :  { %5935 = vmatprep.subr.bf16.mxu0 %v6817_v0 }
 0x1d2   :  { %v366_v21 = vpop.permute.xlu1 %365  ;;  %v415_v23 = vpop.permute.xlu0 %414 }
 0x1d3   :  { %v371_v22 = vsel %vm268_vm2, %v366_v21, 0  ;;  %v420_v24 = vsel %vm268_vm2, %v415_v23, 0 }
 0x1d4   :  { %5930 = vmatpush3.bf16.xpose.msra.mxu1 %v371_v22 }
 0x1d5   :  { %5941 = vmatprep.subr.bf16.mxu1 %v6817_v0 }
 0x1d7   :  { %5926 = vmatmul.mubr.msk.bf16.vlgmr.msra.gmra.mrb[4].mxu0 %vm268_vm2, %v6907_v15 }
 0x1d8   :  { %5936 = vmatpush3.bf16.xpose.msra.mxu0 %v420_v24  ;;  %5937 = vmatprep.mubr.msk.bf16.mxu0 %vm6819_vm0, %v6817_v0 }
 0x1d9   :  { %5947 = vmatprep.subr.bf16.mxu0 %v6817_v0 }
 0x1db   :  { %5932 = vmatmul.mubr.msk.bf16.vlgmr.msra.gmra.mrb[4].mxu1 %vm268_vm2, %v6911_v17 }
 0x1dc   :  { %5943 = vmatprep.mubr.msk.bf16.mxu1 %vm6819_vm0, %v6817_v0 }
 0x1df   :  { %5938 = vmatmul.mubr.msk.bf16.vlgmr.msra.gmra.mrb[8].mxu0 %vm268_vm2, %v6905_v14 }
 0x1e0   :  { %5949 = vmatprep.mubr.msk.bf16.mxu0 %vm6819_vm0, %v6817_v0 }
 0x23b   :  { %v309_v33 = vpop.f32.mrb[0].mxu1 }
 0x23c   :  { %v463_v34 = vmul.f32 0.35355338, %v309_v33  ;;  %v5921_v35 = vpop.f32.mrb[1].mxu1 }
 0x23d   :  { %v312_v37 = vpop.f32.mrb[2].mxu1 }
 0x23e   :  { %v464_v38 = vmul.f32 0.35355338, %v312_v37  ;;  %v5922_v39 = vpop.f32.mrb[3].mxu1  ;;  %v471_v40 = vadd.f32 %v463_v34, %v6965_v32 }
 0x240   :  { %v480_v41 = vsel %vm479_vm7, %v471_v40, -inf  ;;  %v472_v42 = vadd.f32 %v464_v38, %v6968_v36 }
 0x241   :  { %481 = vmax.xlane.f32.xlu1 %v480_v41 }
 0x242   :  { %v483_v43 = vsel %vm479_vm7, %v472_v42, -inf }
 0x243   :  { %484 = vmax.xlane.f32.xlu0 %v483_v43 }
 0x2aa   :  { %v358_v44 = vpop.f32.mrb[4].mxu0 }
 0x2ab   :  { %v465_v45 = vmul.f32 0.35355338, %v358_v44  ;;  %v5927_v46 = vpop.f32.mrb[5].mxu0 }
 0x2ac   :  { %v361_v47 = vpop.f32.mrb[6].mxu0 }
 0x2ad   :  { %v466_v48 = vmul.f32 0.35355338, %v361_v47  ;;  %v5928_v49 = vpop.f32.mrb[7].mxu0  ;;  %v473_v50 = vadd.f32 %v465_v45, %v6965_v32 }
 0x2ae   :  { %v407_v51 = vpop.f32.mrb[4].mxu1 }
 0x2af   :  { %v467_v52 = vmul.f32 0.35355338, %v407_v51  ;;  %v5933_v53 = vpop.f32.mrb[5].mxu1  ;;  %v486_v54 = vsel %vm479_vm7, %v473_v50, -inf  ;;  %v474_v55 = vadd.f32 %v466_v48, %v6968_v36 }
 0x2b0   :  { %v410_v56 = vpop.f32.mrb[6].mxu1  ;;  %487 = vmax.xlane.f32.xlu0 %v486_v54 }
 0x2b1   :  { %v468_v57 = vmul.f32 0.35355338, %v410_v56  ;;  %v5934_v58 = vpop.f32.mrb[7].mxu1  ;;  %v489_v59 = vsel %vm479_vm7, %v474_v55, -inf  ;;  %v475_v60 = vadd.f32 %v467_v52, %v6965_v32 }
 0x2b2   :  { %v456_v61 = vpop.f32.mrb[8].mxu0  ;;  %490 = vmax.xlane.f32.xlu1 %v489_v59 }
 0x2b3   :  { %v469_v62 = vmul.f32 0.35355338, %v456_v61  ;;  %v5939_v63 = vpop.f32.mrb[9].mxu0  ;;  %v492_v1 = vsel %vm479_vm7, %v475_v60, -inf  ;;  %v476_v2 = vadd.f32 %v468_v57, %v6968_v36 }
 0x2b4   :  { %v459_v5 = vpop.f32.mrb[10].mxu0  ;;  %493 = vmax.xlane.f32.xlu0 %v492_v1 }
 0x2b5   :  { %v470_v6 = vmul.f32 0.35355338, %v459_v5  ;;  %v5940_v7 = vpop.f32.mrb[11].mxu0  ;;  %v495_v8 = vsel %vm479_vm7, %v476_v2, -inf  ;;  %v477_v9 = vadd.f32 %v469_v62, %v6965_v32 }
 0x2b6   :  { %496 = vmax.xlane.f32.xlu1 %v495_v8 }
 0x2b7   :  { %v498_v10 = vsel %vm479_vm7, %v477_v9, -inf  ;;  %v478_v11 = vadd.f32 %v470_v6, %v6968_v36 }
 0x2b8   :  { %499 = vmax.xlane.f32.xlu0 %v498_v10 }
 0x2b9   :  { %v501_v12 = vsel %vm479_vm7, %v478_v11, -inf }
 0x2ba   :  { %502 = vmax.xlane.f32.xlu1 %v501_v12 }
 0x2cb   :  { %619 = vrot.lane.b32.xlu1 %v6907_v15, %s6827_s22 }
 0x2ce   :  { %572 = vrot.lane.b32.xlu0 %v6895_v13, %s6827_s22  ;;  %v482_v16 = vpop.xlane.xlu1 %481 }
 0x2cf   :  { %v504_v19 = vsub.f32 %v471_v40, %v482_v16 }
 0x2d0   :  { %v485_v18 = vpop.xlane.xlu0 %484 }
 0x2d1   :  { %v505_v20 = vsub.f32 %v472_v42, %v485_v18  ;;  %v512_v21 = vmul.f32 1.442695, %v504_v19 }
 0x2d3   :  { %v514_v22 = vmul.f32 1.442695, %v505_v20  ;;  %6577 = vpow2.f32 %v512_v21 }
 0x2d5   :  { %6579 = vpow2.f32 %v514_v22 }
 0x2dd   :  { %v6578_v23 = vpop.eup %6577 }
 0x2de   :  { %v528_v30 = vsel %vm479_vm7, %v6578_v23, 0.0 }
 0x2df   :  { %v6580_v24 = vpop.eup %6579 }
 0x2e0   :  { %v531_v33 = vsel %vm479_vm7, %v6580_v24, 0.0 }
 0x2ed   :  { %529 = vadd.xlane.f32.xlu0 %v528_v30 }
 0x2ef   :  { %532 = vadd.xlane.f32.xlu1 %v531_v33 }
 0x33d   :  { %v488_v15 = vpop.xlane.xlu0 %487 }
 0x33e   :  { %v506_v34 = vsub.f32 %v473_v50, %v488_v15 }
 0x33f   :  { %v491_v35 = vpop.xlane.xlu1 %490 }
 0x340   :  { %v516_v13 = vmul.f32 1.442695, %v506_v34  ;;  %v507_v37 = vsub.f32 %v474_v55, %v491_v35 }
 0x341   :  { %v494_v38 = vpop.xlane.xlu0 %493 }
 0x342   :  { %6581 = vpow2.f32 %v516_v13  ;;  %v518_v39 = vmul.f32 1.442695, %v507_v37  ;;  %v508_v40 = vsub.f32 %v475_v60, %v494_v38 }
 0x343   :  { %v497_v41 = vpop.xlane.xlu1 %496 }
 0x344   :  { %6583 = vpow2.f32 %v518_v39  ;;  %v520_v42 = vmul.f32 1.442695, %v508_v40  ;;  %v509_v43 = vsub.f32 %v476_v2, %v497_v41 }
 0x345   :  { %v500_v44 = vpop.xlane.xlu0 %499 }
 0x346   :  { %6585 = vpow2.f32 %v520_v42  ;;  %v522_v45 = vmul.f32 1.442695, %v509_v43  ;;  %v510_v46 = vsub.f32 %v477_v9, %v500_v44 }
 0x347   :  { %v503_v47 = vpop.xlane.xlu1 %502 }
 0x348   :  { %6587 = vpow2.f32 %v522_v45  ;;  %v524_v48 = vmul.f32 1.442695, %v510_v46  ;;  %v511_v49 = vsub.f32 %v478_v11, %v503_v47  ;;  %v6529_v46 = vld [vmem:[%s7033_s4] sm:$0xff]  }
 0x349   :  { %v573_v50 = vpop.permute.xlu0 %572 }
 0x34a   :  { %6589 = vpow2.f32 %v524_v48  ;;  %v526_v51 = vmul.f32 1.442695, %v511_v49  ;;  %5942 = vmatpush3.bf16.msra.mxu1 %v573_v50  ;;  %v6530_v49 = vld [vmem:[%s7033_s4 + $0x8] sm:$0xff]  }
 0x34b   :  { %v620_v52 = vpop.permute.xlu1 %619  ;;  %5953 = vmatprep.subr.bf16.mxu1 %v6817_v0 }
 0x34c   :  { %v6582_v53 = vpop.eup %6581  ;;  %6591 = vpow2.f32 %v526_v51  ;;  %5948 = vmatpush3.bf16.msra.mxu0 %v620_v52 }
 0x34d   :  { %v534_v54 = vsel %vm479_vm7, %v6582_v53, 0.0  ;;  %5959 = vmatprep.subr.bf16.mxu0 %v6817_v0 }
 0x34e   :  { %v6584_v55 = vpop.eup %6583  ;;  %535 = vadd.xlane.f32.xlu0 %v534_v54 }
 0x34f   :  { %v537_v56 = vsel %vm479_vm7, %v6584_v55, 0.0 }
 0x350   :  { %v6586_v57 = vpop.eup %6585  ;;  %538 = vadd.xlane.f32.xlu1 %v537_v56 }
 0x351   :  { %v540_v58 = vsel %vm479_vm7, %v6586_v57, 0.0 }
 0x352   :  { %v6588_v59 = vpop.eup %6587  ;;  %541 = vadd.xlane.f32.xlu0 %v540_v58 }
 0x353   :  { %v543_v60 = vsel %vm479_vm7, %v6588_v59, 0.0 }
 0x354   :  { %v6590_v61 = vpop.eup %6589  ;;  %544 = vadd.xlane.f32.xlu1 %v543_v60 }
 0x355   :  { %v546_v62 = vsel %vm479_vm7, %v6590_v61, 0.0 }
 0x356   :  { %v6592_v63 = vpop.eup %6591  ;;  %547 = vadd.xlane.f32.xlu0 %v546_v62 }
 0x357   :  { %v549_v1 = vsel %vm479_vm7, %v6592_v63, 0.0 }
 0x358   :  { %550 = vadd.xlane.f32.xlu1 %v549_v1 }
 0x369   :  { %666 = vrot.lane.b32.xlu1 %v6911_v17, %s6827_s22 }
 0x36c   :  { %713 = vrot.lane.b32.xlu0 %v6905_v14, %s6827_s22 }
 0x37a   :  { %v530_v2 = vpop.xlane.xlu0 %529 }
 0x37b   :  { %6593 = vrcp.f32 %v530_v2 }
 0x37c   :  { %v533_v5 = vpop.xlane.xlu1 %532 }
 0x37d   :  { %6595 = vrcp.f32 %v533_v5 }
 0x385   :  { %v6594_v6 = vpop.eup %6593 }
 0x386   :  { %v560_v8 = vmul.f32 %v6594_v6, %v6578_v23 }
 0x387   :  { %v6596_v7 = vpop.eup %6595 }
 0x388   :  { %v561_v9 = vmul.f32 %v6596_v7, %v6580_v24 }
 0x38a   :  { %v568_v10 = vpack.c.bf16 %v561_v9, %v560_v8 }
 0x38c   :  { %5944 = vmatmul.mubr.msk.bf16.vlgmr.msra.gmra.mrb[8].mxu1 %vm479_vm7, %v568_v10 }
 0x38d   :  { %5955 = vmatprep.mubr.msk.bf16.mxu1 %vm6819_vm0, %v6817_v0 }
 0x3db   :  { %v536_v11 = vpop.xlane.xlu0 %535 }
 0x3dc   :  { %6597 = vrcp.f32 %v536_v11 }
 0x3dd   :  { %v539_v17 = vpop.xlane.xlu1 %538 }
 0x3de   :  { %6599 = vrcp.f32 %v539_v17 }
 0x3df   :  { %v542_v12 = vpop.xlane.xlu0 %541 }
 0x3e0   :  { %6601 = vrcp.f32 %v542_v12 }
 0x3e1   :  { %v545_v14 = vpop.xlane.xlu1 %544 }
 0x3e2   :  { %6603 = vrcp.f32 %v545_v14 }
 0x3e3   :  { %v548_v16 = vpop.xlane.xlu0 %547 }
 0x3e4   :  { %6605 = vrcp.f32 %v548_v16 }
 0x3e5   :  { %v551_v18 = vpop.xlane.xlu1 %550 }
 0x3e6   :  { %v6598_v19 = vpop.eup %6597  ;;  %6607 = vrcp.f32 %v551_v18 }
 0x3e7   :  { %v562_v21 = vmul.f32 %v6598_v19, %v6582_v53  ;;  %v714_v35 = vpop.permute.xlu0 %713 }
 0x3e8   :  { %v6600_v20 = vpop.eup %6599 }
 0x3e9   :  { %v563_v22 = vmul.f32 %v6600_v20, %v6584_v55  ;;  %v667_v23 = vpop.permute.xlu1 %666  ;;  %v5543_v20 = vld [vmem:[%s7054_s10] ss:$0 sm:$0xff] }
 0x3ea   :  { %v6602_v24 = vpop.eup %6601  ;;  %5954 = vmatpush3.bf16.msra.mxu1 %v667_v23 }
 0x3eb   :  { %v569_v30 = vpack.c.bf16 %v563_v22, %v562_v21  ;;  %5965 = vmatprep.subr.bf16.mxu1 %v6817_v0  ;;  %v564_v15 = vmul.f32 %v6602_v24, %v6586_v57 }
 0x3ec   :  { %v6604_v33 = vpop.eup %6603 }
 0x3ed   :  { %v565_v34 = vmul.f32 %v6604_v33, %v6588_v59  ;;  %5950 = vmatmul.mubr.msk.bf16.vlgmr.msra.gmra.mrb[12].mxu0 %vm479_vm7, %v569_v30 }
 0x3ee   :  { %v6606_v13 = vpop.eup %6605  ;;  %5960 = vmatpush3.bf16.msra.mxu0 %v714_v35  ;;  %5961 = vmatprep.mubr.msk.bf16.mxu0 %vm6819_vm0, %v6817_v0 }
 0x3ef   :  { %v570_v37 = vpack.c.bf16 %v565_v34, %v564_v15  ;;  %5973 = vmatprep.subr.bf16.mxu0 %v6817_v0  ;;  %v566_v39 = vmul.f32 %v6606_v13, %v6590_v61 }
 0x3f0   :  { %v6608_v38 = vpop.eup %6607 }
 0x3f1   :  { %v567_v40 = vmul.f32 %v6608_v38, %v6592_v63  ;;  %5956 = vmatmul.mubr.msk.bf16.vlgmr.msra.gmra.mrb[12].mxu1 %vm479_vm7, %v570_v37 }
 0x3f2   :  { %5969 = vmatprep.mubr.msk.bf16.mxu1 %vm6819_vm0, %v6817_v0  ;;  %5966 = vmatpush3.bf16.msra.mxu1 %v6529_v46  ;;  %v6532_v46 = vld [vmem:[%s7066_s19 + $0x8] sm:$0xff]  }
 0x3f3   :  { %v571_v41 = vpack.c.bf16 %v567_v40, %v566_v39  ;;  %5967 = vmatprep.subr.bf16.mxu1 %v6817_v0 }
 0x3f5   :  { %5962 = vmatmul.mubr.msk.bf16.vlgmr.msra.gmra.mrb[16].mxu0 %vm479_vm7, %v571_v41 }
 0x3f6   :  { %5977 = vmatprep.mubr.msk.bf16.mxu0 %vm6819_vm0, %v6817_v0  ;;  %5968 = vmatpush3.bf16.msra.mxu1 %v6530_v49 }
 0x3f7   :  { %5981 = vmatprep.subr.bf16.mxu1 %v6817_v0 }
 0x45f   :  { %v612_v42 = vpop.f32.mrb[8].mxu1 }
 0x460   :  { %v5945_v43 = vpop.f32.mrb[9].mxu1 }
 0x461   :  { %v615_v44 = vpop.f32.mrb[10].mxu1 }
 0x462   :  { %v5946_v45 = vpop.f32.mrb[11].mxu1 }
 0x4c0   :  { %v659_v47 = vpop.f32.mrb[12].mxu0 }
 0x4c1   :  { %v5951_v48 = vpop.f32.mrb[13].mxu0 }
 0x4c2   :  { %v662_v50 = vpop.f32.mrb[14].mxu0  ;;  %v6534_v48 = vld [vmem:[%s7075_s25 + $0x8] sm:$0xff]  }
 0x4c3   :  { %v6437_v51 = vpack.i.bf16 %v662_v50, %v659_v47  ;;  %v5952_v52 = vpop.f32.mrb[15].mxu0  ;;  %v6533_v47 = vld [vmem:[%s7075_s25] sm:$0xff]  }
 0x4c4   :  { %v706_v53 = vpop.f32.mrb[12].mxu1 }
 0x4c5   :  { %6438 = vrot.lane.b32.xlu1 %v6437_v51, %s6831_s5  ;;  %v5957_v54 = vpop.f32.mrb[13].mxu1 }
 0x4c6   :  { %v709_v55 = vpop.f32.mrb[14].mxu1 }
 0x4c7   :  { %v6442_v56 = vpack.i.bf16 %v709_v55, %v706_v53  ;;  %v5958_v57 = vpop.f32.mrb[15].mxu1  ;;  %v7087_v55 = vshrl.u32 %v139_v25, 7 }
 0x4c8   :  { %v753_v58 = vpop.f32.mrb[16].mxu0  ;;  %v861_v57 = vld [vmem:[%s7084_s2] sm:$0x3] }
 0x4c9   :  { %v5963_v59 = vpop.f32.mrb[17].mxu0  ;;  %6443 = vrot.lane.b32.xlu0 %v6442_v56, %s6828_s23  ;;  %v7090_v56 = vsub.s32 0, %v7087_v55  ;;  %vm183_vm10 = vcmp.le.s32.totalorder %v6945_v26, %v7087_v55 }
 0x4ca   :  { %v756_v60 = vpop.f32.mrb[18].mxu0  ;;  %v7094_v59 = vsub.s32 1, %v7087_v55  ;;  %vm185_vm12 = vmand %vm153_vm5, %vm183_vm10 }
 0x4cb   :  { %v6447_v61 = vpack.i.bf16 %v756_v60, %v753_v58  ;;  %v5964_v62 = vpop.f32.mrb[19].mxu0  ;;  %v892_v60 = vrot.slane %v861_v57, %v7090_v56 }
 0x4cc   :  { %v898_v25 = vrot.slane %v861_v57, %v7094_v59  ;;  %v1058_v57 = vld [vmem:[%s7132_s28] sm:$0x3] }
 0x4cd   :  { %6448 = vrot.lane.b32.xlu1 %v6447_v61, %s6829_s27 }
 0x537   :  { %v6439_v63 = vpop.permute.xlu1 %6438 }
 0x538   :  { %v6441_v2 = vunpack.i.h.bf16 %v6439_v63  ;;  %v6440_v5 = vunpack.i.l.bf16 %v6439_v63 }
 0x53a   :  { %v785_v9 = vsel %vm268_vm2, %v615_v44, %v6441_v2  ;;  %v784_v10 = vsel %vm268_vm2, %v612_v42, %v6440_v5 }
 0x53b   :  { %v6444_v1 = vpop.permute.xlu0 %6443 }
 0x53c   :  { %v6446_v6 = vunpack.i.h.bf16 %v6444_v1  ;;  %v6445_v7 = vunpack.i.l.bf16 %v6444_v1 }
 0x53e   :  { %v786_v12 = vsel %vm479_vm7, %v784_v10, %v6445_v7  ;;  %v787_v14 = vsel %vm479_vm7, %v785_v9, %v6446_v6  ;;  %v6536_v9 = vld [vmem:[%s7075_s25 + $0x18] sm:$0xff]   ;;  %v5547_v10 = vld [vmem:[%s7109_s8] ss:$0 sm:$0xff] }
 0x53f   :  { %v6449_v8 = vpop.permute.xlu1 %6448 }
 0x540   :  { %v6451_v11 = vunpack.i.h.bf16 %v6449_v8  ;;  %v6450_v17 = vunpack.i.l.bf16 %v6449_v8  ;;  %v6535_v8 = vld [vmem:[%s7075_s25 + $0x10] sm:$0xff]  }
 0x542   :  { %v789_v16 = vsel %vm788_vm8, %v786_v12, %v6450_v17  ;;  %v790_v18 = vsel %vm788_vm8, %v787_v14, %v6451_v11 }
 0x543   :  { %v795_v19 = vpack.c.bf16 %v790_v18, %v789_v16 }
 0x545   :  { %5970 = vmatmul.mubr.msk.bf16.vlgmr.msra.gmra.mrb[16].mxu1 %vm213_vm1, %v795_v19 }
 0x546   :  { %5989 = vmatprep.mubr.msk.bf16.mxu1 %vm6819_vm0, %v6817_v0  ;;  %5982 = vmatpush3.bf16.msra.mxu1 %v6533_v47  ;;  %v6537_v47 = vld [vmem:[%s6866_s6 + $0x10] sm:$0xff]  }
 0x547   :  { %5983 = vmatprep.subr.bf16.mxu1 %v6817_v0 }
 0x54a   :  { %5984 = vmatpush3.bf16.msra.mxu1 %v6534_v48  ;;  %v6538_v48 = vld [vmem:[%s6866_s6 + $0x18] sm:$0xff]   ;;  %s6838_s6 = smov 14  }
 0x54b   :  { %5985 = vmatprep.subr.bf16.mxu1 %v6817_v0 }
 0x54e   :  { %5986 = vmatpush3.bf16.msra.mxu1 %v6535_v8  ;;  %v5562_v8 = vld [vmem:[%s6892_s14 + $0x1] ss:$0 sm:$0xff] }
 0x54f   :  { %5987 = vmatprep.subr.bf16.mxu1 %v6817_v0 }
 0x552   :  { %5988 = vmatpush3.bf16.msra.mxu1 %v6536_v9 }
 0x553   :  { %6007 = vmatprep.subr.bf16.mxu1 %v6817_v0 }
 0x618   :  { %v852_v21 = vpop.f32.mrb[16].mxu1 }
 0x619   :  { %v853_v22 = vadd.f32 %v5543_v20, %v852_v21  ;;  %v5971_v23 = vpop.f32.mrb[17].mxu1 }
 0x61a   :  { %v855_v24 = vpop.f32.mrb[18].mxu1 }
 0x61b   :  { %v856_v30 = vadd.f32 %v5543_v20, %v855_v24  ;;  %v5972_v33 = vpop.f32.mrb[19].mxu1  ;;  %v859_v15 = vadd.f32 %v853_v22, %v6878_v3  ;;  %v5551_v22 = vld [vmem:[%s7118_s13] ss:$0 sm:$0xff] }
 0x61d   :  { %v862_v34 = vsel %vm213_vm1, %v859_v15, 0.0  ;;  %v860_v35 = vadd.f32 %v856_v30, %v6880_v4  ;;  %v6531_v4 = vld [vmem:[%s7066_s19] sm:$0xff]  }
 0x61e   :  { %863 = vadd.xlane.f32.xlu0 %v862_v34  ;;  %5974 = vmatpush3.bf16.msra.mxu0 %v6531_v4 }
 0x61f   :  { %v865_v13 = vsel %vm213_vm1, %v860_v35, 0.0  ;;  %5975 = vmatprep.subr.bf16.mxu0 %v6817_v0 }
 0x620   :  { %866 = vadd.xlane.f32.xlu1 %v865_v13 }
 0x622   :  { %5976 = vmatpush3.bf16.msra.mxu0 %v6532_v46 }
 0x623   :  { %5993 = vmatprep.subr.bf16.mxu0 %v6817_v0 }
 0x6ab   :  { %v864_v37 = vpop.xlane.xlu0 %863 }
 0x6ac   :  { %v869_v38 = vmul.f32 0.03125, %v864_v37 }
 0x6ad   :  { %v867_v39 = vpop.xlane.xlu1 %866 }
 0x6ae   :  { %v871_v40 = vsub.f32 %v859_v15, %v869_v38  ;;  %v870_v41 = vmul.f32 0.03125, %v867_v39 }
 0x6b0   :  { %v872_v42 = vsub.f32 %v860_v35, %v870_v41  ;;  %v873_v43 = vmul.f32 %v871_v40, %v871_v40 }
 0x6b2   :  { %v875_v44 = vsel %vm213_vm1, %v873_v43, 0.0  ;;  %v874_v45 = vmul.f32 %v872_v42, %v872_v42 }
 0x6b3   :  { %876 = vadd.xlane.f32.xlu0 %v875_v44 }
 0x6b4   :  { %v878_v3 = vsel %vm213_vm1, %v874_v45, 0.0 }
 0x6b7   :  { %879 = vadd.xlane.f32.xlu0 %v878_v3 }
 0x740   :  { %v877_v49 = vpop.xlane.xlu0 %876 }
 0x741   :  { %v881_v50 = vmul.f32 0.03125, %v877_v49 }
 0x743   :  { %v883_v51 = vadd.f32 1e-05, %v881_v50 }
 0x744   :  { %v880_v52 = vpop.xlane.xlu0 %879 }
 0x745   :  { %6609 = vrsqrt.f32 %v883_v51  ;;  %v882_v53 = vmul.f32 0.03125, %v880_v52 }
 0x747   :  { %v884_v54 = vadd.f32 1e-05, %v882_v53 }
 0x749   :  { %6611 = vrsqrt.f32 %v884_v54 }
 0x74f   :  { %v6610_v58 = vpop.eup %6609 }
 0x750   :  { %v887_v61 = vmul.f32 %v6610_v58, %v871_v40  ;;  %v1088_v58 = vrot.slane %v1058_v57, %v7090_v56 }
 0x752   :  { %v893_v63 = vmul.f32 %v892_v60, %v887_v61 }
 0x753   :  { %v6612_v62 = vpop.eup %6611 }
 0x754   :  { %v888_v1 = vmul.f32 %v6612_v62, %v872_v42  ;;  %v899_v5 = vadd.f32 %v898_v25, %v893_v63 }
 0x756   :  { %v894_v2 = vmul.f32 %v892_v60, %v888_v1 }
 0x758   :  { %v900_v6 = vadd.f32 %v898_v25, %v894_v2  ;;  %v1094_v25 = vrot.slane %v1058_v57, %v7094_v59 }
 0x75a   :  { %v905_v7 = vpack.c.bf16 %v900_v6, %v899_v5 }
 0x75c   :  { %5978 = vmatmul.mubr.msk.bf16.vlgmr.msra.gmra.mrb[20].mxu0 %vm213_vm1, %v905_v7 }
 0x75d   :  { %5997 = vmatprep.mubr.msk.bf16.mxu0 %vm6819_vm0, %v6817_v0  ;;  %5994 = vmatpush3.bf16.msra.mxu0 %v6537_v47 }
 0x75e   :  { %5995 = vmatprep.subr.bf16.mxu0 %v6817_v0 }
 0x761   :  { %5996 = vmatpush3.bf16.msra.mxu0 %v6538_v48 }
 0x762   :  { %6001 = vmatprep.subr.bf16.mxu0 %v6817_v0 }
 0x82f   :  { %v962_v11 = vpop.f32.mrb[20].mxu0 }
 0x830   :  { %v963_v17 = vadd.f32 %v5547_v10, %v962_v11  ;;  %v5979_v12 = vpop.f32.mrb[21].mxu0 }
 0x831   :  { %v965_v14 = vpop.f32.mrb[22].mxu0 }
 0x832   :  { %v966_v16 = vadd.f32 %v5547_v10, %v965_v14  ;;  %v5980_v18 = vpop.f32.mrb[23].mxu0  ;;  %v969_v19 = vmax.f32 %v963_v17, 0.0 }
 0x834   :  { %v970_v20 = vmax.f32 %v966_v16, 0.0 }
 0x836   :  { %v971_v21 = vpack.c.bf16 %v970_v20, %v969_v19 }
 0x838   :  { %5990 = vmatmul.mubr.msk.bf16.vlgmr.msra.gmra.mrb[20].mxu1 %vm1011_vm9, %v971_v21 }
 0x839   :  { %6009 = vmatprep.mubr.msk.bf16.mxu1 %vm6819_vm0, %v6817_v0 }
 0x90b   :  { %v1049_v23 = vpop.f32.mrb[20].mxu1 }
 0x90c   :  { %v1050_v24 = vadd.f32 %v5551_v22, %v1049_v23  ;;  %v5991_v30 = vpop.f32.mrb[21].mxu1 }
 0x90d   :  { %v1052_v33 = vpop.f32.mrb[22].mxu1 }
 0x90e   :  { %v1053_v15 = vadd.f32 %v5551_v22, %v1052_v33  ;;  %v5992_v34 = vpop.f32.mrb[23].mxu1  ;;  %v1056_v35 = vadd.f32 %v1050_v24, %v899_v5 }
 0x910   :  { %v1059_v13 = vsel %vm213_vm1, %v1056_v35, 0.0  ;;  %v1057_v37 = vadd.f32 %v1053_v15, %v900_v6 }
 0x911   :  { %1060 = vadd.xlane.f32.xlu1 %v1059_v13 }
 0x912   :  { %v1062_v38 = vsel %vm213_vm1, %v1057_v37, 0.0 }
 0x913   :  { %1063 = vadd.xlane.f32.xlu0 %v1062_v38 }
 0x99e   :  { %v1061_v39 = vpop.xlane.xlu1 %1060 }
 0x99f   :  { %v1065_v40 = vmul.f32 0.03125, %v1061_v39 }
 0x9a0   :  { %v1064_v41 = vpop.xlane.xlu0 %1063 }
 0x9a1   :  { %v1067_v42 = vsub.f32 %v1056_v35, %v1065_v40  ;;  %v1066_v43 = vmul.f32 0.03125, %v1064_v41 }
 0x9a3   :  { %v1068_v44 = vsub.f32 %v1057_v37, %v1066_v43  ;;  %v1069_v45 = vmul.f32 %v1067_v42, %v1067_v42 }
 0x9a5   :  { %v1071_v3 = vsel %vm213_vm1, %v1069_v45, 0.0  ;;  %v1070_v4 = vmul.f32 %v1068_v44, %v1068_v44 }
 0x9a6   :  { %1072 = vadd.xlane.f32.xlu1 %v1071_v3 }
 0x9a7   :  { %v1074_v46 = vsel %vm213_vm1, %v1070_v4, 0.0 }
 0x9a8   :  { %1075 = vadd.xlane.f32.xlu0 %v1074_v46 }
 0xa33   :  { %v1073_v49 = vpop.xlane.xlu1 %1072 }
 0xa34   :  { %v1077_v50 = vmul.f32 0.03125, %v1073_v49 }
 0xa35   :  { %v1076_v51 = vpop.xlane.xlu0 %1075 }
 0xa36   :  { %v1079_v52 = vadd.f32 1e-05, %v1077_v50  ;;  %v1078_v53 = vmul.f32 0.03125, %v1076_v51 }
 0xa38   :  { %6613 = vrsqrt.f32 %v1079_v52  ;;  %v1080_v54 = vadd.f32 1e-05, %v1078_v53 }
 0xa3a   :  { %6615 = vrsqrt.f32 %v1080_v54 }
 0xa42   :  { %v6614_v60 = vpop.eup %6613 }
 0xa43   :  { %v1083_v61 = vmul.f32 %v6614_v60, %v1067_v42 }
 0xa44   :  { %v6616_v62 = vpop.eup %6615 }
 0xa45   :  { %v1089_v63 = vmul.f32 %v1088_v58, %v1083_v61  ;;  %v1084_v1 = vmul.f32 %v6616_v62, %v1068_v44 }
 0xa47   :  { %v1090_v2 = vmul.f32 %v1088_v58, %v1084_v1  ;;  %v7137_v5 = vadd.f32 %v1094_v25, %v1089_v63 }
 0xa49   :  { %v7139_v6 = vadd.f32 %v1094_v25, %v1090_v2 }
 0xa4b   :  { %v1102_v7 = vpack.c.bf16 %v7139_v6, %v7137_v5 }
 0xa4d   :  { %5998 = vmatmul.mubr.msk.bf16.vlgmr.msra.gmra.mrb[24].mxu0 %vm213_vm1, %v1102_v7 }
 0xa4e   :  { %6003 = vmatprep.mubr.msk.bf16.mxu0 %vm6819_vm0, %v6817_v0 }
 0xb20   :  { %v1160_v9 = vpop.f32.mrb[24].mxu0 }
 0xb21   :  { %v5999_v10 = vpop.f32.mrb[25].mxu0  ;;  %v1161_v17 = vadd.f32 %v5562_v8, %v1160_v9 }
 0xb22   :  { %v1163_v11 = vpop.f32.mrb[26].mxu0 }
 0xb23   :  { %v1164_v12 = vadd.f32 %v5562_v8, %v1163_v11  ;;  %v6000_v14 = vpop.f32.mrb[27].mxu0 }
 0xb25   :  { %v7147_v16 = vpack.c.bf16 %v1164_v12, %v1161_v17 }
 0xb27   :  { %1171 = vrot.lane.b32.xlu0 %v7147_v16, %s6825_s18  ;;  %1169 = vrot.lane.b32.xlu1 %v7147_v16, %s6823_s16 }
 0xb2b   :  { %1173 = vrot.lane.b32.xlu1 %v7147_v16, %s6822_s15 }
 0xb2f   :  { %1175 = vrot.lane.b32.xlu1 %v7147_v16, %s6824_s17 }
 0xb99   :  { %v7157_v18 = vpop.permute.xlu0 %1171  ;;  %v7159_v19 = vpop.permute.xlu1 %1169 }
 0xb9a   :  { %1273 = vrot.lane.b32.xlu1 %v7157_v18, %s6824_s17  ;;  %1224 = vrot.lane.b32.xlu0 %v7159_v19, %s6824_s17 }
 0xb9d   :  { %v7165_v20 = vpop.permute.xlu1 %1173 }
 0xb9e   :  { %1322 = vrot.lane.b32.xlu0 %v7165_v20, %s6824_s17 }
 0xba1   :  { %v1176_v21 = vpop.permute.xlu1 %1175 }
 0xba2   :  { %v1181_v22 = vsel %vm268_vm2, %v1176_v21, 0 }
 0xba3   :  { %6002 = vmatpush3.bf16.xpose.msra.mxu0 %v1181_v22 }
 0xba4   :  { %6013 = vmatprep.subr.bf16.mxu0 %v6817_v0 }
 0xbaa   :  { %6004 = vmatmul.mubr.msk.bf16.vlgmr.msra.gmra.mrb[28].mxu0 %vm268_vm2, %v7147_v16 }
 0xbab   :  { %6015 = vmatprep.mubr.msk.bf16.mxu0 %vm6819_vm0, %v6817_v0 }
 0xc0c   :  { %v1225_v23 = vpop.permute.xlu0 %1224  ;;  %v1274_v24 = vpop.permute.xlu1 %1273 }
 0xc0d   :  { %v1230_v30 = vsel %vm268_vm2, %v1225_v23, 0  ;;  %v1279_v33 = vsel %vm268_vm2, %v1274_v24, 0 }
 0xc0e   :  { %6008 = vmatpush3.bf16.xpose.msra.mxu1 %v1230_v30  ;;  %6014 = vmatpush3.bf16.xpose.msra.mxu0 %v1279_v33 }
 0xc0f   :  { %6019 = vmatprep.subr.bf16.mxu1 %v6817_v0  ;;  %6025 = vmatprep.subr.bf16.mxu0 %v6817_v0 }
 0xc10   :  { %v1323_v15 = vpop.permute.xlu0 %1322 }
 0xc11   :  { %v1328_v34 = vsel %vm268_vm2, %v1323_v15, 0 }
 0xc15   :  { %6010 = vmatmul.mubr.msk.bf16.vlgmr.msra.gmra.mrb[24].mxu1 %vm268_vm2, %v7159_v19  ;;  %6016 = vmatmul.mubr.msk.bf16.vlgmr.msra.gmra.mrb[32].mxu0 %vm268_vm2, %v7157_v18 }
 0xc16   :  { %6020 = vmatpush3.bf16.xpose.msra.mxu1 %v1328_v34  ;;  %6021 = vmatprep.mubr.msk.bf16.mxu1 %vm6819_vm0, %v6817_v0 }
 0xc17   :  { %6031 = vmatprep.subr.bf16.mxu1 %v6817_v0  ;;  %6027 = vmatprep.mubr.msk.bf16.mxu0 %vm6819_vm0, %v6817_v0 }
 0xc1d   :  { %6022 = vmatmul.mubr.msk.bf16.vlgmr.msra.gmra.mrb[28].mxu1 %vm268_vm2, %v7165_v20 }
 0xc1e   :  { %6033 = vmatprep.mubr.msk.bf16.mxu1 %vm6819_vm0, %v6817_v0 }
 0xc7d   :  { %v1217_v35 = vpop.f32.mrb[28].mxu0 }
 0xc7e   :  { %v1371_v13 = vmul.f32 0.35355338, %v1217_v35  ;;  %v6005_v37 = vpop.f32.mrb[29].mxu0 }
 0xc7f   :  { %v1220_v38 = vpop.f32.mrb[30].mxu0 }
 0xc80   :  { %v1372_v39 = vmul.f32 0.35355338, %v1220_v38  ;;  %v6006_v40 = vpop.f32.mrb[31].mxu0  ;;  %v1379_v41 = vadd.f32 %v1371_v13, %v6965_v32 }
 0xc82   :  { %v1387_v42 = vsel %vm479_vm7, %v1379_v41, -inf  ;;  %v1380_v43 = vadd.f32 %v1372_v39, %v6968_v36 }
 0xc83   :  { %1388 = vmax.xlane.f32.xlu1 %v1387_v42 }
 0xc84   :  { %v1390_v44 = vsel %vm479_vm7, %v1380_v43, -inf }
 0xc85   :  { %1391 = vmax.xlane.f32.xlu0 %v1390_v44 }
 0xce8   :  { %v1266_v45 = vpop.f32.mrb[24].mxu1  ;;  %v1315_v3 = vpop.f32.mrb[32].mxu0 }
 0xce9   :  { %v1373_v4 = vmul.f32 0.35355338, %v1266_v45  ;;  %v1375_v46 = vmul.f32 0.35355338, %v1315_v3  ;;  %v6011_v47 = vpop.f32.mrb[25].mxu1  ;;  %v6017_v48 = vpop.f32.mrb[33].mxu0 }
 0xcea   :  { %v1269_v49 = vpop.f32.mrb[26].mxu1  ;;  %v1318_v50 = vpop.f32.mrb[34].mxu0 }
 0xceb   :  { %v1374_v51 = vmul.f32 0.35355338, %v1269_v49  ;;  %v1376_v52 = vmul.f32 0.35355338, %v1318_v50  ;;  %v6012_v53 = vpop.f32.mrb[27].mxu1  ;;  %v6018_v54 = vpop.f32.mrb[35].mxu0  ;;  %v1381_v57 = vadd.f32 %v1373_v4, %v6965_v32  ;;  %v1383_v61 = vadd.f32 %v1375_v46, %v6965_v32 }
 0xced   :  { %v1393_v58 = vsel %vm479_vm7, %v1381_v57, -inf  ;;  %v1382_v60 = vadd.f32 %v1374_v51, %v6968_v36  ;;  %v1384_v63 = vadd.f32 %v1376_v52, %v6968_v36  ;;  %v1399_v7 = vsel %vm479_vm7, %v1383_v61, -inf }
 0xcee   :  { %1394 = vmax.xlane.f32.xlu0 %v1393_v58 }
 0xcef   :  { %v1396_v62 = vsel %vm479_vm7, %v1382_v60, -inf  ;;  %v1402_v11 = vsel %vm479_vm7, %v1384_v63, -inf }
 0xcf0   :  { %1397 = vmax.xlane.f32.xlu1 %v1396_v62  ;;  %v1364_v1 = vpop.f32.mrb[28].mxu1 }
 0xcf1   :  { %v1377_v25 = vmul.f32 0.35355338, %v1364_v1  ;;  %v6023_v2 = vpop.f32.mrb[29].mxu1 }
 0xcf2   :  { %1400 = vmax.xlane.f32.xlu0 %v1399_v7  ;;  %v1367_v8 = vpop.f32.mrb[30].mxu1 }
 0xcf3   :  { %v1378_v9 = vmul.f32 0.35355338, %v1367_v8  ;;  %v6024_v10 = vpop.f32.mrb[31].mxu1  ;;  %v1385_v17 = vadd.f32 %v1377_v25, %v6965_v32 }
 0xcf4   :  { %1403 = vmax.xlane.f32.xlu1 %v1402_v11 }
 0xcf5   :  { %v1405_v12 = vsel %vm479_vm7, %v1385_v17, -inf  ;;  %v1386_v14 = vadd.f32 %v1378_v9, %v6968_v36 }
 0xcf6   :  { %1406 = vmax.xlane.f32.xlu0 %v1405_v12 }
 0xcf7   :  { %v1408_v21 = vsel %vm479_vm7, %v1386_v14, -inf }
 0xcf8   :  { %1409 = vmax.xlane.f32.xlu1 %v1408_v21 }
 0xd09   :  { %1526 = vrot.lane.b32.xlu1 %v7159_v19, %s6827_s22 }
 0xd0c   :  { %1479 = vrot.lane.b32.xlu0 %v7147_v16, %s6827_s22 }
 0xd10   :  { %v1389_v22 = vpop.xlane.xlu1 %1388 }
 0xd11   :  { %v1411_v24 = vsub.f32 %v1379_v41, %v1389_v22 }
 0xd12   :  { %v1392_v23 = vpop.xlane.xlu0 %1391 }
 0xd13   :  { %v1412_v30 = vsub.f32 %v1380_v43, %v1392_v23  ;;  %v1419_v32 = vmul.f32 1.442695, %v1411_v24 }
 0xd15   :  { %v1421_v33 = vmul.f32 1.442695, %v1412_v30  ;;  %6617 = vpow2.f32 %v1419_v32 }
 0xd17   :  { %6619 = vpow2.f32 %v1421_v33 }
 0xd1f   :  { %v6618_v15 = vpop.eup %6617 }
 0xd20   :  { %v1435_v34 = vsel %vm479_vm7, %v6618_v15, 0.0 }
 0xd21   :  { %v6620_v36 = vpop.eup %6619 }
 0xd22   :  { %v1438_v35 = vsel %vm479_vm7, %v6620_v36, 0.0 }
 0xd2b   :  { %1436 = vadd.xlane.f32.xlu0 %v1435_v34 }
 0xd2d   :  { %1439 = vadd.xlane.f32.xlu1 %v1438_v35 }
 0xd7b   :  { %v1395_v19 = vpop.xlane.xlu0 %1394 }
 0xd7c   :  { %v1413_v13 = vsub.f32 %v1381_v57, %v1395_v19 }
 0xd7d   :  { %v1398_v37 = vpop.xlane.xlu1 %1397 }
 0xd7e   :  { %v1423_v16 = vmul.f32 1.442695, %v1413_v13  ;;  %v1414_v38 = vsub.f32 %v1382_v60, %v1398_v37 }
 0xd7f   :  { %v1401_v39 = vpop.xlane.xlu0 %1400 }
 0xd80   :  { %6621 = vpow2.f32 %v1423_v16  ;;  %v1425_v40 = vmul.f32 1.442695, %v1414_v38  ;;  %v1415_v41 = vsub.f32 %v1383_v61, %v1401_v39 }
 0xd81   :  { %v1404_v42 = vpop.xlane.xlu1 %1403 }
 0xd82   :  { %6623 = vpow2.f32 %v1425_v40  ;;  %v1427_v43 = vmul.f32 1.442695, %v1415_v41  ;;  %v1416_v44 = vsub.f32 %v1384_v63, %v1404_v42 }
 0xd83   :  { %v1407_v45 = vpop.xlane.xlu0 %1406 }
 0xd84   :  { %6625 = vpow2.f32 %v1427_v43  ;;  %v1429_v3 = vmul.f32 1.442695, %v1416_v44  ;;  %v1417_v4 = vsub.f32 %v1385_v17, %v1407_v45 }
 0xd85   :  { %v1410_v46 = vpop.xlane.xlu1 %1409 }
 0xd86   :  { %6627 = vpow2.f32 %v1429_v3  ;;  %v1431_v47 = vmul.f32 1.442695, %v1417_v4  ;;  %v1418_v48 = vsub.f32 %v1386_v14, %v1410_v46  ;;  %v6539_v4 = vld [vmem:[%s7033_s4 + $0x10] sm:$0xff]  }
 0xd87   :  { %v1480_v49 = vpop.permute.xlu0 %1479 }
 0xd88   :  { %6629 = vpow2.f32 %v1431_v47  ;;  %v1433_v50 = vmul.f32 1.442695, %v1418_v48  ;;  %6026 = vmatpush3.bf16.msra.mxu0 %v1480_v49  ;;  %v6540_v48 = vld [vmem:[%s7033_s4 + $0x18] sm:$0xff]   ;;  %s7681_s4 = sld [smem:[%s8021_s0 + %s6850_s21]]  }
 0xd89   :  { %v1527_v51 = vpop.permute.xlu1 %1526  ;;  %6037 = vmatprep.subr.bf16.mxu0 %v6817_v0 }
 0xd8a   :  { %v6622_v52 = vpop.eup %6621  ;;  %6631 = vpow2.f32 %v1433_v50  ;;  %6032 = vmatpush3.bf16.msra.mxu1 %v1527_v51 }
 0xd8b   :  { %v1441_v53 = vsel %vm479_vm7, %v6622_v52, 0.0  ;;  %6043 = vmatprep.subr.bf16.mxu1 %v6817_v0 }
 0xd8c   :  { %v6624_v54 = vpop.eup %6623  ;;  %1442 = vadd.xlane.f32.xlu0 %v1441_v53 }
 0xd8d   :  { %v1444_v57 = vsel %vm479_vm7, %v6624_v54, 0.0 }
 0xd8e   :  { %v6626_v58 = vpop.eup %6625  ;;  %1445 = vadd.xlane.f32.xlu1 %v1444_v57 }
 0xd8f   :  { %v1447_v60 = vsel %vm479_vm7, %v6626_v58, 0.0 }
 0xd90   :  { %v6628_v61 = vpop.eup %6627  ;;  %1448 = vadd.xlane.f32.xlu0 %v1447_v60 }
 0xd91   :  { %v1450_v62 = vsel %vm479_vm7, %v6628_v61, 0.0 }
 0xd92   :  { %v6630_v63 = vpop.eup %6629  ;;  %1451 = vadd.xlane.f32.xlu1 %v1450_v62 }
 0xd93   :  { %v1453_v1 = vsel %vm479_vm7, %v6630_v63, 0.0 }
 0xd94   :  { %v6632_v25 = vpop.eup %6631  ;;  %1454 = vadd.xlane.f32.xlu0 %v1453_v1 }
 0xd95   :  { %v1456_v2 = vsel %vm479_vm7, %v6632_v25, 0.0 }
 0xd96   :  { %1457 = vadd.xlane.f32.xlu1 %v1456_v2 }
 0xda7   :  { %1573 = vrot.lane.b32.xlu1 %v7157_v18, %s6827_s22 }
 0xdaa   :  { %1620 = vrot.lane.b32.xlu0 %v7165_v20, %s6827_s22 }
 0xdb8   :  { %v1437_v7 = vpop.xlane.xlu0 %1436 }
 0xdb9   :  { %6633 = vrcp.f32 %v1437_v7 }
 0xdba   :  { %v1440_v8 = vpop.xlane.xlu1 %1439 }
 0xdbb   :  { %6635 = vrcp.f32 %v1440_v8 }
 0xdc3   :  { %v6634_v9 = vpop.eup %6633 }
 0xdc4   :  { %v1467_v11 = vmul.f32 %v6634_v9, %v6618_v15 }
 0xdc5   :  { %v6636_v10 = vpop.eup %6635 }
 0xdc6   :  { %v1468_v17 = vmul.f32 %v6636_v10, %v6620_v36 }
 0xdc8   :  { %v1475_v12 = vpack.c.bf16 %v1468_v17, %v1467_v11 }
 0xdca   :  { %6028 = vmatmul.mubr.msk.bf16.vlgmr.msra.gmra.mrb[36].mxu0 %vm479_vm7, %v1475_v12 }
 0xdcb   :  { %6039 = vmatprep.mubr.msk.bf16.mxu0 %vm6819_vm0, %v6817_v0 }
 0xe19   :  { %v1443_v14 = vpop.xlane.xlu0 %1442 }
 0xe1a   :  { %6637 = vrcp.f32 %v1443_v14 }
 0xe1b   :  { %v1446_v18 = vpop.xlane.xlu1 %1445 }
 0xe1c   :  { %6639 = vrcp.f32 %v1446_v18 }
 0xe1d   :  { %v1449_v21 = vpop.xlane.xlu0 %1448 }
 0xe1e   :  { %6641 = vrcp.f32 %v1449_v21 }
 0xe1f   :  { %v1452_v20 = vpop.xlane.xlu1 %1451 }
 0xe20   :  { %6643 = vrcp.f32 %v1452_v20 }
 0xe21   :  { %v1455_v22 = vpop.xlane.xlu0 %1454 }
 0xe22   :  { %6645 = vrcp.f32 %v1455_v22 }
 0xe23   :  { %v1458_v23 = vpop.xlane.xlu1 %1457 }
 0xe24   :  { %v6638_v24 = vpop.eup %6637  ;;  %6647 = vrcp.f32 %v1458_v23 }
 0xe25   :  { %v1469_v32 = vmul.f32 %v6638_v24, %v6622_v52  ;;  %v1621_v37 = vpop.permute.xlu0 %1620 }
 0xe26   :  { %v6640_v30 = vpop.eup %6639 }
 0xe27   :  { %v1470_v33 = vmul.f32 %v6640_v30, %v6624_v54  ;;  %v1574_v15 = vpop.permute.xlu1 %1573  ;;  %v5579_v30 = vld [vmem:[%s7054_s10 + $0x1] ss:$0 sm:$0xff]  ;;  %s7269_s10 = sld [smem:[%s8021_s0 + %s6838_s6]]   ;;  %s6843_s6 = smov 19  }
 0xe28   :  { %v6642_v36 = vpop.eup %6641  ;;  %6038 = vmatpush3.bf16.msra.mxu0 %v1574_v15 }
 0xe29   :  { %v1476_v34 = vpack.c.bf16 %v1470_v33, %v1469_v32  ;;  %6049 = vmatprep.subr.bf16.mxu0 %v6817_v0  ;;  %v1471_v19 = vmul.f32 %v6642_v36, %v6626_v58 }
 0xe2a   :  { %v6644_v35 = vpop.eup %6643 }
 0xe2b   :  { %v1472_v13 = vmul.f32 %v6644_v35, %v6628_v61  ;;  %6034 = vmatmul.mubr.msk.bf16.vlgmr.msra.gmra.mrb[32].mxu1 %vm479_vm7, %v1476_v34 }
 0xe2c   :  { %v6646_v16 = vpop.eup %6645  ;;  %6044 = vmatpush3.bf16.msra.mxu1 %v1621_v37  ;;  %6045 = vmatprep.mubr.msk.bf16.mxu1 %vm6819_vm0, %v6817_v0 }
 0xe2d   :  { %v1477_v38 = vpack.c.bf16 %v1472_v13, %v1471_v19  ;;  %6057 = vmatprep.subr.bf16.mxu1 %v6817_v0  ;;  %v1473_v40 = vmul.f32 %v6646_v16, %v6630_v63 }
 0xe2e   :  { %v6648_v39 = vpop.eup %6647 }
 0xe2f   :  { %v1474_v41 = vmul.f32 %v6648_v39, %v6632_v25  ;;  %6040 = vmatmul.mubr.msk.bf16.vlgmr.msra.gmra.mrb[40].mxu0 %vm479_vm7, %v1477_v38 }
 0xe30   :  { %6053 = vmatprep.mubr.msk.bf16.mxu0 %vm6819_vm0, %v6817_v0  ;;  %6050 = vmatpush3.bf16.msra.mxu0 %v6539_v4  ;;  %v6542_v4 = vld [vmem:[%s7066_s19 + $0x18] sm:$0xff]  }
 0xe31   :  { %v1478_v42 = vpack.c.bf16 %v1474_v41, %v1473_v40  ;;  %6051 = vmatprep.subr.bf16.mxu0 %v6817_v0 }
 0xe33   :  { %6046 = vmatmul.mubr.msk.bf16.vlgmr.msra.gmra.mrb[36].mxu1 %vm479_vm7, %v1478_v42 }
 0xe34   :  { %6061 = vmatprep.mubr.msk.bf16.mxu1 %vm6819_vm0, %v6817_v0  ;;  %6052 = vmatpush3.bf16.msra.mxu0 %v6540_v48 }
 0xe35   :  { %6065 = vmatprep.subr.bf16.mxu0 %v6817_v0 }
 0xe9d   :  { %v1519_v43 = vpop.f32.mrb[36].mxu0 }
 0xe9e   :  { %v6029_v44 = vpop.f32.mrb[37].mxu0 }
 0xe9f   :  { %v1522_v45 = vpop.f32.mrb[38].mxu0 }
 0xea0   :  { %v6030_v3 = vpop.f32.mrb[39].mxu0 }
 0xea1   :  { %v6541_v3 = vld [vmem:[%s7066_s19 + $0x10] sm:$0xff]   ;;  %s6839_s19 = smov 2  }
 0xea2   :  { %6058 = vmatpush3.bf16.msra.mxu1 %v6541_v3  ;;  %s5499_s3 = sld [smem:[%s8021_s0 + %s6839_s19]]  }
 0xea3   :  { %6059 = vmatprep.subr.bf16.mxu1 %v6817_v0  ;;  %s7489_s19 = sld [smem:[%s8021_s0 + %s6843_s6]]   ;;  %s6847_s6 = smov 21  }
 0xea6   :  { %6060 = vmatpush3.bf16.msra.mxu1 %v6542_v4 }
 0xea7   :  { %6077 = vmatprep.subr.bf16.mxu1 %v6817_v0 }
 0xefe   :  { %v1566_v46 = vpop.f32.mrb[32].mxu1 }
 0xeff   :  { %v6035_v47 = vpop.f32.mrb[33].mxu1 }
 0xf00   :  { %v1569_v49 = vpop.f32.mrb[34].mxu1  ;;  %v6546_v47 = vld [vmem:[%s7075_s25 + $0x28] sm:$0xff]  }
 0xf01   :  { %v6452_v50 = vpack.i.bf16 %v1569_v49, %v1566_v46  ;;  %v6036_v51 = vpop.f32.mrb[35].mxu1  ;;  %v6545_v46 = vld [vmem:[%s7075_s25 + $0x20] sm:$0xff]  }
 0xf02   :  { %v1613_v52 = vpop.f32.mrb[40].mxu0 }
 0xf03   :  { %v6041_v53 = vpop.f32.mrb[41].mxu0  ;;  %6453 = vrot.lane.b32.xlu1 %v6452_v50, %s6831_s5 }
 0xf04   :  { %v1616_v54 = vpop.f32.mrb[42].mxu0 }
 0xf05   :  { %v6457_v57 = vpack.i.bf16 %v1616_v54, %v1613_v52  ;;  %v6042_v58 = vpop.f32.mrb[43].mxu0  ;;  %v5583_v54 = vld [vmem:[%s7084_s2 + $0x2] sm:$0x3]  ;;  %s6840_s2 = smov 15  }
 0xf06   :  { %v1660_v60 = vpop.f32.mrb[36].mxu1  ;;  %v1800_v58 = vrot.slane %v5583_v54, %v7090_v56  ;;  %s7313_s11 = sld [smem:[%s8021_s0 + %s6840_s2]]  }
 0xf07   :  { %6458 = vrot.lane.b32.xlu0 %v6457_v57, %s6828_s23  ;;  %v6047_v61 = vpop.f32.mrb[37].mxu1  ;;  %s5510_s2 = sld [smem:[%s8021_s0 + %s6844_s29]]  }
 0xf08   :  { %v1663_v62 = vpop.f32.mrb[38].mxu1  ;;  %s7641_s29 = sld [smem:[%s8021_s0 + %s6847_s6]]  }
 0xf09   :  { %v6462_v63 = vpack.i.bf16 %v1663_v62, %v1660_v60  ;;  %v6048_v1 = vpop.f32.mrb[39].mxu1 }
 0xf0a   :  { %v1806_v1 = vrot.slane %v5583_v54, %v7094_v59 }
 0xf0b   :  { %6463 = vrot.lane.b32.xlu1 %v6462_v63, %s6829_s27 }
 0xf75   :  { %v6454_v25 = vpop.permute.xlu1 %6453 }
 0xf76   :  { %v6456_v7 = vunpack.i.h.bf16 %v6454_v25  ;;  %v6455_v8 = vunpack.i.l.bf16 %v6454_v25 }
 0xf78   :  { %v1692_v17 = vsel %vm268_vm2, %v1522_v45, %v6456_v7  ;;  %v1691_v12 = vsel %vm268_vm2, %v1519_v43, %v6455_v8  ;;  %v6543_v8 = vld [vmem:[%s7269_s10] sm:$0xff]  }
 0xf79   :  { %v6459_v2 = vpop.permute.xlu0 %6458 }
 0xf7a   :  { %v6461_v9 = vunpack.i.h.bf16 %v6459_v2  ;;  %v6460_v10 = vunpack.i.l.bf16 %v6459_v2 }
 0xf7c   :  { %v1693_v21 = vsel %vm479_vm7, %v1691_v12, %v6460_v10  ;;  %v1694_v20 = vsel %vm479_vm7, %v1692_v17, %v6461_v9  ;;  %v6544_v10 = vld [vmem:[%s7269_s10 + $0x8] sm:$0xff]  }
 0xf7d   :  { %v6464_v11 = vpop.permute.xlu1 %6463  ;;  %v7296_v17 = vld [vmem:[%s5499_s3 + $0x8] sm:$0xff] }
 0xf7e   :  { %v6466_v14 = vunpack.i.h.bf16 %v6464_v11  ;;  %v6465_v18 = vunpack.i.l.bf16 %v6464_v11  ;;  %v7294_v11 = vld [vmem:[%s5499_s3] sm:$0xff] }
 0xf7f   :  { %v2053_v12 = vpack.c.bf16 %v7296_v17, %v7294_v11 }
 0xf80   :  { %v1696_v22 = vsel %vm788_vm8, %v1694_v20, %v6466_v14  ;;  %v1695_v23 = vsel %vm788_vm8, %v1693_v21, %v6465_v18  ;;  %v6547_v14 = vld [vmem:[%s7075_s25 + $0x30] sm:$0xff]   ;;  %v6548_v18 = vld [vmem:[%s7075_s25 + $0x38] sm:$0xff]   ;;  %v5589_v21 = vld [vmem:[%s7109_s8 + $0x1] ss:$0 sm:$0xff]  ;;  %s6841_s25 = smov 17   ;;  %s7503_s8 = sld [smem:[%s8021_s0 + %s6845_s7]]  }
 0xf81   :  { %v1702_v24 = vpack.c.bf16 %v1696_v22, %v1695_v23  ;;  %s7653_s7 = sld [smem:[%s8021_s0 + %s6848_s1]]   ;;  %s6851_s1 = smov 25  }
 0xf83   :  { %6054 = vmatmul.mubr.msk.bf16.vlgmr.msra.gmra.mrb[44].mxu0 %vm213_vm1, %v1702_v24 }
 0xf84   :  { %6073 = vmatprep.mubr.msk.bf16.mxu0 %vm6819_vm0, %v6817_v0  ;;  %6066 = vmatpush3.bf16.msra.mxu0 %v6545_v46 }
 0xf85   :  { %6067 = vmatprep.subr.bf16.mxu0 %v6817_v0 }
 0xf88   :  { %6068 = vmatpush3.bf16.msra.mxu0 %v6546_v47 }
 0xf89   :  { %6069 = vmatprep.subr.bf16.mxu0 %v6817_v0 }
 0xf8c   :  { %6070 = vmatpush3.bf16.msra.mxu0 %v6547_v14 }
 0xf8d   :  { %6071 = vmatprep.subr.bf16.mxu0 %v6817_v0 }
 0xf90   :  { %6072 = vmatpush3.bf16.msra.mxu0 %v6548_v18 }
 0xf91   :  { %6091 = vmatprep.subr.bf16.mxu0 %v6817_v0 }
0x1056   :  { %v1760_v32 = vpop.f32.mrb[44].mxu0 }
0x1057   :  { %v1761_v33 = vadd.f32 %v5579_v30, %v1760_v32  ;;  %v6055_v15 = vpop.f32.mrb[45].mxu0 }
0x1058   :  { %v1763_v36 = vpop.f32.mrb[46].mxu0 }
0x1059   :  { %v1764_v34 = vadd.f32 %v5579_v30, %v1763_v36  ;;  %v6056_v35 = vpop.f32.mrb[47].mxu0  ;;  %v1767_v19 = vadd.f32 %v1761_v33, %v7137_v5 }
0x105b   :  { %v1771_v13 = vsel %vm213_vm1, %v1767_v19, 0.0  ;;  %v1768_v37 = vadd.f32 %v1764_v34, %v7139_v6  ;;  %v5609_v34 = vld [vmem:[%s7313_s11] ss:$0 sm:$0xff] }
0x105c   :  { %1772 = vadd.xlane.f32.xlu0 %v1771_v13 }
0x105d   :  { %v1774_v16 = vsel %vm213_vm1, %v1768_v37, 0.0 }
0x105e   :  { %1775 = vadd.xlane.f32.xlu1 %v1774_v16 }
0x10e9   :  { %v1773_v38 = vpop.xlane.xlu0 %1772 }
0x10ea   :  { %v1777_v39 = vmul.f32 0.03125, %v1773_v38 }
0x10eb   :  { %v1776_v40 = vpop.xlane.xlu1 %1775 }
0x10ec   :  { %v1779_v41 = vsub.f32 %v1767_v19, %v1777_v39  ;;  %v1778_v42 = vmul.f32 0.03125, %v1776_v40 }
0x10ee   :  { %v1780_v43 = vsub.f32 %v1768_v37, %v1778_v42  ;;  %v1781_v44 = vmul.f32 %v1779_v41, %v1779_v41 }
0x10f0   :  { %v1783_v5 = vsel %vm213_vm1, %v1781_v44, 0.0  ;;  %v1782_v45 = vmul.f32 %v1780_v43, %v1780_v43 }
0x10f1   :  { %1784 = vadd.xlane.f32.xlu0 %v1783_v5 }
0x10f2   :  { %v1786_v6 = vsel %vm213_vm1, %v1782_v45, 0.0 }
0x10f5   :  { %1787 = vadd.xlane.f32.xlu0 %v1786_v6 }
0x117e   :  { %v1785_v48 = vpop.xlane.xlu0 %1784 }
0x117f   :  { %v1789_v49 = vmul.f32 0.03125, %v1785_v48 }
0x1181   :  { %v1791_v50 = vadd.f32 1e-05, %v1789_v49 }
0x1182   :  { %v1788_v51 = vpop.xlane.xlu0 %1787 }
0x1183   :  { %6649 = vrsqrt.f32 %v1791_v50  ;;  %v1790_v52 = vmul.f32 0.03125, %v1788_v51  ;;  %v141_v51 = vadd.s32 8, %v7087_v55 }
0x1185   :  { %v1792_v53 = vadd.f32 1e-05, %v1790_v52  ;;  %vm184_vm11 = vcmp.le.s32.totalorder %v6945_v26, %v141_v51 }
0x1186   :  { %vm186_vm13 = vmand %vm6950_vm6, %vm184_vm11 }
0x1187   :  { %6651 = vrsqrt.f32 %v1792_v53  ;;  %v7378_v53 = vsel %vm185_vm12, 0.0, %v6826_v28 }
0x118d   :  { %v6650_v57 = vpop.eup %6649 }
0x118e   :  { %v1795_v60 = vmul.f32 %v6650_v57, %v1779_v41 }
0x1190   :  { %v1801_v62 = vmul.f32 %v1800_v58, %v1795_v60  ;;  %v7381_v60 = vsel %vm186_vm13, 0.0, %v6826_v28 }
0x1191   :  { %v6652_v61 = vpop.eup %6651 }
0x1192   :  { %v1796_v63 = vmul.f32 %v6652_v61, %v1780_v43  ;;  %v7283_v2 = vadd.f32 %v1806_v1, %v1801_v62 }
0x1194   :  { %v1802_v25 = vmul.f32 %v1800_v58, %v1796_v63 }
0x1196   :  { %v7285_v7 = vadd.f32 %v1806_v1, %v1802_v25 }
0x1198   :  { %v1814_v9 = vpack.c.bf16 %v7285_v7, %v7283_v2 }
0x119a   :  { %6062 = vmatmul.mubr.msk.bf16.vlgmr.msra.gmra.mrb[40].mxu1 %vm213_vm1, %v1814_v9 }
0x119b   :  { %6078 = vmatpush3.bf16.msra.mxu1 %v6543_v8  ;;  %6081 = vmatprep.mubr.msk.bf16.mxu1 %vm6819_vm0, %v6817_v0 }
0x119c   :  { %6079 = vmatprep.subr.bf16.mxu1 %v6817_v0 }
0x119f   :  { %6080 = vmatpush3.bf16.msra.mxu1 %v6544_v10 }
0x11a0   :  { %6085 = vmatprep.subr.bf16.mxu1 %v6817_v0 }
0x11a2   :  { %6082 = vmatmul.mubr.msk.bf16.vlgmr.msra.gmra.mrb[44].mxu1 %vm213_vm1, %v2053_v12 }
0x11a3   :  { %6087 = vmatprep.mubr.msk.bf16.mxu1 %vm6819_vm0, %v6817_v0 }
0x126d   :  { %v1872_v20 = vpop.f32.mrb[40].mxu1 }
0x126e   :  { %v1873_v22 = vadd.f32 %v5589_v21, %v1872_v20  ;;  %v6063_v23 = vpop.f32.mrb[41].mxu1 }
0x126f   :  { %v1875_v24 = vpop.f32.mrb[42].mxu1 }
0x1270   :  { %v1876_v30 = vadd.f32 %v5589_v21, %v1875_v24  ;;  %v6064_v32 = vpop.f32.mrb[43].mxu1  ;;  %v1879_v33 = vmax.f32 %v1873_v22, 0.0 }
0x1272   :  { %v1880_v15 = vmax.f32 %v1876_v30, 0.0 }
0x1274   :  { %v1881_v36 = vpack.c.bf16 %v1880_v15, %v1879_v33 }
0x1275   :  { %v2110_v35 = vpop.f32.mrb[44].mxu1 }
0x1276   :  { %6074 = vmatmul.mubr.msk.bf16.vlgmr.msra.gmra.mrb[48].mxu0 %vm1011_vm9, %v1881_v36  ;;  %v6083_v19 = vpop.f32.mrb[45].mxu1  ;;  %v2111_v37 = vadd.f32 %v5609_v34, %v2110_v35 }
0x1277   :  { %v2113_v13 = vpop.f32.mrb[46].mxu1  ;;  %6093 = vmatprep.mubr.msk.bf16.mxu0 %vm6819_vm0, %v6817_v0 }
0x1278   :  { %v2114_v16 = vadd.f32 %v5609_v34, %v2113_v13  ;;  %v6084_v38 = vpop.f32.mrb[47].mxu1 }
0x127a   :  { %v7319_v39 = vpack.c.bf16 %v2114_v16, %v2111_v37 }
0x127c   :  { %2121 = vrot.lane.b32.xlu0 %v7319_v39, %s6825_s18  ;;  %2119 = vrot.lane.b32.xlu1 %v7319_v39, %s6823_s16 }
0x1280   :  { %2123 = vrot.lane.b32.xlu1 %v7319_v39, %s6822_s15 }
0x1284   :  { %2125 = vrot.lane.b32.xlu1 %v7319_v39, %s6824_s17 }
0x12ee   :  { %v7329_v40 = vpop.permute.xlu0 %2121  ;;  %v7331_v41 = vpop.permute.xlu1 %2119 }
0x12ef   :  { %2223 = vrot.lane.b32.xlu1 %v7329_v40, %s6824_s17  ;;  %2174 = vrot.lane.b32.xlu0 %v7331_v41, %s6824_s17 }
0x12f2   :  { %v7337_v42 = vpop.permute.xlu1 %2123 }
0x12f3   :  { %2272 = vrot.lane.b32.xlu0 %v7337_v42, %s6824_s17 }
0x12f6   :  { %v2126_v43 = vpop.permute.xlu1 %2125 }
0x12f7   :  { %v2131_v44 = vsel %vm268_vm2, %v2126_v43, 0 }
0x12f8   :  { %6086 = vmatpush3.bf16.xpose.msra.mxu1 %v2131_v44 }
0x12f9   :  { %6097 = vmatprep.subr.bf16.mxu1 %v6817_v0 }
0x12ff   :  { %6088 = vmatmul.mubr.msk.bf16.vlgmr.msra.gmra.mrb[48].mxu1 %vm268_vm2, %v7319_v39 }
0x1300   :  { %6099 = vmatprep.mubr.msk.bf16.mxu1 %vm6819_vm0, %v6817_v0 }
0x1349   :  { %v7347_v5 = vpop.f32.mrb[48].mxu0 }
0x134a   :  { %v6075_v45 = vpop.f32.mrb[49].mxu0 }
0x134b   :  { %v7349_v6 = vpop.f32.mrb[50].mxu0 }
0x134c   :  { %v6076_v3 = vpop.f32.mrb[51].mxu0 }
0x1361   :  { %v2175_v4 = vpop.permute.xlu0 %2174  ;;  %v2224_v46 = vpop.permute.xlu1 %2223 }
0x1362   :  { %v2180_v47 = vsel %vm268_vm2, %v2175_v4, 0  ;;  %v2229_v48 = vsel %vm268_vm2, %v2224_v46, 0 }
0x1363   :  { %6092 = vmatpush3.bf16.xpose.msra.mxu0 %v2180_v47  ;;  %6098 = vmatpush3.bf16.xpose.msra.mxu1 %v2229_v48 }
0x1364   :  { %6103 = vmatprep.subr.bf16.mxu0 %v6817_v0  ;;  %6109 = vmatprep.subr.bf16.mxu1 %v6817_v0 }
0x1365   :  { %v2273_v49 = vpop.permute.xlu0 %2272 }
0x1366   :  { %v2278_v50 = vsel %vm268_vm2, %v2273_v49, 0 }
0x136a   :  { %6094 = vmatmul.mubr.msk.bf16.vlgmr.msra.gmra.mrb[52].mxu0 %vm268_vm2, %v7331_v41  ;;  %6100 = vmatmul.mubr.msk.bf16.vlgmr.msra.gmra.mrb[52].mxu1 %vm268_vm2, %v7329_v40 }
0x136b   :  { %6104 = vmatpush3.bf16.xpose.msra.mxu0 %v2278_v50  ;;  %6105 = vmatprep.mubr.msk.bf16.mxu0 %vm6819_vm0, %v6817_v0 }
0x136c   :  { %6115 = vmatprep.subr.bf16.mxu0 %v6817_v0  ;;  %6111 = vmatprep.mubr.msk.bf16.mxu1 %vm6819_vm0, %v6817_v0 }
0x1372   :  { %6106 = vmatmul.mubr.msk.bf16.vlgmr.msra.gmra.mrb[56].mxu0 %vm268_vm2, %v7337_v42 }
0x1373   :  { %6117 = vmatprep.mubr.msk.bf16.mxu0 %vm6819_vm0, %v6817_v0 }
0x13d2   :  { %v2167_v52 = vpop.f32.mrb[48].mxu1 }
0x13d3   :  { %v2321_v54 = vmul.f32 0.35355338, %v2167_v52  ;;  %v6089_v57 = vpop.f32.mrb[49].mxu1 }
0x13d4   :  { %v2170_v58 = vpop.f32.mrb[50].mxu1 }
0x13d5   :  { %v2322_v61 = vmul.f32 0.35355338, %v2170_v58  ;;  %v6090_v55 = vpop.f32.mrb[51].mxu1  ;;  %v2329_v62 = vadd.f32 %v2321_v54, %v7378_v53 }
0x13d7   :  { %v2337_v26 = vsel %vm479_vm7, %v2329_v62, -inf  ;;  %v2330_v63 = vadd.f32 %v2322_v61, %v7381_v60 }
0x13d8   :  { %2338 = vmax.xlane.f32.xlu1 %v2337_v26 }
0x13d9   :  { %v2340_v27 = vsel %vm479_vm7, %v2330_v63, -inf }
0x13da   :  { %2341 = vmax.xlane.f32.xlu0 %v2340_v27 }
0x143d   :  { %v2216_v1 = vpop.f32.mrb[52].mxu0  ;;  %v2265_v25 = vpop.f32.mrb[52].mxu1 }
0x143e   :  { %v2323_v8 = vmul.f32 0.35355338, %v2216_v1  ;;  %v2325_v9 = vmul.f32 0.35355338, %v2265_v25  ;;  %v6095_v10 = vpop.f32.mrb[53].mxu0  ;;  %v6101_v12 = vpop.f32.mrb[53].mxu1 }
0x143f   :  { %v2219_v28 = vpop.f32.mrb[54].mxu0  ;;  %v2268_v14 = vpop.f32.mrb[54].mxu1 }
0x1440   :  { %v2324_v18 = vmul.f32 0.35355338, %v2219_v28  ;;  %v2326_v21 = vmul.f32 0.35355338, %v2268_v14  ;;  %v6096_v20 = vpop.f32.mrb[55].mxu0  ;;  %v6102_v22 = vpop.f32.mrb[55].mxu1  ;;  %v2331_v23 = vadd.f32 %v2323_v8, %v7378_v53  ;;  %v2333_v32 = vadd.f32 %v2325_v9, %v7378_v53 }
0x1442   :  { %v2343_v24 = vsel %vm479_vm7, %v2331_v23, -inf  ;;  %v2332_v30 = vadd.f32 %v2324_v18, %v7381_v60  ;;  %v2334_v15 = vadd.f32 %v2326_v21, %v7381_v60  ;;  %v2349_v19 = vsel %vm479_vm7, %v2333_v32, -inf }
0x1443   :  { %2344 = vmax.xlane.f32.xlu0 %v2343_v24 }
0x1444   :  { %v2346_v33 = vsel %vm479_vm7, %v2332_v30, -inf  ;;  %v2352_v38 = vsel %vm479_vm7, %v2334_v15, -inf }
0x1445   :  { %v2314_v36 = vpop.f32.mrb[56].mxu0  ;;  %2347 = vmax.xlane.f32.xlu1 %v2346_v33 }
0x1446   :  { %v2327_v34 = vmul.f32 0.35355338, %v2314_v36  ;;  %v6107_v35 = vpop.f32.mrb[57].mxu0 }
0x1447   :  { %v2317_v13 = vpop.f32.mrb[58].mxu0  ;;  %2350 = vmax.xlane.f32.xlu0 %v2349_v19 }
0x1448   :  { %v2328_v37 = vmul.f32 0.35355338, %v2317_v13  ;;  %v6108_v16 = vpop.f32.mrb[59].mxu0  ;;  %v2335_v43 = vadd.f32 %v2327_v34, %v7378_v53 }
0x1449   :  { %2353 = vmax.xlane.f32.xlu1 %v2352_v38 }
0x144a   :  { %v2355_v44 = vsel %vm479_vm7, %v2335_v43, -inf  ;;  %v2336_v45 = vadd.f32 %v2328_v37, %v7381_v60 }
0x144b   :  { %2356 = vmax.xlane.f32.xlu0 %v2355_v44 }
0x144c   :  { %v2358_v3 = vsel %vm479_vm7, %v2336_v45, -inf }
0x144d   :  { %2359 = vmax.xlane.f32.xlu1 %v2358_v3 }
0x145e   :  { %2476 = vrot.lane.b32.xlu1 %v7331_v41, %s6827_s22 }
0x1461   :  { %2429 = vrot.lane.b32.xlu0 %v7319_v39, %s6827_s22 }
0x1465   :  { %v2339_v4 = vpop.xlane.xlu1 %2338 }
0x1466   :  { %v2361_v47 = vsub.f32 %v2329_v62, %v2339_v4 }
0x1467   :  { %v2342_v46 = vpop.xlane.xlu0 %2341 }
0x1468   :  { %v2362_v48 = vsub.f32 %v2330_v63, %v2342_v46  ;;  %v2369_v49 = vmul.f32 1.442695, %v2361_v47 }
0x146a   :  { %v2371_v50 = vmul.f32 1.442695, %v2362_v48  ;;  %6653 = vpow2.f32 %v2369_v49 }
0x146c   :  { %6655 = vpow2.f32 %v2371_v50 }
0x1474   :  { %v6654_v51 = vpop.eup %6653 }
0x1475   :  { %v2385_v54 = vsel %vm479_vm7, %v6654_v51, 0.0 }
0x1476   :  { %v6656_v52 = vpop.eup %6655 }
0x1477   :  { %v2388_v57 = vsel %vm479_vm7, %v6656_v52, 0.0 }
0x1480   :  { %2386 = vadd.xlane.f32.xlu0 %v2385_v54 }
0x1482   :  { %2389 = vadd.xlane.f32.xlu1 %v2388_v57 }
0x14d0   :  { %v2345_v41 = vpop.xlane.xlu0 %2344 }
0x14d1   :  { %v2363_v58 = vsub.f32 %v2331_v23, %v2345_v41 }
0x14d2   :  { %v2348_v61 = vpop.xlane.xlu1 %2347 }
0x14d3   :  { %v2373_v39 = vmul.f32 1.442695, %v2363_v58  ;;  %v2364_v55 = vsub.f32 %v2332_v30, %v2348_v61 }
0x14d4   :  { %v2351_v26 = vpop.xlane.xlu0 %2350 }
0x14d5   :  { %6657 = vpow2.f32 %v2373_v39  ;;  %v2375_v62 = vmul.f32 1.442695, %v2364_v55  ;;  %v2365_v63 = vsub.f32 %v2333_v32, %v2351_v26 }
0x14d6   :  { %v2354_v27 = vpop.xlane.xlu1 %2353 }
0x14d7   :  { %6659 = vpow2.f32 %v2375_v62  ;;  %v2377_v1 = vmul.f32 1.442695, %v2365_v63  ;;  %v2366_v25 = vsub.f32 %v2334_v15, %v2354_v27 }
0x14d8   :  { %v2357_v8 = vpop.xlane.xlu0 %2356 }
0x14d9   :  { %6661 = vpow2.f32 %v2377_v1  ;;  %v2379_v9 = vmul.f32 1.442695, %v2366_v25  ;;  %v2367_v10 = vsub.f32 %v2335_v43, %v2357_v8 }
0x14da   :  { %v2360_v12 = vpop.xlane.xlu1 %2359 }
0x14db   :  { %6663 = vpow2.f32 %v2379_v9  ;;  %v2381_v28 = vmul.f32 1.442695, %v2367_v10  ;;  %v2368_v14 = vsub.f32 %v2336_v45, %v2360_v12 }
0x14dc   :  { %v2430_v18 = vpop.permute.xlu0 %2429 }
0x14dd   :  { %6665 = vpow2.f32 %v2381_v28  ;;  %v2383_v21 = vmul.f32 1.442695, %v2368_v14  ;;  %6110 = vmatpush3.bf16.msra.mxu1 %v2430_v18  ;;  %v6549_v28 = vld [vmem:[%s7022_s26] sm:$0xff]  }
0x14de   :  { %v2477_v20 = vpop.permute.xlu1 %2476  ;;  %6121 = vmatprep.subr.bf16.mxu1 %v6817_v0 }
0x14df   :  { %v6658_v22 = vpop.eup %6657  ;;  %6667 = vpow2.f32 %v2383_v21  ;;  %6116 = vmatpush3.bf16.msra.mxu0 %v2477_v20  ;;  %v6550_v21 = vld [vmem:[%s7022_s26 + $0x8] sm:$0xff]  }
0x14e0   :  { %v2391_v23 = vsel %vm479_vm7, %v6658_v22, 0.0  ;;  %6127 = vmatprep.subr.bf16.mxu0 %v6817_v0 }
0x14e1   :  { %v6660_v24 = vpop.eup %6659  ;;  %2392 = vadd.xlane.f32.xlu0 %v2391_v23 }
0x14e2   :  { %v2394_v30 = vsel %vm479_vm7, %v6660_v24, 0.0 }
0x14e3   :  { %v6662_v32 = vpop.eup %6661  ;;  %2395 = vadd.xlane.f32.xlu1 %v2394_v30 }
0x14e4   :  { %v2397_v33 = vsel %vm479_vm7, %v6662_v32, 0.0 }
0x14e5   :  { %v6664_v15 = vpop.eup %6663  ;;  %2398 = vadd.xlane.f32.xlu0 %v2397_v33 }
0x14e6   :  { %v2400_v36 = vsel %vm479_vm7, %v6664_v15, 0.0 }
0x14e7   :  { %v6666_v34 = vpop.eup %6665  ;;  %2401 = vadd.xlane.f32.xlu1 %v2400_v36 }
0x14e8   :  { %v2403_v35 = vsel %vm479_vm7, %v6666_v34, 0.0 }
0x14e9   :  { %v6668_v19 = vpop.eup %6667  ;;  %2404 = vadd.xlane.f32.xlu0 %v2403_v35 }
0x14ea   :  { %v2406_v13 = vsel %vm479_vm7, %v6668_v19, 0.0 }
0x14eb   :  { %2407 = vadd.xlane.f32.xlu1 %v2406_v13 }
0x14fc   :  { %2523 = vrot.lane.b32.xlu1 %v7329_v40, %s6827_s22 }
0x14ff   :  { %2570 = vrot.lane.b32.xlu0 %v7337_v42, %s6827_s22 }
0x150d   :  { %v2387_v37 = vpop.xlane.xlu0 %2386 }
0x150e   :  { %6669 = vrcp.f32 %v2387_v37  ;;  %v5602_v37 = vld [vmem:[%s7118_s13 + $0x1] ss:$0 sm:$0xff]  ;;  %s7459_s13 = sld [smem:[%s8021_s0 + %s6841_s25]]   ;;  %s6852_s25 = smov 28  }
0x150f   :  { %v2390_v16 = vpop.xlane.xlu1 %2389  ;;  %s7704_s6 = sld [smem:[%s8021_s0 + %s6852_s25]]  }
0x1510   :  { %6671 = vrcp.f32 %v2390_v16  ;;  %v1961_v16 = vadd.f32 %v5602_v37, %v7347_v5 }
0x1518   :  { %v6670_v38 = vpop.eup %6669 }
0x1519   :  { %v2417_v44 = vmul.f32 %v6670_v38, %v6654_v51  ;;  %v1967_v38 = vadd.f32 %v1961_v16, %v7283_v2 }
0x151a   :  { %v6672_v43 = vpop.eup %6671 }
0x151b   :  { %v2418_v45 = vmul.f32 %v6672_v43, %v6656_v52  ;;  %v1971_v43 = vsel %vm213_vm1, %v1967_v38, 0.0 }
0x151d   :  { %v2425_v3 = vpack.c.bf16 %v2418_v45, %v2417_v44  ;;  %v1964_v44 = vadd.f32 %v5602_v37, %v7349_v6 }
0x151f   :  { %6112 = vmatmul.mubr.msk.bf16.vlgmr.msra.gmra.mrb[56].mxu1 %vm479_vm7, %v2425_v3  ;;  %v1968_v45 = vadd.f32 %v1964_v44, %v7285_v7 }
0x1520   :  { %6123 = vmatprep.mubr.msk.bf16.mxu1 %vm6819_vm0, %v6817_v0 }
0x1521   :  { %v1974_v3 = vsel %vm213_vm1, %v1968_v45, 0.0 }
0x156e   :  { %v2393_v4 = vpop.xlane.xlu0 %2392 }
0x156f   :  { %6673 = vrcp.f32 %v2393_v4 }
0x1570   :  { %v2396_v40 = vpop.xlane.xlu1 %2395 }
0x1571   :  { %6675 = vrcp.f32 %v2396_v40 }
0x1572   :  { %v2399_v46 = vpop.xlane.xlu0 %2398 }
0x1573   :  { %6677 = vrcp.f32 %v2399_v46 }
0x1574   :  { %v2402_v42 = vpop.xlane.xlu1 %2401 }
0x1575   :  { %6679 = vrcp.f32 %v2402_v42 }
0x1576   :  { %v2405_v47 = vpop.xlane.xlu0 %2404 }
0x1577   :  { %6681 = vrcp.f32 %v2405_v47 }
0x1578   :  { %v2408_v48 = vpop.xlane.xlu1 %2407 }
0x1579   :  { %v6674_v49 = vpop.eup %6673  ;;  %6683 = vrcp.f32 %v2408_v48 }
0x157a   :  { %v2419_v51 = vmul.f32 %v6674_v49, %v6658_v22  ;;  %v2571_v55 = vpop.permute.xlu0 %2570 }
0x157b   :  { %v6676_v50 = vpop.eup %6675 }
0x157c   :  { %v2420_v52 = vmul.f32 %v6676_v50, %v6660_v24  ;;  %v2524_v54 = vpop.permute.xlu1 %2523 }
0x157d   :  { %v6678_v57 = vpop.eup %6677  ;;  %6122 = vmatpush3.bf16.msra.mxu1 %v2524_v54 }
0x157e   :  { %v2426_v41 = vpack.c.bf16 %v2420_v52, %v2419_v51  ;;  %6133 = vmatprep.subr.bf16.mxu1 %v6817_v0  ;;  %v2421_v61 = vmul.f32 %v6678_v57, %v6662_v32 }
0x157f   :  { %v6680_v58 = vpop.eup %6679 }
0x1580   :  { %v2422_v39 = vmul.f32 %v6680_v58, %v6664_v15  ;;  %6118 = vmatmul.mubr.msk.bf16.vlgmr.msra.gmra.mrb[60].mxu0 %vm479_vm7, %v2426_v41 }
0x1581   :  { %v6682_v26 = vpop.eup %6681  ;;  %6128 = vmatpush3.bf16.msra.mxu0 %v2571_v55  ;;  %6129 = vmatprep.mubr.msk.bf16.mxu0 %vm6819_vm0, %v6817_v0 }
0x1582   :  { %v2427_v62 = vpack.c.bf16 %v2422_v39, %v2421_v61  ;;  %6141 = vmatprep.subr.bf16.mxu0 %v6817_v0  ;;  %v2423_v27 = vmul.f32 %v6682_v26, %v6666_v34 }
0x1583   :  { %v6684_v63 = vpop.eup %6683 }
0x1584   :  { %v2424_v1 = vmul.f32 %v6684_v63, %v6668_v19  ;;  %6124 = vmatmul.mubr.msk.bf16.vlgmr.msra.gmra.mrb[60].mxu1 %vm479_vm7, %v2427_v62 }
0x1585   :  { %6137 = vmatprep.mubr.msk.bf16.mxu1 %vm6819_vm0, %v6817_v0  ;;  %6134 = vmatpush3.bf16.msra.mxu1 %v6549_v28  ;;  %v5608_v28 = vld [vmem:[%s7132_s28 + $0x2] sm:$0x3]  ;;  %s7474_s28 = sld [smem:[%s8021_s0 + %s6842_s20]]  }
0x1586   :  { %v2428_v25 = vpack.c.bf16 %v2424_v1, %v2423_v27  ;;  %6135 = vmatprep.subr.bf16.mxu1 %v6817_v0  ;;  %s7666_s20 = sld [smem:[%s8021_s0 + %s6849_s9]]  }
0x1587   :  { %s7690_s9 = sld [smem:[%s8021_s0 + %s6851_s1]]  }
0x1588   :  { %6130 = vmatmul.mubr.msk.bf16.vlgmr.msra.gmra.mrb[64].mxu0 %vm479_vm7, %v2428_v25 }
0x1589   :  { %6145 = vmatprep.mubr.msk.bf16.mxu0 %vm6819_vm0, %v6817_v0  ;;  %6136 = vmatpush3.bf16.msra.mxu1 %v6550_v21  ;;  %v2000_v21 = vrot.slane %v5608_v28, %v7090_v56 }
0x158a   :  { %6149 = vmatprep.subr.bf16.mxu1 %v6817_v0 }
0x15f2   :  { %v2469_v8 = vpop.f32.mrb[56].mxu1 }
0x15f3   :  { %v6113_v9 = vpop.f32.mrb[57].mxu1 }
0x15f4   :  { %v2472_v10 = vpop.f32.mrb[58].mxu1 }
0x15f5   :  { %v6114_v12 = vpop.f32.mrb[59].mxu1 }
0x1653   :  { %v2516_v14 = vpop.f32.mrb[60].mxu0 }
0x1654   :  { %v6119_v18 = vpop.f32.mrb[61].mxu0 }
0x1655   :  { %v2519_v20 = vpop.f32.mrb[62].mxu0 }
0x1656   :  { %v6467_v22 = vpack.i.bf16 %v2519_v20, %v2516_v14  ;;  %v6120_v23 = vpop.f32.mrb[63].mxu0 }
0x1657   :  { %v2563_v24 = vpop.f32.mrb[60].mxu1 }
0x1658   :  { %6468 = vrot.lane.b32.xlu1 %v6467_v22, %s6831_s5  ;;  %v6125_v30 = vpop.f32.mrb[61].mxu1  ;;  %v5621_v22 = vld [vmem:[%s7459_s13] ss:$0 sm:$0xff] }
0x1659   :  { %v2566_v32 = vpop.f32.mrb[62].mxu1 }
0x165a   :  { %v6472_v33 = vpack.i.bf16 %v2566_v32, %v2563_v24  ;;  %v6126_v15 = vpop.f32.mrb[63].mxu1  ;;  %v2006_v32 = vrot.slane %v5608_v28, %v7094_v59 }
0x165b   :  { %v2610_v36 = vpop.f32.mrb[64].mxu0 }
0x165c   :  { %v6131_v34 = vpop.f32.mrb[65].mxu0  ;;  %6473 = vrot.lane.b32.xlu0 %v6472_v33, %s6828_s23 }
0x165d   :  { %v2613_v35 = vpop.f32.mrb[66].mxu0 }
0x165e   :  { %v6477_v19 = vpack.i.bf16 %v2613_v35, %v2610_v36  ;;  %v6132_v13 = vpop.f32.mrb[67].mxu0 }
0x1660   :  { %6478 = vrot.lane.b32.xlu1 %v6477_v19, %s6829_s27 }
0x167b   :  { %1972 = vadd.xlane.f32.xlu0 %v1971_v43 }
0x1684   :  { %1975 = vadd.xlane.f32.xlu1 %v1974_v3 }
0x16ca   :  { %v6469_v4 = vpop.permute.xlu1 %6468 }
0x16cb   :  { %v6471_v46 = vunpack.i.h.bf16 %v6469_v4  ;;  %v6470_v42 = vunpack.i.l.bf16 %v6469_v4 }
0x16cd   :  { %v2641_v5 = vsel %vm268_vm2, %v2469_v8, %v6470_v42  ;;  %v2642_v2 = vsel %vm268_vm2, %v2472_v10, %v6471_v46 }
0x16ce   :  { %v6474_v40 = vpop.permute.xlu0 %6473 }
0x16cf   :  { %v6476_v47 = vunpack.i.h.bf16 %v6474_v40  ;;  %v6475_v48 = vunpack.i.l.bf16 %v6474_v40  ;;  %v6552_v40 = vld [vmem:[%s7474_s28 + $0x8] sm:$0xff]  }
0x16d1   :  { %v2644_v6 = vsel %vm479_vm7, %v2642_v2, %v6476_v47  ;;  %v2643_v7 = vsel %vm479_vm7, %v2641_v5, %v6475_v48 }
0x16d2   :  { %v6479_v49 = vpop.permute.xlu1 %6478 }
0x16d3   :  { %v6481_v50 = vunpack.i.h.bf16 %v6479_v49  ;;  %v6480_v51 = vunpack.i.l.bf16 %v6479_v49 }
0x16d5   :  { %v2645_v52 = vsel %vm788_vm8, %v2643_v7, %v6480_v51  ;;  %v2646_v54 = vsel %vm788_vm8, %v2644_v6, %v6481_v50 }
0x16d6   :  { %v2651_v57 = vpack.c.bf16 %v2646_v54, %v2645_v52 }
0x16d8   :  { %6138 = vmatmul.mubr.msk.bf16.vlgmr.msra.gmra.mrb[64].mxu1 %vm213_vm1, %v2651_v57 }
0x16d9   :  { %6153 = vmatprep.mubr.msk.bf16.mxu1 %vm6819_vm0, %v6817_v0 }
0x1708   :  { %v1973_v41 = vpop.xlane.xlu0 %1972 }
0x1709   :  { %v1977_v58 = vmul.f32 0.03125, %v1973_v41 }
0x170b   :  { %v1979_v61 = vsub.f32 %v1967_v38, %v1977_v58 }
0x170d   :  { %v1981_v39 = vmul.f32 %v1979_v61, %v1979_v61 }
0x170f   :  { %v1983_v55 = vsel %vm213_vm1, %v1981_v39, 0.0 }
0x1710   :  { %1984 = vadd.xlane.f32.xlu0 %v1983_v55 }
0x1711   :  { %v1976_v26 = vpop.xlane.xlu1 %1975 }
0x1712   :  { %v1978_v62 = vmul.f32 0.03125, %v1976_v26  ;;  %v7492_v26 = vld [vmem:[%s7489_s19] ss:$0 sm:$0xff] }
0x1714   :  { %v1980_v63 = vsub.f32 %v1968_v45, %v1978_v62 }
0x1716   :  { %v1982_v27 = vmul.f32 %v1980_v63, %v1980_v63 }
0x1718   :  { %v1986_v1 = vsel %vm213_vm1, %v1982_v27, 0.0 }
0x1719   :  { %1987 = vadd.xlane.f32.xlu0 %v1986_v1 }
0x179d   :  { %v1985_v25 = vpop.xlane.xlu0 %1984 }
0x179e   :  { %v1989_v8 = vmul.f32 0.03125, %v1985_v25 }
0x17a0   :  { %v1991_v9 = vadd.f32 1e-05, %v1989_v8 }
0x17a2   :  { %6685 = vrsqrt.f32 %v1991_v9 }
0x17a6   :  { %v1988_v10 = vpop.xlane.xlu0 %1987 }
0x17a7   :  { %v1990_v12 = vmul.f32 0.03125, %v1988_v10 }
0x17a9   :  { %v1992_v14 = vadd.f32 1e-05, %v1990_v12 }
0x17ab   :  { %6687 = vrsqrt.f32 %v1992_v14  ;;  %v2708_v18 = vpop.f32.mrb[64].mxu1 }
0x17ac   :  { %v6686_v20 = vpop.eup %6685  ;;  %v6139_v23 = vpop.f32.mrb[65].mxu1  ;;  %v2709_v15 = vadd.f32 %v5621_v22, %v2708_v18 }
0x17ad   :  { %v2711_v24 = vpop.f32.mrb[66].mxu1  ;;  %v1995_v30 = vmul.f32 %v6686_v20, %v1979_v61  ;;  %v2009_v23 = vld [vmem:[%s5510_s2] sm:$0x3] }
0x17ae   :  { %v6140_v33 = vpop.f32.mrb[67].mxu1  ;;  %v2715_v35 = vadd.f32 %v2709_v15, %v7294_v11  ;;  %v2712_v38 = vadd.f32 %v5621_v22, %v2711_v24  ;;  %v6551_v11 = vld [vmem:[%s7474_s28] sm:$0xff]   ;;  %v2039_v24 = vrot.slane %v2009_v23, %v7090_v56 }
0x17af   :  { %v2001_v36 = vmul.f32 %v2000_v21, %v1995_v30  ;;  %6142 = vmatpush3.bf16.msra.mxu0 %v6551_v11  ;;  %v2717_v33 = vld [vmem:[%s7503_s8] sm:$0x3] }
0x17b0   :  { %v2718_v16 = vsel %vm213_vm1, %v2715_v35, 0.0  ;;  %v2716_v45 = vadd.f32 %v2712_v38, %v7296_v17  ;;  %6143 = vmatprep.subr.bf16.mxu0 %v6817_v0  ;;  %v2753_v38 = vrot.slane %v2717_v33, %v7094_v59 }
0x17b1   :  { %v2007_v34 = vadd.f32 %v2006_v32, %v2001_v36  ;;  %v2045_v36 = vrot.slane %v2009_v23, %v7094_v59 }
0x17b2   :  { %v2721_v4 = vsel %vm213_vm1, %v2716_v45, 0.0 }
0x17b3   :  { %v2010_v19 = vsel %vm213_vm1, %v2007_v34, 0.0  ;;  %6144 = vmatpush3.bf16.msra.mxu0 %v6552_v40 }
0x17b4   :  { %2011 = vadd.xlane.f32.xlu1 %v2010_v19  ;;  %6157 = vmatprep.subr.bf16.mxu0 %v6817_v0 }
0x17b5   :  { %v6688_v13 = vpop.eup %6687 }
0x17b6   :  { %v1996_v37 = vmul.f32 %v6688_v13, %v1980_v63 }
0x17b8   :  { %2719 = vadd.xlane.f32.xlu1 %v2718_v16  ;;  %v2002_v43 = vmul.f32 %v2000_v21, %v1996_v37 }
0x17ba   :  { %v2008_v44 = vadd.f32 %v2006_v32, %v2002_v43 }
0x17bc   :  { %v2013_v3 = vsel %vm213_vm1, %v2008_v44, 0.0 }
0x17bd   :  { %2014 = vadd.xlane.f32.xlu0 %v2013_v3 }
0x17c1   :  { %2722 = vadd.xlane.f32.xlu0 %v2721_v4 }
0x1841   :  { %v2012_v17 = vpop.xlane.xlu1 %2011 }
0x1842   :  { %v2016_v46 = vmul.f32 0.03125, %v2012_v17 }
0x1844   :  { %v2018_v42 = vsub.f32 %v2007_v34, %v2016_v46 }
0x1845   :  { %v2720_v47 = vpop.xlane.xlu1 %2719 }
0x1846   :  { %v2724_v48 = vmul.f32 0.03125, %v2720_v47  ;;  %v2020_v49 = vmul.f32 %v2018_v42, %v2018_v42 }
0x1848   :  { %v2726_v5 = vsub.f32 %v2715_v35, %v2724_v48  ;;  %v2022_v2 = vsel %vm213_vm1, %v2020_v49, 0.0  ;;  %v2747_v35 = vrot.slane %v2717_v33, %v7090_v56 }
0x1849   :  { %2023 = vadd.xlane.f32.xlu1 %v2022_v2 }
0x184a   :  { %v2015_v50 = vpop.xlane.xlu0 %2014  ;;  %v2728_v51 = vmul.f32 %v2726_v5, %v2726_v5 }
0x184b   :  { %v2017_v6 = vmul.f32 0.03125, %v2015_v50 }
0x184c   :  { %v2730_v7 = vsel %vm213_vm1, %v2728_v51, 0.0 }
0x184d   :  { %v2019_v52 = vsub.f32 %v2008_v44, %v2017_v6  ;;  %2731 = vadd.xlane.f32.xlu1 %v2730_v7 }
0x184e   :  { %v2723_v54 = vpop.xlane.xlu0 %2722 }
0x184f   :  { %v2725_v57 = vmul.f32 0.03125, %v2723_v54  ;;  %v2021_v41 = vmul.f32 %v2019_v52, %v2019_v52 }
0x1851   :  { %v2727_v58 = vsub.f32 %v2716_v45, %v2725_v57  ;;  %v2025_v61 = vsel %vm213_vm1, %v2021_v41, 0.0 }
0x1852   :  { %2026 = vadd.xlane.f32.xlu0 %v2025_v61 }
0x1853   :  { %v2729_v39 = vmul.f32 %v2727_v58, %v2727_v58 }
0x1855   :  { %v2733_v55 = vsel %vm213_vm1, %v2729_v39, 0.0 }
0x1856   :  { %2734 = vadd.xlane.f32.xlu0 %v2733_v55 }
0x185e   :  { %2825 = vrot.lane.b32.xlu1 %v6551_v11, %s6824_s17 }
0x1862   :  { %2831 = vrot.lane.b32.xlu1 %v7492_v26, %s6824_s17 }
0x186c   :  { %2827 = vrot.lane.b32.xlu0 %v6552_v40, %s6824_s17 }
0x18d6   :  { %v2024_v62 = vpop.xlane.xlu1 %2023 }
0x18d7   :  { %v2028_v63 = vmul.f32 0.03125, %v2024_v62 }
0x18d9   :  { %v2030_v27 = vadd.f32 1e-05, %v2028_v63 }
0x18da   :  { %v2732_v1 = vpop.xlane.xlu1 %2731 }
0x18db   :  { %v2736_v25 = vmul.f32 0.03125, %v2732_v1  ;;  %6689 = vrsqrt.f32 %v2030_v27 }
0x18dd   :  { %v2738_v8 = vadd.f32 1e-05, %v2736_v25 }
0x18de   :  { %v2826_v9 = vpop.permute.xlu1 %2825 }
0x18df   :  { %v2027_v10 = vpop.xlane.xlu0 %2026  ;;  %6150 = vmatpush3.bf16.msra.mxu1 %v2826_v9  ;;  %6691 = vrsqrt.f32 %v2738_v8 }
0x18e0   :  { %v2029_v12 = vmul.f32 0.03125, %v2027_v10  ;;  %6151 = vmatprep.subr.bf16.mxu1 %v6817_v0 }
0x18e2   :  { %v2031_v28 = vadd.f32 1e-05, %v2029_v12 }
0x18e3   :  { %v2735_v14 = vpop.xlane.xlu0 %2734 }
0x18e4   :  { %6693 = vrsqrt.f32 %v2031_v28  ;;  %v2737_v18 = vmul.f32 0.03125, %v2735_v14 }
0x18e5   :  { %v6690_v22 = vpop.eup %6689 }
0x18e6   :  { %v2739_v21 = vadd.f32 1e-05, %v2737_v18  ;;  %v2034_v30 = vmul.f32 %v6690_v22, %v2018_v42  ;;  %v2832_v42 = vpop.permute.xlu1 %2831 }
0x18e7   :  { %v2828_v20 = vpop.permute.xlu0 %2827 }
0x18e8   :  { %6695 = vrsqrt.f32 %v2739_v21  ;;  %6152 = vmatpush3.bf16.msra.mxu1 %v2828_v20  ;;  %v2040_v34 = vmul.f32 %v2039_v24, %v2034_v30 }
0x18e9   :  { %6163 = vmatprep.subr.bf16.mxu1 %v6817_v0  ;;  %v6692_v32 = vpop.eup %6691 }
0x18ea   :  { %v2742_v19 = vmul.f32 %v6692_v32, %v2726_v5  ;;  %v2046_v45 = vadd.f32 %v2045_v36, %v2040_v34 }
0x18ec   :  { %v2748_v43 = vmul.f32 %v2747_v35, %v2742_v19 }
0x18ee   :  { %v6694_v15 = vpop.eup %6693  ;;  %v7515_v40 = vadd.f32 %v2753_v38, %v2748_v43 }
0x18ef   :  { %v2035_v13 = vmul.f32 %v6694_v15, %v2019_v52 }
0x18f1   :  { %v2041_v37 = vmul.f32 %v2039_v24, %v2035_v13 }
0x18f2   :  { %v6696_v16 = vpop.eup %6695 }
0x18f3   :  { %v2743_v44 = vmul.f32 %v6696_v16, %v2727_v58  ;;  %v2047_v3 = vadd.f32 %v2045_v36, %v2041_v37 }
0x18f5   :  { %v2749_v4 = vmul.f32 %v2747_v35, %v2743_v44  ;;  %v7511_v11 = vpack.c.bf16 %v2047_v3, %v2046_v45 }
0x18f7   :  { %6154 = vmatmul.mubr.msk.bf16.vlgmr.msra.gmra.mrb[68].mxu1 %vm213_vm1, %v7511_v11  ;;  %v7517_v17 = vadd.f32 %v2753_v38, %v2749_v4 }
0x18f8   :  { %6165 = vmatprep.mubr.msk.bf16.mxu1 %vm6819_vm0, %v6817_v0 }
0x18f9   :  { %v2761_v46 = vpack.c.bf16 %v7517_v17, %v7515_v40 }
0x18fb   :  { %6146 = vmatmul.mubr.msk.bf16.vlgmr.msra.gmra.mrb[68].mxu0 %vm213_vm1, %v2761_v46 }
0x18fc   :  { %6159 = vmatprep.mubr.msk.bf16.mxu0 %vm6819_vm0, %v6817_v0 }
0x19ca   :  { %v2871_v47 = vpop.f32.mrb[68].mxu1 }
0x19cb   :  { %v6155_v48 = vpop.f32.mrb[69].mxu1  ;;  %v2872_v5 = vadd.f32 %v2871_v47, %v2832_v42 }
0x19cc   :  { %v2874_v49 = vpop.f32.mrb[70].mxu1 }
0x19cd   :  { %v2875_v2 = vadd.f32 %v2874_v49, %v2832_v42  ;;  %v6156_v50 = vpop.f32.mrb[71].mxu1 }
0x19ce   :  { %v2817_v51 = vpop.f32.mrb[68].mxu0 }
0x19cf   :  { %v7526_v6 = vpack.c.bf16 %v2875_v2, %v2872_v5  ;;  %v6147_v7 = vpop.f32.mrb[69].mxu0  ;;  %v2818_v54 = vadd.f32 %v7492_v26, %v2817_v51 }
0x19d0   :  { %v2820_v52 = vpop.f32.mrb[70].mxu0 }
0x19d1   :  { %v2821_v57 = vadd.f32 %v7492_v26, %v2820_v52  ;;  %v6148_v41 = vpop.f32.mrb[71].mxu0  ;;  %2889 = vrot.lane.b32.xlu0 %v7526_v6, %s6825_s18  ;;  %2887 = vrot.lane.b32.xlu1 %v7526_v6, %s6823_s16  ;;  %v2897_v58 = vsel %vm268_vm2, %v7526_v6, 0 }
0x19d2   :  { %6158 = vmatpush3.bf16.xpose.msra.mxu0 %v2897_v58 }
0x19d3   :  { %v2824_v61 = vpack.c.bf16 %v2821_v57, %v2818_v54  ;;  %6169 = vmatprep.subr.bf16.mxu0 %v6817_v0 }
0x19d5   :  { %2891 = vrot.lane.b32.xlu0 %v7526_v6, %s6822_s15  ;;  %2880 = vrot.lane.b32.xlu1 %v2824_v61, %s6823_s16 }
0x19d9   :  { %2884 = vrot.lane.b32.xlu0 %v2824_v61, %s6822_s15  ;;  %2882 = vrot.lane.b32.xlu1 %v2824_v61, %s6825_s18 }
0x19da   :  { %6160 = vmatmul.mubr.msk.bf16.vlgmr.msra.gmra.mrb[72].mxu0 %vm268_vm2, %v2824_v61 }
0x19db   :  { %6171 = vmatprep.mubr.msk.bf16.mxu0 %vm6819_vm0, %v6817_v0 }
0x1a43   :  { %v7545_v39 = vpop.permute.xlu0 %2889  ;;  %v7547_v55 = vpop.permute.xlu1 %2887 }
0x1a44   :  { %v2944_v26 = vsel %vm268_vm2, %v7547_v55, 0  ;;  %v2991_v62 = vsel %vm268_vm2, %v7545_v39, 0 }
0x1a45   :  { %6164 = vmatpush3.bf16.xpose.msra.mxu1 %v2944_v26  ;;  %6170 = vmatpush3.bf16.xpose.msra.mxu0 %v2991_v62 }
0x1a46   :  { %6175 = vmatprep.subr.bf16.mxu1 %v6817_v0  ;;  %6181 = vmatprep.subr.bf16.mxu0 %v6817_v0 }
0x1a47   :  { %v2881_v63 = vpop.permute.xlu1 %2880  ;;  %v7555_v27 = vpop.permute.xlu0 %2891 }
0x1a48   :  { %v3038_v25 = vsel %vm268_vm2, %v7555_v27, 0 }
0x1a4b   :  { %v2883_v1 = vpop.permute.xlu1 %2882  ;;  %v2885_v8 = vpop.permute.xlu0 %2884 }
0x1a4c   :  { %6166 = vmatmul.mubr.msk.bf16.vlgmr.msra.gmra.mrb[72].mxu1 %vm268_vm2, %v2881_v63  ;;  %6172 = vmatmul.mubr.msk.bf16.vlgmr.msra.gmra.mrb[76].mxu0 %vm268_vm2, %v2883_v1 }
0x1a4d   :  { %6176 = vmatpush3.bf16.xpose.msra.mxu1 %v3038_v25  ;;  %6177 = vmatprep.mubr.msk.bf16.mxu1 %vm6819_vm0, %v6817_v0 }
0x1a4e   :  { %6187 = vmatprep.subr.bf16.mxu1 %v6817_v0  ;;  %6183 = vmatprep.mubr.msk.bf16.mxu0 %vm6819_vm0, %v6817_v0 }
0x1a54   :  { %6178 = vmatmul.mubr.msk.bf16.vlgmr.msra.gmra.mrb[76].mxu1 %vm268_vm2, %v2885_v8 }
0x1a55   :  { %6189 = vmatprep.mubr.msk.bf16.mxu1 %vm6819_vm0, %v6817_v0 }
0x1aad   :  { %v2933_v9 = vpop.f32.mrb[72].mxu0 }
0x1aae   :  { %v3081_v10 = vmul.f32 0.35355338, %v2933_v9  ;;  %v6161_v12 = vpop.f32.mrb[73].mxu0 }
0x1aaf   :  { %v2936_v28 = vpop.f32.mrb[74].mxu0 }
0x1ab0   :  { %v3089_v14 = vadd.f32 %v3081_v10, %v6957_v29  ;;  %v3082_v18 = vmul.f32 0.35355338, %v2936_v28  ;;  %v6162_v21 = vpop.f32.mrb[75].mxu0 }
0x1ab2   :  { %v3090_v20 = vadd.f32 %v3082_v18, %v6962_v31  ;;  %v3097_v22 = vsel %vm479_vm7, %v3089_v14, -inf }
0x1ab3   :  { %3098 = vmax.xlane.f32.xlu1 %v3097_v22 }
0x1ab4   :  { %v3100_v23 = vsel %vm479_vm7, %v3090_v20, -inf }
0x1ab5   :  { %3101 = vmax.xlane.f32.xlu0 %v3100_v23 }
0x1b1f   :  { %v2980_v24 = vpop.f32.mrb[72].mxu1  ;;  %v3027_v30 = vpop.f32.mrb[76].mxu0 }
0x1b20   :  { %v3083_v32 = vmul.f32 0.35355338, %v2980_v24  ;;  %v3085_v33 = vmul.f32 0.35355338, %v3027_v30  ;;  %v6167_v15 = vpop.f32.mrb[73].mxu1  ;;  %v6173_v36 = vpop.f32.mrb[77].mxu0 }
0x1b21   :  { %v2983_v34 = vpop.f32.mrb[74].mxu1  ;;  %v3030_v35 = vpop.f32.mrb[78].mxu0 }
0x1b22   :  { %v3091_v19 = vadd.f32 %v3083_v32, %v6957_v29  ;;  %v3084_v13 = vmul.f32 0.35355338, %v2983_v34  ;;  %v3086_v37 = vmul.f32 0.35355338, %v3030_v35  ;;  %v6168_v16 = vpop.f32.mrb[75].mxu1  ;;  %v6174_v38 = vpop.f32.mrb[79].mxu0  ;;  %v3093_v43 = vadd.f32 %v3085_v33, %v6957_v29 }
0x1b24   :  { %v3092_v44 = vadd.f32 %v3084_v13, %v6962_v31  ;;  %v3103_v45 = vsel %vm479_vm7, %v3091_v19, -inf  ;;  %v3094_v3 = vadd.f32 %v3086_v37, %v6962_v31  ;;  %v3109_v48 = vsel %vm479_vm7, %v3093_v43, -inf }
0x1b25   :  { %3104 = vmax.xlane.f32.xlu0 %v3103_v45 }
0x1b26   :  { %v3106_v4 = vsel %vm479_vm7, %v3092_v44, -inf  ;;  %v3112_v51 = vsel %vm479_vm7, %v3094_v3, -inf }
0x1b27   :  { %3107 = vmax.xlane.f32.xlu1 %v3106_v4  ;;  %v3074_v46 = vpop.f32.mrb[76].mxu1 }
0x1b28   :  { %v3087_v42 = vmul.f32 0.35355338, %v3074_v46  ;;  %v6179_v47 = vpop.f32.mrb[77].mxu1 }
0x1b29   :  { %3110 = vmax.xlane.f32.xlu0 %v3109_v48  ;;  %v3077_v49 = vpop.f32.mrb[78].mxu1 }
0x1b2a   :  { %v3095_v5 = vadd.f32 %v3087_v42, %v6957_v29  ;;  %v3088_v2 = vmul.f32 0.35355338, %v3077_v49  ;;  %v6180_v50 = vpop.f32.mrb[79].mxu1 }
0x1b2b   :  { %3113 = vmax.xlane.f32.xlu1 %v3112_v51 }
0x1b2c   :  { %v3096_v7 = vadd.f32 %v3088_v2, %v6962_v31  ;;  %v3115_v52 = vsel %vm479_vm7, %v3095_v5, -inf }
0x1b2d   :  { %3116 = vmax.xlane.f32.xlu0 %v3115_v52 }
0x1b2e   :  { %v3118_v54 = vsel %vm479_vm7, %v3096_v7, -inf }
0x1b2f   :  { %3119 = vmax.xlane.f32.xlu1 %v3118_v54 }
0x1b40   :  { %3236 = vrot.lane.b32.xlu1 %v7547_v55, %s6824_s17  ;;  %v3099_v57 = vpop.xlane.xlu1 %3098 }
0x1b41   :  { %v3121_v58 = vsub.f32 %v3089_v14, %v3099_v57 }
0x1b42   :  { %v3102_v41 = vpop.xlane.xlu0 %3101 }
0x1b43   :  { %3189 = vrot.lane.b32.xlu0 %v7526_v6, %s6824_s17  ;;  %v3122_v61 = vsub.f32 %v3090_v20, %v3102_v41  ;;  %v3129_v26 = vmul.f32 1.442695, %v3121_v58 }
0x1b45   :  { %v3131_v62 = vmul.f32 1.442695, %v3122_v61  ;;  %6697 = vpow2.f32 %v3129_v26 }
0x1b47   :  { %6699 = vpow2.f32 %v3131_v62 }
0x1b4f   :  { %v6698_v63 = vpop.eup %6697 }
0x1b50   :  { %v3145_v25 = vsel %vm479_vm7, %v6698_v63, 0.0 }
0x1b51   :  { %v6700_v1 = vpop.eup %6699 }
0x1b52   :  { %v3148_v8 = vsel %vm479_vm7, %v6700_v1, 0.0 }
0x1b62   :  { %3146 = vadd.xlane.f32.xlu0 %v3145_v25 }
0x1b64   :  { %3149 = vadd.xlane.f32.xlu1 %v3148_v8 }
0x1bb2   :  { %v3105_v55 = vpop.xlane.xlu0 %3104 }
0x1bb3   :  { %v3123_v9 = vsub.f32 %v3091_v19, %v3105_v55 }
0x1bb4   :  { %v3108_v10 = vpop.xlane.xlu1 %3107 }
0x1bb5   :  { %v3133_v6 = vmul.f32 1.442695, %v3123_v9  ;;  %v3124_v12 = vsub.f32 %v3092_v44, %v3108_v10 }
0x1bb6   :  { %v3111_v28 = vpop.xlane.xlu0 %3110 }
0x1bb7   :  { %6701 = vpow2.f32 %v3133_v6  ;;  %v3135_v14 = vmul.f32 1.442695, %v3124_v12  ;;  %v3125_v18 = vsub.f32 %v3093_v43, %v3111_v28 }
0x1bb8   :  { %v3114_v21 = vpop.xlane.xlu1 %3113 }
0x1bb9   :  { %6703 = vpow2.f32 %v3135_v14  ;;  %v3137_v20 = vmul.f32 1.442695, %v3125_v18  ;;  %v3126_v22 = vsub.f32 %v3094_v3, %v3114_v21 }
0x1bba   :  { %v3117_v23 = vpop.xlane.xlu0 %3116 }
0x1bbb   :  { %6705 = vpow2.f32 %v3137_v20  ;;  %v3139_v24 = vmul.f32 1.442695, %v3126_v22  ;;  %v3127_v30 = vsub.f32 %v3095_v5, %v3117_v23 }
0x1bbc   :  { %v3120_v32 = vpop.xlane.xlu1 %3119 }
0x1bbd   :  { %6707 = vpow2.f32 %v3139_v24  ;;  %v3141_v33 = vmul.f32 1.442695, %v3127_v30  ;;  %v3128_v15 = vsub.f32 %v3096_v7, %v3120_v32  ;;  %v6553_v24 = vld [vmem:[%s7620_s24] sm:$0xff]  }
0x1bbe   :  { %v3190_v36 = vpop.permute.xlu0 %3189 }
0x1bbf   :  { %6709 = vpow2.f32 %v3141_v33  ;;  %v3143_v34 = vmul.f32 1.442695, %v3128_v15  ;;  %6182 = vmatpush3.bf16.msra.mxu0 %v3190_v36  ;;  %v6554_v33 = vld [vmem:[%s7620_s24 + $0x8] sm:$0xff]  }
0x1bc0   :  { %v3237_v35 = vpop.permute.xlu1 %3236  ;;  %6193 = vmatprep.subr.bf16.mxu0 %v6817_v0 }
0x1bc1   :  { %v6702_v19 = vpop.eup %6701  ;;  %6711 = vpow2.f32 %v3143_v34  ;;  %6188 = vmatpush3.bf16.msra.mxu1 %v3237_v35 }
0x1bc2   :  { %v3151_v13 = vsel %vm479_vm7, %v6702_v19, 0.0  ;;  %6199 = vmatprep.subr.bf16.mxu1 %v6817_v0 }
0x1bc3   :  { %v6704_v37 = vpop.eup %6703  ;;  %3152 = vadd.xlane.f32.xlu0 %v3151_v13 }
0x1bc4   :  { %v3154_v16 = vsel %vm479_vm7, %v6704_v37, 0.0 }
0x1bc5   :  { %v6706_v38 = vpop.eup %6705  ;;  %3155 = vadd.xlane.f32.xlu1 %v3154_v16 }
0x1bc6   :  { %v3157_v43 = vsel %vm479_vm7, %v6706_v38, 0.0 }
0x1bc7   :  { %v6708_v44 = vpop.eup %6707  ;;  %3158 = vadd.xlane.f32.xlu0 %v3157_v43 }
0x1bc8   :  { %v3160_v45 = vsel %vm479_vm7, %v6708_v44, 0.0 }
0x1bc9   :  { %v6710_v3 = vpop.eup %6709  ;;  %3161 = vadd.xlane.f32.xlu1 %v3160_v45 }
0x1bca   :  { %v3163_v4 = vsel %vm479_vm7, %v6710_v3, 0.0 }
0x1bcb   :  { %v6712_v46 = vpop.eup %6711  ;;  %3164 = vadd.xlane.f32.xlu0 %v3163_v4 }
0x1bcc   :  { %v3166_v42 = vsel %vm479_vm7, %v6712_v46, 0.0 }
0x1bcd   :  { %3167 = vadd.xlane.f32.xlu1 %v3166_v42 }
0x1bde   :  { %3283 = vrot.lane.b32.xlu1 %v7545_v39, %s6824_s17 }
0x1be1   :  { %3330 = vrot.lane.b32.xlu0 %v7555_v27, %s6824_s17 }
0x1bef   :  { %v3147_v47 = vpop.xlane.xlu0 %3146 }
0x1bf0   :  { %6713 = vrcp.f32 %v3147_v47 }
0x1bf1   :  { %v3150_v48 = vpop.xlane.xlu1 %3149 }
0x1bf2   :  { %6715 = vrcp.f32 %v3150_v48 }
0x1bfa   :  { %v6714_v49 = vpop.eup %6713 }
0x1bfb   :  { %v3177_v2 = vmul.f32 %v6714_v49, %v6698_v63 }
0x1bfc   :  { %v6716_v5 = vpop.eup %6715 }
0x1bfd   :  { %v3178_v50 = vmul.f32 %v6716_v5, %v6700_v1 }
0x1bff   :  { %v3185_v51 = vpack.c.bf16 %v3178_v50, %v3177_v2 }
0x1c01   :  { %6184 = vmatmul.mubr.msk.bf16.vlgmr.msra.gmra.mrb[80].mxu0 %vm479_vm7, %v3185_v51 }
0x1c02   :  { %6195 = vmatprep.mubr.msk.bf16.mxu0 %vm6819_vm0, %v6817_v0 }
0x1c50   :  { %v3153_v7 = vpop.xlane.xlu0 %3152 }
0x1c51   :  { %6717 = vrcp.f32 %v3153_v7 }
0x1c52   :  { %v3156_v39 = vpop.xlane.xlu1 %3155 }
0x1c53   :  { %6719 = vrcp.f32 %v3156_v39 }
0x1c54   :  { %v3159_v52 = vpop.xlane.xlu0 %3158 }
0x1c55   :  { %6721 = vrcp.f32 %v3159_v52 }
0x1c56   :  { %v3162_v27 = vpop.xlane.xlu1 %3161 }
0x1c57   :  { %6723 = vrcp.f32 %v3162_v27 }
0x1c58   :  { %v3165_v54 = vpop.xlane.xlu0 %3164 }
0x1c59   :  { %6725 = vrcp.f32 %v3165_v54 }
0x1c5a   :  { %v3168_v57 = vpop.xlane.xlu1 %3167 }
0x1c5b   :  { %v6718_v41 = vpop.eup %6717  ;;  %6727 = vrcp.f32 %v3168_v57 }
0x1c5c   :  { %v3179_v61 = vmul.f32 %v6718_v41, %v6702_v19  ;;  %v3331_v9 = vpop.permute.xlu0 %3330  ;;  %v5638_v41 = vld [vmem:[%s7641_s29] ss:$0 sm:$0xff] }
0x1c5d   :  { %v6720_v58 = vpop.eup %6719 }
0x1c5e   :  { %v3180_v26 = vmul.f32 %v6720_v58, %v6704_v37  ;;  %v3284_v62 = vpop.permute.xlu1 %3283 }
0x1c5f   :  { %v6722_v63 = vpop.eup %6721  ;;  %6194 = vmatpush3.bf16.msra.mxu0 %v3284_v62 }
0x1c60   :  { %v3186_v1 = vpack.c.bf16 %v3180_v26, %v3179_v61  ;;  %6205 = vmatprep.subr.bf16.mxu0 %v6817_v0  ;;  %v3181_v8 = vmul.f32 %v6722_v63, %v6706_v38 }
0x1c61   :  { %v6724_v25 = vpop.eup %6723 }
0x1c62   :  { %v3182_v55 = vmul.f32 %v6724_v25, %v6708_v44  ;;  %6190 = vmatmul.mubr.msk.bf16.vlgmr.msra.gmra.mrb[80].mxu1 %vm479_vm7, %v3186_v1 }
0x1c63   :  { %v6726_v10 = vpop.eup %6725  ;;  %6200 = vmatpush3.bf16.msra.mxu1 %v3331_v9  ;;  %6201 = vmatprep.mubr.msk.bf16.mxu1 %vm6819_vm0, %v6817_v0 }
0x1c64   :  { %v3187_v6 = vpack.c.bf16 %v3182_v55, %v3181_v8  ;;  %6213 = vmatprep.subr.bf16.mxu1 %v6817_v0  ;;  %v3183_v28 = vmul.f32 %v6726_v10, %v6710_v3 }
0x1c65   :  { %v6728_v12 = vpop.eup %6727 }
0x1c66   :  { %v3184_v14 = vmul.f32 %v6728_v12, %v6712_v46  ;;  %6196 = vmatmul.mubr.msk.bf16.vlgmr.msra.gmra.mrb[84].mxu0 %vm479_vm7, %v3187_v6 }
0x1c67   :  { %6209 = vmatprep.mubr.msk.bf16.mxu0 %vm6819_vm0, %v6817_v0  ;;  %6206 = vmatpush3.bf16.msra.mxu0 %v6553_v24  ;;  %v6557_v24 = vld [vmem:[%s7028_s30] sm:$0xff]  }
0x1c68   :  { %v3188_v18 = vpack.c.bf16 %v3184_v14, %v3183_v28  ;;  %6207 = vmatprep.subr.bf16.mxu0 %v6817_v0 }
0x1c6a   :  { %6202 = vmatmul.mubr.msk.bf16.vlgmr.msra.gmra.mrb[84].mxu1 %vm479_vm7, %v3188_v18 }
0x1c6b   :  { %6217 = vmatprep.mubr.msk.bf16.mxu1 %vm6819_vm0, %v6817_v0  ;;  %6208 = vmatpush3.bf16.msra.mxu0 %v6554_v33 }
0x1c6c   :  { %6221 = vmatprep.subr.bf16.mxu0 %v6817_v0 }
0x1cd4   :  { %v3229_v21 = vpop.f32.mrb[80].mxu0 }
0x1cd5   :  { %v6185_v20 = vpop.f32.mrb[81].mxu0 }
0x1cd6   :  { %v3232_v22 = vpop.f32.mrb[82].mxu0 }
0x1cd7   :  { %v6186_v23 = vpop.f32.mrb[83].mxu0 }
0x1cd8   :  { %v6556_v23 = vld [vmem:[%s7653_s7 + $0x8] sm:$0xff]  }
0x1d35   :  { %v3276_v30 = vpop.f32.mrb[80].mxu1 }
0x1d36   :  { %v6191_v32 = vpop.f32.mrb[81].mxu1 }
0x1d37   :  { %v3279_v15 = vpop.f32.mrb[82].mxu1 }
0x1d38   :  { %v6482_v36 = vpack.i.bf16 %v3279_v15, %v3276_v30  ;;  %v6192_v34 = vpop.f32.mrb[83].mxu1  ;;  %v6558_v30 = vld [vmem:[%s7028_s30 + $0x8] sm:$0xff]  }
0x1d39   :  { %v3323_v35 = vpop.f32.mrb[84].mxu0 }
0x1d3a   :  { %v6197_v19 = vpop.f32.mrb[85].mxu0  ;;  %6483 = vrot.lane.b32.xlu1 %v6482_v36, %s6831_s5 }
0x1d3b   :  { %v3326_v13 = vpop.f32.mrb[86].mxu0  ;;  %v3477_v19 = vld [vmem:[%s7666_s20] sm:$0x3] }
0x1d3c   :  { %v6487_v37 = vpack.i.bf16 %v3326_v13, %v3323_v35  ;;  %v6198_v16 = vpop.f32.mrb[87].mxu0 }
0x1d3d   :  { %v3370_v38 = vpop.f32.mrb[84].mxu1 }
0x1d3e   :  { %6488 = vrot.lane.b32.xlu0 %v6487_v37, %s6828_s23  ;;  %v6203_v43 = vpop.f32.mrb[85].mxu1  ;;  %v3507_v37 = vrot.slane %v3477_v19, %v7090_v56 }
0x1d3f   :  { %v3373_v44 = vpop.f32.mrb[86].mxu1 }
0x1d40   :  { %v6492_v45 = vpack.i.bf16 %v3373_v44, %v3370_v38  ;;  %v6204_v3 = vpop.f32.mrb[87].mxu1 }
0x1d42   :  { %6493 = vrot.lane.b32.xlu1 %v6492_v45, %s6829_s27  ;;  %v3513_v45 = vrot.slane %v3477_v19, %v7094_v59 }
0x1dac   :  { %v6484_v4 = vpop.permute.xlu1 %6483 }
0x1dad   :  { %v6486_v42 = vunpack.i.h.bf16 %v6484_v4  ;;  %v6485_v47 = vunpack.i.l.bf16 %v6484_v4 }
0x1daf   :  { %v3402_v2 = vsel %vm268_vm2, %v3232_v22, %v6486_v42  ;;  %v3401_v50 = vsel %vm268_vm2, %v3229_v21, %v6485_v47  ;;  %v6555_v22 = vld [vmem:[%s7653_s7] sm:$0xff]   ;;  %v6559_v47 = vld [vmem:[%s7028_s30 + $0x10] sm:$0xff]  }
0x1db0   :  { %v6489_v46 = vpop.permute.xlu0 %6488  ;;  %6214 = vmatpush3.bf16.msra.mxu1 %v6555_v22  ;;  %v6562_v22 = vld [vmem:[%s7269_s10 + $0x18] sm:$0xff]  }
0x1db1   :  { %v6491_v48 = vunpack.i.h.bf16 %v6489_v46  ;;  %v6490_v49 = vunpack.i.l.bf16 %v6489_v46  ;;  %6215 = vmatprep.subr.bf16.mxu1 %v6817_v0 }
0x1db3   :  { %v3403_v39 = vsel %vm479_vm7, %v3401_v50, %v6490_v49  ;;  %v3404_v52 = vsel %vm479_vm7, %v3402_v2, %v6491_v48  ;;  %v6560_v48 = vld [vmem:[%s7028_s30 + $0x18] sm:$0xff]   ;;  %v5642_v49 = vld [vmem:[%s7681_s4] ss:$0 sm:$0xff] }
0x1db4   :  { %v6494_v5 = vpop.permute.xlu1 %6493  ;;  %6216 = vmatpush3.bf16.msra.mxu1 %v6556_v23 }
0x1db5   :  { %v6496_v51 = vunpack.i.h.bf16 %v6494_v5  ;;  %v6495_v7 = vunpack.i.l.bf16 %v6494_v5  ;;  %6233 = vmatprep.subr.bf16.mxu1 %v6817_v0 }
0x1db7   :  { %v3406_v27 = vsel %vm788_vm8, %v3404_v52, %v6496_v51  ;;  %v3405_v54 = vsel %vm788_vm8, %v3403_v39, %v6495_v7 }
0x1db8   :  { %v3411_v57 = vpack.c.bf16 %v3406_v27, %v3405_v54 }
0x1dba   :  { %6210 = vmatmul.mubr.msk.bf16.vlgmr.msra.gmra.mrb[88].mxu0 %vm213_vm1, %v3411_v57  ;;  %v5646_v57 = vld [vmem:[%s7690_s9] ss:$0 sm:$0xff] }
0x1dbb   :  { %6229 = vmatprep.mubr.msk.bf16.mxu0 %vm6819_vm0, %v6817_v0  ;;  %6222 = vmatpush3.bf16.msra.mxu0 %v6557_v24 }
0x1dbc   :  { %6223 = vmatprep.subr.bf16.mxu0 %v6817_v0 }
0x1dbf   :  { %6224 = vmatpush3.bf16.msra.mxu0 %v6558_v30 }
0x1dc0   :  { %6225 = vmatprep.subr.bf16.mxu0 %v6817_v0 }
0x1dc3   :  { %6226 = vmatpush3.bf16.msra.mxu0 %v6559_v47 }
0x1dc4   :  { %6227 = vmatprep.subr.bf16.mxu0 %v6817_v0 }
0x1dc7   :  { %6228 = vmatpush3.bf16.msra.mxu0 %v6560_v48 }
0x1dc8   :  { %6247 = vmatprep.subr.bf16.mxu0 %v6817_v0 }
0x1e8d   :  { %v3468_v58 = vpop.f32.mrb[88].mxu0 }
0x1e8e   :  { %v3469_v61 = vadd.f32 %v5638_v41, %v3468_v58  ;;  %v6211_v26 = vpop.f32.mrb[89].mxu0 }
0x1e8f   :  { %v3471_v62 = vpop.f32.mrb[90].mxu0 }
0x1e90   :  { %v3475_v63 = vadd.f32 %v3469_v61, %v7515_v40  ;;  %v3472_v1 = vadd.f32 %v5638_v41, %v3471_v62  ;;  %v6212_v25 = vpop.f32.mrb[91].mxu0 }
0x1e92   :  { %v3476_v8 = vadd.f32 %v3472_v1, %v7517_v17  ;;  %v3478_v55 = vsel %vm213_vm1, %v3475_v63, 0.0 }
0x1e93   :  { %3479 = vadd.xlane.f32.xlu0 %v3478_v55 }
0x1e94   :  { %v3481_v9 = vsel %vm213_vm1, %v3476_v8, 0.0 }
0x1e95   :  { %3482 = vadd.xlane.f32.xlu1 %v3481_v9 }
0x1f20   :  { %v3480_v10 = vpop.xlane.xlu0 %3479 }
0x1f21   :  { %v3484_v6 = vmul.f32 0.03125, %v3480_v10 }
0x1f22   :  { %v3483_v12 = vpop.xlane.xlu1 %3482 }
0x1f23   :  { %v3486_v28 = vsub.f32 %v3475_v63, %v3484_v6  ;;  %v3485_v14 = vmul.f32 0.03125, %v3483_v12 }
0x1f25   :  { %v3487_v18 = vsub.f32 %v3476_v8, %v3485_v14  ;;  %v3488_v21 = vmul.f32 %v3486_v28, %v3486_v28 }
0x1f27   :  { %v3490_v40 = vsel %vm213_vm1, %v3488_v21, 0.0  ;;  %v3489_v20 = vmul.f32 %v3487_v18, %v3487_v18 }
0x1f28   :  { %3491 = vadd.xlane.f32.xlu0 %v3490_v40 }
0x1f29   :  { %v3493_v17 = vsel %vm213_vm1, %v3489_v20, 0.0 }
0x1f2c   :  { %3494 = vadd.xlane.f32.xlu0 %v3493_v17  ;;  %v6561_v17 = vld [vmem:[%s7269_s10 + $0x10] sm:$0xff]  }
0x1fb5   :  { %v3492_v32 = vpop.xlane.xlu0 %3491 }
0x1fb6   :  { %v3496_v33 = vmul.f32 0.03125, %v3492_v32 }
0x1fb8   :  { %v3498_v15 = vadd.f32 1e-05, %v3496_v33 }
0x1fb9   :  { %v3495_v36 = vpop.xlane.xlu0 %3494 }
0x1fba   :  { %6729 = vrsqrt.f32 %v3498_v15  ;;  %v3497_v34 = vmul.f32 0.03125, %v3495_v36  ;;  %v3672_v36 = vld [vmem:[%s7704_s6] sm:$0x3] }
0x1fbc   :  { %v3499_v35 = vadd.f32 1e-05, %v3497_v34  ;;  %v3702_v34 = vrot.slane %v3672_v36, %v7090_v56 }
0x1fbe   :  { %6731 = vrsqrt.f32 %v3499_v35 }
0x1fc4   :  { %v6730_v13 = vpop.eup %6729 }
0x1fc5   :  { %v3502_v16 = vmul.f32 %v6730_v13, %v3486_v28 }
0x1fc7   :  { %v3508_v43 = vmul.f32 %v3507_v37, %v3502_v16 }
0x1fc8   :  { %v6732_v38 = vpop.eup %6731 }
0x1fc9   :  { %v3503_v44 = vmul.f32 %v6732_v38, %v3487_v18  ;;  %v3514_v4 = vadd.f32 %v3513_v45, %v3508_v43  ;;  %v3708_v38 = vrot.slane %v3672_v36, %v7094_v59 }
0x1fcb   :  { %v3509_v3 = vmul.f32 %v3507_v37, %v3503_v44 }
0x1fcd   :  { %v3515_v46 = vadd.f32 %v3513_v45, %v3509_v3 }
0x1fcf   :  { %v3520_v42 = vpack.c.bf16 %v3515_v46, %v3514_v4 }
0x1fd1   :  { %6218 = vmatmul.mubr.msk.bf16.vlgmr.msra.gmra.mrb[88].mxu1 %vm213_vm1, %v3520_v42 }
0x1fd2   :  { %6237 = vmatprep.mubr.msk.bf16.mxu1 %vm6819_vm0, %v6817_v0  ;;  %6234 = vmatpush3.bf16.msra.mxu1 %v6561_v17 }
0x1fd3   :  { %6235 = vmatprep.subr.bf16.mxu1 %v6817_v0 }
0x1fd6   :  { %6236 = vmatpush3.bf16.msra.mxu1 %v6562_v22 }
0x1fd7   :  { %6241 = vmatprep.subr.bf16.mxu1 %v6817_v0 }
0x20a4   :  { %v3577_v5 = vpop.f32.mrb[88].mxu1 }
0x20a5   :  { %v3578_v2 = vadd.f32 %v5642_v49, %v3577_v5  ;;  %v6219_v50 = vpop.f32.mrb[89].mxu1 }
0x20a6   :  { %v3580_v51 = vpop.f32.mrb[90].mxu1 }
0x20a7   :  { %v3581_v7 = vadd.f32 %v5642_v49, %v3580_v51  ;;  %v6220_v39 = vpop.f32.mrb[91].mxu1  ;;  %v3584_v52 = vmax.f32 %v3578_v2, 0.0 }
0x20a9   :  { %v3585_v27 = vmax.f32 %v3581_v7, 0.0 }
0x20ab   :  { %v3586_v54 = vpack.c.bf16 %v3585_v27, %v3584_v52 }
0x20ad   :  { %6230 = vmatmul.mubr.msk.bf16.vlgmr.msra.gmra.mrb[92].mxu0 %vm1011_vm9, %v3586_v54 }
0x20ae   :  { %6249 = vmatprep.mubr.msk.bf16.mxu0 %vm6819_vm0, %v6817_v0 }
0x2180   :  { %v3663_v41 = vpop.f32.mrb[92].mxu0 }
0x2181   :  { %v3664_v58 = vadd.f32 %v5646_v57, %v3663_v41  ;;  %v6231_v61 = vpop.f32.mrb[93].mxu0 }
0x2182   :  { %v3666_v26 = vpop.f32.mrb[94].mxu0 }
0x2183   :  { %v3670_v62 = vadd.f32 %v3664_v58, %v3514_v4  ;;  %v3667_v63 = vadd.f32 %v5646_v57, %v3666_v26  ;;  %v6232_v1 = vpop.f32.mrb[95].mxu0  ;;  %v5657_v4 = vld [vmem:[%s7313_s11 + $0x1] ss:$0 sm:$0xff] }
0x2185   :  { %v3671_v25 = vadd.f32 %v3667_v63, %v3515_v46  ;;  %v3673_v8 = vsel %vm213_vm1, %v3670_v62, 0.0 }
0x2186   :  { %3674 = vadd.xlane.f32.xlu1 %v3673_v8 }
0x2187   :  { %v3676_v55 = vsel %vm213_vm1, %v3671_v25, 0.0 }
0x2188   :  { %3677 = vadd.xlane.f32.xlu0 %v3676_v55 }
0x2213   :  { %v3675_v9 = vpop.xlane.xlu1 %3674 }
0x2214   :  { %v3679_v10 = vmul.f32 0.03125, %v3675_v9 }
0x2215   :  { %v3678_v6 = vpop.xlane.xlu0 %3677 }
0x2216   :  { %v3681_v12 = vsub.f32 %v3670_v62, %v3679_v10  ;;  %v3680_v28 = vmul.f32 0.03125, %v3678_v6 }
0x2218   :  { %v3682_v14 = vsub.f32 %v3671_v25, %v3680_v28  ;;  %v3683_v18 = vmul.f32 %v3681_v12, %v3681_v12 }
0x221a   :  { %v3685_v21 = vsel %vm213_vm1, %v3683_v18, 0.0  ;;  %v3684_v40 = vmul.f32 %v3682_v14, %v3682_v14 }
0x221b   :  { %3686 = vadd.xlane.f32.xlu1 %v3685_v21 }
0x221c   :  { %v3688_v20 = vsel %vm213_vm1, %v3684_v40, 0.0 }
0x221d   :  { %3689 = vadd.xlane.f32.xlu0 %v3688_v20 }
0x22a8   :  { %v3687_v23 = vpop.xlane.xlu1 %3686 }
0x22a9   :  { %v3691_v24 = vmul.f32 0.03125, %v3687_v23 }
0x22aa   :  { %v3690_v30 = vpop.xlane.xlu0 %3689 }
0x22ab   :  { %v3693_v32 = vadd.f32 1e-05, %v3691_v24  ;;  %v3692_v33 = vmul.f32 0.03125, %v3690_v30 }
0x22ad   :  { %6733 = vrsqrt.f32 %v3693_v32  ;;  %v3694_v15 = vadd.f32 1e-05, %v3692_v33 }
0x22af   :  { %6735 = vrsqrt.f32 %v3694_v15 }
0x22b7   :  { %v6734_v35 = vpop.eup %6733 }
0x22b8   :  { %v3697_v19 = vmul.f32 %v6734_v35, %v3681_v12 }
0x22b9   :  { %v6736_v13 = vpop.eup %6735 }
0x22ba   :  { %v3703_v37 = vmul.f32 %v3702_v34, %v3697_v19  ;;  %v3698_v16 = vmul.f32 %v6736_v13, %v3682_v14 }
0x22bc   :  { %v3704_v43 = vmul.f32 %v3702_v34, %v3698_v16  ;;  %v7709_v44 = vadd.f32 %v3708_v38, %v3703_v37 }
0x22be   :  { %v7711_v45 = vadd.f32 %v3708_v38, %v3704_v43 }
0x22c0   :  { %v3716_v3 = vpack.c.bf16 %v7711_v45, %v7709_v44 }
0x22c2   :  { %6238 = vmatmul.mubr.msk.bf16.vlgmr.msra.gmra.mrb[92].mxu1 %vm213_vm1, %v3716_v3 }
0x22c3   :  { %6243 = vmatprep.mubr.msk.bf16.mxu1 %vm6819_vm0, %v6817_v0 }
0x2395   :  { %v3774_v46 = vpop.f32.mrb[92].mxu1 }
0x2396   :  { %v6239_v42 = vpop.f32.mrb[93].mxu1  ;;  %v3775_v48 = vadd.f32 %v5657_v4, %v3774_v46 }
0x2397   :  { %v3777_v47 = vpop.f32.mrb[94].mxu1 }
0x2398   :  { %v3778_v49 = vadd.f32 %v5657_v4, %v3777_v47  ;;  %v6240_v5 = vpop.f32.mrb[95].mxu1 }
0x239a   :  { %v7719_v2 = vpack.c.bf16 %v3778_v49, %v3775_v48 }
0x239c   :  { %3785 = vrot.lane.b32.xlu0 %v7719_v2, %s6825_s18  ;;  %3783 = vrot.lane.b32.xlu1 %v7719_v2, %s6823_s16 }
0x23a0   :  { %3787 = vrot.lane.b32.xlu1 %v7719_v2, %s6822_s15 }
0x23a4   :  { %3789 = vrot.lane.b32.xlu1 %v7719_v2, %s6824_s17 }
0x240e   :  { %v7729_v50 = vpop.permute.xlu0 %3785  ;;  %v7731_v51 = vpop.permute.xlu1 %3783 }
0x240f   :  { %3887 = vrot.lane.b32.xlu1 %v7729_v50, %s6824_s17  ;;  %3838 = vrot.lane.b32.xlu0 %v7731_v51, %s6824_s17 }
0x2412   :  { %v7737_v7 = vpop.permute.xlu1 %3787 }
0x2413   :  { %3936 = vrot.lane.b32.xlu0 %v7737_v7, %s6824_s17 }
0x2416   :  { %v3790_v39 = vpop.permute.xlu1 %3789 }
0x2417   :  { %v3795_v52 = vsel %vm268_vm2, %v3790_v39, 0 }
0x2418   :  { %6242 = vmatpush3.bf16.xpose.msra.mxu1 %v3795_v52 }
0x2419   :  { %6253 = vmatprep.subr.bf16.mxu1 %v6817_v0 }
0x241f   :  { %6244 = vmatmul.mubr.msk.bf16.vlgmr.msra.gmra.mrb[96].mxu1 %vm268_vm2, %v7719_v2 }
0x2420   :  { %6255 = vmatprep.mubr.msk.bf16.mxu1 %vm6819_vm0, %v6817_v0 }
0x2481   :  { %v3839_v27 = vpop.permute.xlu0 %3838  ;;  %v3888_v54 = vpop.permute.xlu1 %3887 }
0x2482   :  { %v3844_v57 = vsel %vm268_vm2, %v3839_v27, 0  ;;  %v3893_v41 = vsel %vm268_vm2, %v3888_v54, 0 }
0x2483   :  { %6248 = vmatpush3.bf16.xpose.msra.mxu0 %v3844_v57  ;;  %6254 = vmatpush3.bf16.xpose.msra.mxu1 %v3893_v41 }
0x2484   :  { %6259 = vmatprep.subr.bf16.mxu0 %v6817_v0  ;;  %6265 = vmatprep.subr.bf16.mxu1 %v6817_v0 }
0x2485   :  { %v3937_v58 = vpop.permute.xlu0 %3936 }
0x2486   :  { %v3942_v61 = vsel %vm268_vm2, %v3937_v58, 0 }
0x248a   :  { %6250 = vmatmul.mubr.msk.bf16.vlgmr.msra.gmra.mrb[96].mxu0 %vm268_vm2, %v7731_v51  ;;  %6256 = vmatmul.mubr.msk.bf16.vlgmr.msra.gmra.mrb[100].mxu1 %vm268_vm2, %v7729_v50 }
0x248b   :  { %6260 = vmatpush3.bf16.xpose.msra.mxu0 %v3942_v61  ;;  %6261 = vmatprep.mubr.msk.bf16.mxu0 %vm6819_vm0, %v6817_v0 }
0x248c   :  { %6271 = vmatprep.subr.bf16.mxu0 %v6817_v0  ;;  %6267 = vmatprep.mubr.msk.bf16.mxu1 %vm6819_vm0, %v6817_v0 }
0x2492   :  { %6262 = vmatmul.mubr.msk.bf16.vlgmr.msra.gmra.mrb[100].mxu0 %vm268_vm2, %v7737_v7 }
0x2493   :  { %6273 = vmatprep.mubr.msk.bf16.mxu0 %vm6819_vm0, %v6817_v0 }
0x24f2   :  { %v3831_v26 = vpop.f32.mrb[96].mxu1 }
0x24f3   :  { %v3985_v62 = vmul.f32 0.35355338, %v3831_v26  ;;  %v6245_v63 = vpop.f32.mrb[97].mxu1 }
0x24f4   :  { %v3834_v1 = vpop.f32.mrb[98].mxu1 }
0x24f5   :  { %v3993_v25 = vadd.f32 %v3985_v62, %v7378_v53  ;;  %v3986_v8 = vmul.f32 0.35355338, %v3834_v1  ;;  %v6246_v55 = vpop.f32.mrb[99].mxu1 }
0x24f7   :  { %v3994_v9 = vadd.f32 %v3986_v8, %v7381_v60  ;;  %v4001_v10 = vsel %vm479_vm7, %v3993_v25, -inf }
0x24f8   :  { %4002 = vmax.xlane.f32.xlu1 %v4001_v10 }
0x24f9   :  { %v4004_v6 = vsel %vm479_vm7, %v3994_v9, -inf }
0x24fa   :  { %4005 = vmax.xlane.f32.xlu0 %v4004_v6 }
0x255d   :  { %v3880_v12 = vpop.f32.mrb[96].mxu0  ;;  %v3929_v28 = vpop.f32.mrb[100].mxu1 }
0x255e   :  { %v3987_v14 = vmul.f32 0.35355338, %v3880_v12  ;;  %v3989_v18 = vmul.f32 0.35355338, %v3929_v28  ;;  %v6251_v21 = vpop.f32.mrb[97].mxu0  ;;  %v6257_v40 = vpop.f32.mrb[101].mxu1 }
0x255f   :  { %v3883_v20 = vpop.f32.mrb[98].mxu0  ;;  %v3932_v17 = vpop.f32.mrb[102].mxu1 }
0x2560   :  { %v3995_v22 = vadd.f32 %v3987_v14, %v7378_v53  ;;  %v3988_v23 = vmul.f32 0.35355338, %v3883_v20  ;;  %v3990_v24 = vmul.f32 0.35355338, %v3932_v17  ;;  %v6252_v30 = vpop.f32.mrb[99].mxu0  ;;  %v6258_v32 = vpop.f32.mrb[103].mxu1  ;;  %v3997_v33 = vadd.f32 %v3989_v18, %v7378_v53 }
0x2562   :  { %v3996_v15 = vadd.f32 %v3988_v23, %v7381_v60  ;;  %v4007_v36 = vsel %vm479_vm7, %v3995_v22, -inf  ;;  %v3998_v34 = vadd.f32 %v3990_v24, %v7381_v60  ;;  %v4013_v16 = vsel %vm479_vm7, %v3997_v33, -inf }
0x2563   :  { %4008 = vmax.xlane.f32.xlu0 %v4007_v36 }
0x2564   :  { %v4010_v35 = vsel %vm479_vm7, %v3996_v15, -inf  ;;  %v4016_v46 = vsel %vm479_vm7, %v3998_v34, -inf }
0x2565   :  { %v3978_v19 = vpop.f32.mrb[100].mxu0  ;;  %4011 = vmax.xlane.f32.xlu1 %v4010_v35 }
0x2566   :  { %v3991_v13 = vmul.f32 0.35355338, %v3978_v19  ;;  %v6263_v37 = vpop.f32.mrb[101].mxu0 }
0x2567   :  { %v3981_v38 = vpop.f32.mrb[102].mxu0  ;;  %4014 = vmax.xlane.f32.xlu0 %v4013_v16 }
0x2568   :  { %v3999_v43 = vadd.f32 %v3991_v13, %v7378_v53  ;;  %v3992_v3 = vmul.f32 0.35355338, %v3981_v38  ;;  %v6264_v4 = vpop.f32.mrb[103].mxu0 }
0x2569   :  { %4017 = vmax.xlane.f32.xlu1 %v4016_v46 }
0x256a   :  { %v4000_v42 = vadd.f32 %v3992_v3, %v7381_v60  ;;  %v4019_v47 = vsel %vm479_vm7, %v3999_v43, -inf }
0x256b   :  { %4020 = vmax.xlane.f32.xlu0 %v4019_v47 }
0x256c   :  { %v4022_v48 = vsel %vm479_vm7, %v4000_v42, -inf }
0x256d   :  { %4023 = vmax.xlane.f32.xlu1 %v4022_v48 }
0x257e   :  { %4140 = vrot.lane.b32.xlu1 %v7731_v51, %s6827_s22 }
0x2581   :  { %4093 = vrot.lane.b32.xlu0 %v7719_v2, %s6827_s22 }
0x2585   :  { %v4003_v53 = vpop.xlane.xlu1 %4002 }
0x2586   :  { %v4025_v5 = vsub.f32 %v3993_v25, %v4003_v53 }
0x2587   :  { %v4006_v49 = vpop.xlane.xlu0 %4005 }
0x2588   :  { %v4026_v39 = vsub.f32 %v3994_v9, %v4006_v49  ;;  %v4033_v52 = vmul.f32 1.442695, %v4025_v5 }
0x258a   :  { %v4035_v27 = vmul.f32 1.442695, %v4026_v39  ;;  %6737 = vpow2.f32 %v4033_v52 }
0x258c   :  { %6739 = vpow2.f32 %v4035_v27 }
0x2594   :  { %v6738_v60 = vpop.eup %6737 }
0x2595   :  { %v4049_v57 = vsel %vm479_vm7, %v6738_v60, 0.0 }
0x2596   :  { %v6740_v54 = vpop.eup %6739 }
0x2597   :  { %v4052_v41 = vsel %vm479_vm7, %v6740_v54, 0.0 }
0x25a0   :  { %4050 = vadd.xlane.f32.xlu0 %v4049_v57 }
0x25a2   :  { %4053 = vadd.xlane.f32.xlu1 %v4052_v41 }
0x25f0   :  { %v4009_v51 = vpop.xlane.xlu0 %4008 }
0x25f1   :  { %v4027_v58 = vsub.f32 %v3995_v22, %v4009_v51 }
0x25f2   :  { %v4012_v61 = vpop.xlane.xlu1 %4011 }
0x25f3   :  { %v4037_v2 = vmul.f32 1.442695, %v4027_v58  ;;  %v4028_v26 = vsub.f32 %v3996_v15, %v4012_v61 }
0x25f4   :  { %v4015_v62 = vpop.xlane.xlu0 %4014 }
0x25f5   :  { %6741 = vpow2.f32 %v4037_v2  ;;  %v4039_v63 = vmul.f32 1.442695, %v4028_v26  ;;  %v4029_v1 = vsub.f32 %v3997_v33, %v4015_v62 }
0x25f6   :  { %v4018_v25 = vpop.xlane.xlu1 %4017 }
0x25f7   :  { %6743 = vpow2.f32 %v4039_v63  ;;  %v4041_v8 = vmul.f32 1.442695, %v4029_v1  ;;  %v4030_v55 = vsub.f32 %v3998_v34, %v4018_v25 }
0x25f8   :  { %v4021_v9 = vpop.xlane.xlu0 %4020 }
0x25f9   :  { %6745 = vpow2.f32 %v4041_v8  ;;  %v4043_v10 = vmul.f32 1.442695, %v4030_v55  ;;  %v4031_v6 = vsub.f32 %v3999_v43, %v4021_v9  ;;  %v6563_v55 = vld [vmem:[%s7022_s26 + $0x10] sm:$0xff]  }
0x25fa   :  { %v4024_v12 = vpop.xlane.xlu1 %4023 }
0x25fb   :  { %6747 = vpow2.f32 %v4043_v10  ;;  %v4045_v28 = vmul.f32 1.442695, %v4031_v6  ;;  %v4032_v14 = vsub.f32 %v4000_v42, %v4024_v12  ;;  %v6564_v6 = vld [vmem:[%s7022_s26 + $0x18] sm:$0xff]  }
0x25fc   :  { %v4094_v18 = vpop.permute.xlu0 %4093 }
0x25fd   :  { %6749 = vpow2.f32 %v4045_v28  ;;  %v4047_v21 = vmul.f32 1.442695, %v4032_v14  ;;  %6266 = vmatpush3.bf16.msra.mxu1 %v4094_v18 }
0x25fe   :  { %v4141_v40 = vpop.permute.xlu1 %4140  ;;  %6277 = vmatprep.subr.bf16.mxu1 %v6817_v0 }
0x25ff   :  { %v6742_v20 = vpop.eup %6741  ;;  %6751 = vpow2.f32 %v4047_v21  ;;  %6272 = vmatpush3.bf16.msra.mxu0 %v4141_v40 }
0x2600   :  { %v4055_v17 = vsel %vm479_vm7, %v6742_v20, 0.0  ;;  %6283 = vmatprep.subr.bf16.mxu0 %v6817_v0 }
0x2601   :  { %v6744_v22 = vpop.eup %6743  ;;  %4056 = vadd.xlane.f32.xlu0 %v4055_v17 }
0x2602   :  { %v4058_v23 = vsel %vm479_vm7, %v6744_v22, 0.0 }
0x2603   :  { %v6746_v24 = vpop.eup %6745  ;;  %4059 = vadd.xlane.f32.xlu1 %v4058_v23 }
0x2604   :  { %v4061_v30 = vsel %vm479_vm7, %v6746_v24, 0.0 }
0x2605   :  { %v6748_v32 = vpop.eup %6747  ;;  %4062 = vadd.xlane.f32.xlu0 %v4061_v30 }
0x2606   :  { %v4064_v33 = vsel %vm479_vm7, %v6748_v32, 0.0 }
0x2607   :  { %v6750_v15 = vpop.eup %6749  ;;  %4065 = vadd.xlane.f32.xlu1 %v4064_v33 }
0x2608   :  { %v4067_v36 = vsel %vm479_vm7, %v6750_v15, 0.0 }
0x2609   :  { %v6752_v34 = vpop.eup %6751  ;;  %4068 = vadd.xlane.f32.xlu0 %v4067_v36 }
0x260a   :  { %v4070_v35 = vsel %vm479_vm7, %v6752_v34, 0.0 }
0x260b   :  { %4071 = vadd.xlane.f32.xlu1 %v4070_v35 }
0x261c   :  { %4187 = vrot.lane.b32.xlu1 %v7729_v50, %s6827_s22 }
0x261f   :  { %4234 = vrot.lane.b32.xlu0 %v7737_v7, %s6827_s22  ;;  %s6854_s22 = smov 29  }
0x262d   :  { %v4051_v19 = vpop.xlane.xlu0 %4050 }
0x262e   :  { %6753 = vrcp.f32 %v4051_v19 }
0x262f   :  { %v4054_v13 = vpop.xlane.xlu1 %4053 }
0x2630   :  { %6755 = vrcp.f32 %v4054_v13 }
0x2638   :  { %v6754_v37 = vpop.eup %6753 }
0x2639   :  { %v4081_v38 = vmul.f32 %v6754_v37, %v6738_v60 }
0x263a   :  { %v6756_v16 = vpop.eup %6755 }
0x263b   :  { %v4082_v43 = vmul.f32 %v6756_v16, %v6740_v54 }
0x263d   :  { %v4089_v3 = vpack.c.bf16 %v4082_v43, %v4081_v38 }
0x263f   :  { %6268 = vmatmul.mubr.msk.bf16.vlgmr.msra.gmra.mrb[104].mxu1 %vm479_vm7, %v4089_v3 }
0x2640   :  { %6279 = vmatprep.mubr.msk.bf16.mxu1 %vm6819_vm0, %v6817_v0 }
0x268e   :  { %v4057_v4 = vpop.xlane.xlu0 %4056 }
0x268f   :  { %6757 = vrcp.f32 %v4057_v4 }
0x2690   :  { %v4060_v50 = vpop.xlane.xlu1 %4059 }
0x2691   :  { %6759 = vrcp.f32 %v4060_v50 }
0x2692   :  { %v4063_v46 = vpop.xlane.xlu0 %4062 }
0x2693   :  { %6761 = vrcp.f32 %v4063_v46 }
0x2694   :  { %v4066_v7 = vpop.xlane.xlu1 %4065 }
0x2695   :  { %6763 = vrcp.f32 %v4066_v7 }
0x2696   :  { %v4069_v42 = vpop.xlane.xlu0 %4068 }
0x2697   :  { %6765 = vrcp.f32 %v4069_v42  ;;  %v5674_v42 = vld [vmem:[%s7459_s13 + $0x1] ss:$0 sm:$0xff]  ;;  %s6856_s13 = smov 32  }
0x2698   :  { %v4072_v47 = vpop.xlane.xlu1 %4071 }
0x2699   :  { %v6758_v48 = vpop.eup %6757  ;;  %6767 = vrcp.f32 %v4072_v47 }
0x269a   :  { %v4083_v49 = vmul.f32 %v6758_v48, %v6742_v20  ;;  %v4235_v41 = vpop.permute.xlu0 %4234 }
0x269b   :  { %v6760_v53 = vpop.eup %6759 }
0x269c   :  { %v4084_v5 = vmul.f32 %v6760_v53, %v6744_v22  ;;  %v4188_v39 = vpop.permute.xlu1 %4187 }
0x269d   :  { %v6762_v52 = vpop.eup %6761  ;;  %6278 = vmatpush3.bf16.msra.mxu1 %v4188_v39 }
0x269e   :  { %v4090_v27 = vpack.c.bf16 %v4084_v5, %v4083_v49  ;;  %6289 = vmatprep.subr.bf16.mxu1 %v6817_v0  ;;  %v4085_v54 = vmul.f32 %v6762_v52, %v6746_v24 }
0x269f   :  { %v6764_v60 = vpop.eup %6763 }
0x26a0   :  { %v4086_v57 = vmul.f32 %v6764_v60, %v6748_v32  ;;  %6274 = vmatmul.mubr.msk.bf16.vlgmr.msra.gmra.mrb[104].mxu0 %vm479_vm7, %v4090_v27 }
0x26a1   :  { %v6766_v51 = vpop.eup %6765  ;;  %6284 = vmatpush3.bf16.msra.mxu0 %v4235_v41  ;;  %6285 = vmatprep.mubr.msk.bf16.mxu0 %vm6819_vm0, %v6817_v0  ;;  %v6566_v41 = vld [vmem:[%s7474_s28 + $0x18] sm:$0xff]  }
0x26a2   :  { %v4091_v58 = vpack.c.bf16 %v4086_v57, %v4085_v54  ;;  %6297 = vmatprep.subr.bf16.mxu0 %v6817_v0  ;;  %v4087_v2 = vmul.f32 %v6766_v51, %v6750_v15  ;;  %v6565_v57 = vld [vmem:[%s7474_s28 + $0x10] sm:$0xff]  }
0x26a3   :  { %v6768_v61 = vpop.eup %6767 }
0x26a4   :  { %v4088_v26 = vmul.f32 %v6768_v61, %v6752_v34  ;;  %6280 = vmatmul.mubr.msk.bf16.vlgmr.msra.gmra.mrb[108].mxu1 %vm479_vm7, %v4091_v58 }
0x26a5   :  { %6293 = vmatprep.mubr.msk.bf16.mxu1 %vm6819_vm0, %v6817_v0  ;;  %6290 = vmatpush3.bf16.msra.mxu1 %v6563_v55 }
0x26a6   :  { %v4092_v62 = vpack.c.bf16 %v4088_v26, %v4087_v2  ;;  %6291 = vmatprep.subr.bf16.mxu1 %v6817_v0 }
0x26a8   :  { %6286 = vmatmul.mubr.msk.bf16.vlgmr.msra.gmra.mrb[108].mxu0 %vm479_vm7, %v4092_v62 }
0x26a9   :  { %6301 = vmatprep.mubr.msk.bf16.mxu0 %vm6819_vm0, %v6817_v0  ;;  %6292 = vmatpush3.bf16.msra.mxu1 %v6564_v6 }
0x26aa   :  { %6305 = vmatprep.subr.bf16.mxu1 %v6817_v0  ;;  %6298 = vmatpush3.bf16.msra.mxu0 %v6565_v57 }
0x26ab   :  { %6299 = vmatprep.subr.bf16.mxu0 %v6817_v0 }
0x26ae   :  { %6300 = vmatpush3.bf16.msra.mxu0 %v6566_v41 }
0x26af   :  { %6313 = vmatprep.subr.bf16.mxu0 %v6817_v0 }
0x2712   :  { %v4133_v63 = vpop.f32.mrb[104].mxu1 }
0x2713   :  { %v6269_v1 = vpop.f32.mrb[105].mxu1 }
0x2714   :  { %v4136_v25 = vpop.f32.mrb[106].mxu1 }
0x2715   :  { %v6270_v8 = vpop.f32.mrb[107].mxu1 }
0x2716   :  { %v5684_v8 = vld [vmem:[%s7489_s19 + $0x1] ss:$0 sm:$0xff] }
0x2773   :  { %v4180_v9 = vpop.f32.mrb[104].mxu0 }
0x2774   :  { %v6275_v10 = vpop.f32.mrb[105].mxu0 }
0x2775   :  { %v4183_v12 = vpop.f32.mrb[106].mxu0 }
0x2776   :  { %v6497_v28 = vpack.i.bf16 %v4183_v12, %v4180_v9  ;;  %v6276_v14 = vpop.f32.mrb[107].mxu0 }
0x2777   :  { %v4227_v18 = vpop.f32.mrb[108].mxu1 }
0x2778   :  { %6498 = vrot.lane.b32.xlu1 %v6497_v28, %s6831_s5  ;;  %v6281_v21 = vpop.f32.mrb[109].mxu1 }
0x2779   :  { %v4230_v40 = vpop.f32.mrb[110].mxu1 }
0x277a   :  { %v6502_v20 = vpack.i.bf16 %v4230_v40, %v4227_v18  ;;  %v6282_v17 = vpop.f32.mrb[111].mxu1  ;;  %v5678_v18 = vld [vmem:[%s7503_s8 + $0x2] sm:$0x3]  ;;  %s5529_s8 = sld [smem:[%s8021_s0 + %s6856_s13]]  }
0x277b   :  { %v4274_v22 = vpop.f32.mrb[108].mxu0  ;;  %v4414_v40 = vrot.slane %v5678_v18, %v7090_v56 }
0x277c   :  { %v6287_v23 = vpop.f32.mrb[109].mxu0  ;;  %6503 = vrot.lane.b32.xlu0 %v6502_v20, %s6828_s23 }
0x277d   :  { %v4277_v24 = vpop.f32.mrb[110].mxu0 }
0x277e   :  { %v6507_v30 = vpack.i.bf16 %v4277_v24, %v4274_v22  ;;  %v6288_v32 = vpop.f32.mrb[111].mxu0  ;;  %v4420_v24 = vrot.slane %v5678_v18, %v7094_v59 }
0x2780   :  { %6508 = vrot.lane.b32.xlu1 %v6507_v30, %s6829_s27 }
0x27ea   :  { %v6499_v33 = vpop.permute.xlu1 %6498 }
0x27eb   :  { %v6501_v36 = vunpack.i.h.bf16 %v6499_v33  ;;  %v6500_v34 = vunpack.i.l.bf16 %v6499_v33 }
0x27ed   :  { %v4305_v37 = vsel %vm268_vm2, %v4133_v63, %v6500_v34  ;;  %v4306_v16 = vsel %vm268_vm2, %v4136_v25, %v6501_v36 }
0x27ee   :  { %v6504_v15 = vpop.permute.xlu0 %6503 }
0x27ef   :  { %v6506_v35 = vunpack.i.h.bf16 %v6504_v15  ;;  %v6505_v19 = vunpack.i.l.bf16 %v6504_v15 }
0x27f1   :  { %v4308_v3 = vsel %vm479_vm7, %v4306_v16, %v6506_v35  ;;  %v4307_v4 = vsel %vm479_vm7, %v4305_v37, %v6505_v19 }
0x27f2   :  { %v6509_v13 = vpop.permute.xlu1 %6508 }
0x27f3   :  { %v6511_v38 = vunpack.i.h.bf16 %v6509_v13  ;;  %v6510_v43 = vunpack.i.l.bf16 %v6509_v13 }
0x27f5   :  { %v4309_v50 = vsel %vm788_vm8, %v4307_v4, %v6510_v43  ;;  %v4310_v46 = vsel %vm788_vm8, %v4308_v3, %v6511_v38 }
0x27f6   :  { %v4316_v7 = vpack.c.bf16 %v4310_v46, %v4309_v50 }
0x27f8   :  { %6294 = vmatmul.mubr.msk.bf16.vlgmr.msra.gmra.mrb[112].mxu1 %vm213_vm1, %v4316_v7 }
0x27f9   :  { %6309 = vmatprep.mubr.msk.bf16.mxu1 %vm6819_vm0, %v6817_v0 }
0x28cb   :  { %v4374_v47 = vpop.f32.mrb[112].mxu1 }
0x28cc   :  { %v4375_v48 = vadd.f32 %v5674_v42, %v4374_v47  ;;  %v6295_v53 = vpop.f32.mrb[113].mxu1 }
0x28cd   :  { %v4377_v49 = vpop.f32.mrb[114].mxu1 }
0x28ce   :  { %v4381_v5 = vadd.f32 %v4375_v48, %v7709_v44  ;;  %v4378_v39 = vadd.f32 %v5674_v42, %v4377_v49  ;;  %v6296_v52 = vpop.f32.mrb[115].mxu1 }
0x28d0   :  { %v4382_v27 = vadd.f32 %v4378_v39, %v7711_v45  ;;  %v4385_v60 = vsel %vm213_vm1, %v4381_v5, 0.0 }
0x28d1   :  { %4386 = vadd.xlane.f32.xlu0 %v4385_v60 }
0x28d2   :  { %v4388_v54 = vsel %vm213_vm1, %v4382_v27, 0.0 }
0x28d3   :  { %4389 = vadd.xlane.f32.xlu1 %v4388_v54 }
0x28e4   :  { %4494 = vrot.lane.b32.xlu1 %v6565_v57, %s6824_s17 }
0x28e8   :  { %4500 = vrot.lane.b32.xlu1 %v5684_v8, %s6824_s17 }
0x295e   :  { %v4387_v44 = vpop.xlane.xlu0 %4386 }
0x295f   :  { %v4391_v51 = vmul.f32 0.03125, %v4387_v44 }
0x2960   :  { %v4390_v45 = vpop.xlane.xlu1 %4389 }
0x2961   :  { %v4393_v58 = vsub.f32 %v4381_v5, %v4391_v51  ;;  %v4392_v61 = vmul.f32 0.03125, %v4390_v45 }
0x2963   :  { %v4394_v2 = vsub.f32 %v4382_v27, %v4392_v61  ;;  %v4395_v26 = vmul.f32 %v4393_v58, %v4393_v58 }
0x2964   :  { %v4495_v25 = vpop.permute.xlu1 %4494 }
0x2965   :  { %v4397_v62 = vsel %vm213_vm1, %v4395_v26, 0.0  ;;  %v4396_v63 = vmul.f32 %v4394_v2, %v4394_v2  ;;  %6306 = vmatpush3.bf16.msra.mxu1 %v4495_v25 }
0x2966   :  { %4398 = vadd.xlane.f32.xlu0 %v4397_v62  ;;  %6307 = vmatprep.subr.bf16.mxu1 %v6817_v0 }
0x2967   :  { %v4400_v1 = vsel %vm213_vm1, %v4396_v63, 0.0 }
0x2968   :  { %v4501_v15 = vpop.permute.xlu1 %4500 }
0x296a   :  { %4401 = vadd.xlane.f32.xlu0 %v4400_v1 }
0x2980   :  { %4496 = vrot.lane.b32.xlu0 %v6566_v41, %s6824_s17 }
0x29f3   :  { %v4399_v55 = vpop.xlane.xlu0 %4398 }
0x29f4   :  { %v4403_v9 = vmul.f32 0.03125, %v4399_v55 }
0x29f6   :  { %v4405_v10 = vadd.f32 1e-05, %v4403_v9 }
0x29f7   :  { %v4402_v6 = vpop.xlane.xlu0 %4401 }
0x29f8   :  { %6769 = vrsqrt.f32 %v4405_v10  ;;  %v4404_v12 = vmul.f32 0.03125, %v4402_v6 }
0x29fa   :  { %v4406_v28 = vadd.f32 1e-05, %v4404_v12 }
0x29fb   :  { %v4497_v14 = vpop.permute.xlu0 %4496 }
0x29fc   :  { %6771 = vrsqrt.f32 %v4406_v28  ;;  %6308 = vmatpush3.bf16.msra.mxu1 %v4497_v14 }
0x29fd   :  { %6319 = vmatprep.subr.bf16.mxu1 %v6817_v0 }
0x29ff   :  { %6310 = vmatmul.mubr.msk.bf16.vlgmr.msra.gmra.mrb[116].mxu1 %vm213_vm1, %v7511_v11 }
0x2a00   :  { %6321 = vmatprep.mubr.msk.bf16.mxu1 %vm6819_vm0, %v6817_v0 }
0x2a02   :  { %v6770_v21 = vpop.eup %6769 }
0x2a03   :  { %v4409_v20 = vmul.f32 %v6770_v21, %v4393_v58 }
0x2a05   :  { %v4415_v22 = vmul.f32 %v4414_v40, %v4409_v20 }
0x2a06   :  { %v6772_v17 = vpop.eup %6771 }
0x2a07   :  { %v4410_v23 = vmul.f32 %v6772_v17, %v4394_v2  ;;  %v7853_v32 = vadd.f32 %v4420_v24, %v4415_v22 }
0x2a09   :  { %v4416_v30 = vmul.f32 %v4414_v40, %v4410_v23 }
0x2a0b   :  { %v7855_v33 = vadd.f32 %v4420_v24, %v4416_v30 }
0x2a0d   :  { %v4430_v11 = vpack.c.bf16 %v7855_v33, %v7853_v32 }
0x2a0f   :  { %6302 = vmatmul.mubr.msk.bf16.vlgmr.msra.gmra.mrb[112].mxu0 %vm213_vm1, %v4430_v11 }
0x2a10   :  { %6315 = vmatprep.mubr.msk.bf16.mxu0 %vm6819_vm0, %v6817_v0 }
0x2ad2   :  { %v4537_v36 = vpop.f32.mrb[116].mxu1 }
0x2ad3   :  { %v6311_v34 = vpop.f32.mrb[117].mxu1  ;;  %v4538_v19 = vadd.f32 %v4537_v36, %v4501_v15 }
0x2ad4   :  { %v4540_v35 = vpop.f32.mrb[118].mxu1 }
0x2ad5   :  { %v4541_v13 = vadd.f32 %v4540_v35, %v4501_v15  ;;  %v6312_v37 = vpop.f32.mrb[119].mxu1 }
0x2ad7   :  { %v7862_v16 = vpack.c.bf16 %v4541_v13, %v4538_v19 }
0x2ad9   :  { %4555 = vrot.lane.b32.xlu0 %v7862_v16, %s6825_s18  ;;  %4553 = vrot.lane.b32.xlu1 %v7862_v16, %s6823_s16  ;;  %v4563_v38 = vsel %vm268_vm2, %v7862_v16, 0 }
0x2ada   :  { %6314 = vmatpush3.bf16.xpose.msra.mxu0 %v4563_v38 }
0x2adb   :  { %6325 = vmatprep.subr.bf16.mxu0 %v6817_v0 }
0x2add   :  { %4557 = vrot.lane.b32.xlu0 %v7862_v16, %s6822_s15 }
0x2ae2   :  { %v4486_v43 = vpop.f32.mrb[112].mxu0 }
0x2ae3   :  { %v6303_v3 = vpop.f32.mrb[113].mxu0  ;;  %v4487_v50 = vadd.f32 %v5684_v8, %v4486_v43 }
0x2ae4   :  { %v4489_v4 = vpop.f32.mrb[114].mxu0 }
0x2ae5   :  { %v4490_v46 = vadd.f32 %v5684_v8, %v4489_v4  ;;  %v6304_v7 = vpop.f32.mrb[115].mxu0 }
0x2ae7   :  { %v4493_v42 = vpack.c.bf16 %v4490_v46, %v4487_v50 }
0x2ae9   :  { %4550 = vrot.lane.b32.xlu0 %v4493_v42, %s6822_s15  ;;  %4546 = vrot.lane.b32.xlu1 %v4493_v42, %s6823_s16  ;;  %s6853_s15 = smov 30  }
0x2aea   :  { %6316 = vmatmul.mubr.msk.bf16.vlgmr.msra.gmra.mrb[116].mxu0 %vm268_vm2, %v4493_v42 }
0x2aeb   :  { %6327 = vmatprep.mubr.msk.bf16.mxu0 %vm6819_vm0, %v6817_v0 }
0x2aed   :  { %4548 = vrot.lane.b32.xlu1 %v4493_v42, %s6825_s18  ;;  %s5527_s18 = sld [smem:[%s8021_s0 + %s6853_s15]]  }
0x2b4b   :  { %v7879_v47 = vpop.permute.xlu0 %4555  ;;  %v7881_v48 = vpop.permute.xlu1 %4553 }
0x2b4c   :  { %v4657_v53 = vsel %vm268_vm2, %v7879_v47, 0  ;;  %v4610_v49 = vsel %vm268_vm2, %v7881_v48, 0 }
0x2b4d   :  { %6320 = vmatpush3.bf16.xpose.msra.mxu1 %v4610_v49  ;;  %6326 = vmatpush3.bf16.xpose.msra.mxu0 %v4657_v53 }
0x2b4e   :  { %6331 = vmatprep.subr.bf16.mxu1 %v6817_v0  ;;  %6337 = vmatprep.subr.bf16.mxu0 %v6817_v0 }
0x2b4f   :  { %v7889_v5 = vpop.permute.xlu0 %4557 }
0x2b50   :  { %v4704_v52 = vsel %vm268_vm2, %v7889_v5, 0 }
0x2b5b   :  { %v4547_v39 = vpop.permute.xlu1 %4546  ;;  %v4551_v60 = vpop.permute.xlu0 %4550 }
0x2b5c   :  { %6322 = vmatmul.mubr.msk.bf16.vlgmr.msra.gmra.mrb[120].mxu1 %vm268_vm2, %v4547_v39 }
0x2b5d   :  { %6332 = vmatpush3.bf16.xpose.msra.mxu1 %v4704_v52  ;;  %6333 = vmatprep.mubr.msk.bf16.mxu1 %vm6819_vm0, %v6817_v0 }
0x2b5e   :  { %6343 = vmatprep.subr.bf16.mxu1 %v6817_v0 }
0x2b5f   :  { %v4549_v27 = vpop.permute.xlu1 %4548 }
0x2b60   :  { %6328 = vmatmul.mubr.msk.bf16.vlgmr.msra.gmra.mrb[120].mxu0 %vm268_vm2, %v4549_v27 }
0x2b61   :  { %6339 = vmatprep.mubr.msk.bf16.mxu0 %vm6819_vm0, %v6817_v0 }
0x2b64   :  { %6334 = vmatmul.mubr.msk.bf16.vlgmr.msra.gmra.mrb[124].mxu1 %vm268_vm2, %v4551_v60 }
0x2b65   :  { %6345 = vmatprep.mubr.msk.bf16.mxu1 %vm6819_vm0, %v6817_v0 }
0x2bbd   :  { %v4599_v54 = vpop.f32.mrb[116].mxu0 }
0x2bbe   :  { %v4747_v57 = vmul.f32 0.35355338, %v4599_v54  ;;  %v6317_v41 = vpop.f32.mrb[117].mxu0 }
0x2bbf   :  { %v4602_v44 = vpop.f32.mrb[118].mxu0 }
0x2bc0   :  { %v4755_v51 = vadd.f32 %v4747_v57, %v6957_v29  ;;  %v4748_v45 = vmul.f32 0.35355338, %v4602_v44  ;;  %v6318_v58 = vpop.f32.mrb[119].mxu0 }
0x2bc2   :  { %v4756_v61 = vadd.f32 %v4748_v45, %v6962_v31  ;;  %v4763_v2 = vsel %vm479_vm7, %v4755_v51, -inf }
0x2bc3   :  { %4764 = vmax.xlane.f32.xlu1 %v4763_v2 }
0x2bc4   :  { %v4766_v26 = vsel %vm479_vm7, %v4756_v61, -inf }
0x2bc5   :  { %4767 = vmax.xlane.f32.xlu0 %v4766_v26 }
0x2c2f   :  { %v4646_v62 = vpop.f32.mrb[120].mxu1 }
0x2c30   :  { %v4749_v63 = vmul.f32 0.35355338, %v4646_v62  ;;  %v6323_v1 = vpop.f32.mrb[121].mxu1 }
0x2c31   :  { %v4649_v25 = vpop.f32.mrb[122].mxu1 }
0x2c32   :  { %v4757_v8 = vadd.f32 %v4749_v63, %v6957_v29  ;;  %v4750_v55 = vmul.f32 0.35355338, %v4649_v25  ;;  %v6324_v9 = vpop.f32.mrb[123].mxu1 }
0x2c33   :  { %v4693_v10 = vpop.f32.mrb[120].mxu0 }
0x2c34   :  { %v4758_v6 = vadd.f32 %v4750_v55, %v6962_v31  ;;  %v4751_v12 = vmul.f32 0.35355338, %v4693_v10  ;;  %v6329_v28 = vpop.f32.mrb[121].mxu0  ;;  %v4769_v14 = vsel %vm479_vm7, %v4757_v8, -inf }
0x2c35   :  { %v4696_v18 = vpop.f32.mrb[122].mxu0  ;;  %4770 = vmax.xlane.f32.xlu0 %v4769_v14 }
0x2c36   :  { %v4759_v21 = vadd.f32 %v4751_v12, %v6957_v29  ;;  %v4752_v40 = vmul.f32 0.35355338, %v4696_v18  ;;  %v6330_v20 = vpop.f32.mrb[123].mxu0  ;;  %v4772_v17 = vsel %vm479_vm7, %v4758_v6, -inf }
0x2c37   :  { %4773 = vmax.xlane.f32.xlu1 %v4772_v17  ;;  %v4740_v22 = vpop.f32.mrb[124].mxu1 }
0x2c38   :  { %v4760_v23 = vadd.f32 %v4752_v40, %v6962_v31  ;;  %v4753_v24 = vmul.f32 0.35355338, %v4740_v22  ;;  %v6335_v30 = vpop.f32.mrb[125].mxu1  ;;  %v4775_v11 = vsel %vm479_vm7, %v4759_v21, -inf }
0x2c39   :  { %4776 = vmax.xlane.f32.xlu0 %v4775_v11  ;;  %v4743_v15 = vpop.f32.mrb[126].mxu1 }
0x2c3a   :  { %v4761_v36 = vadd.f32 %v4753_v24, %v6957_v29  ;;  %v4754_v34 = vmul.f32 0.35355338, %v4743_v15  ;;  %v6336_v35 = vpop.f32.mrb[127].mxu1  ;;  %v4778_v19 = vsel %vm479_vm7, %v4760_v23, -inf }
0x2c3b   :  { %4779 = vmax.xlane.f32.xlu1 %v4778_v19 }
0x2c3c   :  { %v4762_v13 = vadd.f32 %v4754_v34, %v6962_v31  ;;  %v4781_v37 = vsel %vm479_vm7, %v4761_v36, -inf }
0x2c3d   :  { %4782 = vmax.xlane.f32.xlu0 %v4781_v37 }
0x2c3e   :  { %v4784_v38 = vsel %vm479_vm7, %v4762_v13, -inf }
0x2c3f   :  { %4785 = vmax.xlane.f32.xlu1 %v4784_v38 }
0x2c50   :  { %4902 = vrot.lane.b32.xlu1 %v7881_v48, %s6824_s17  ;;  %v4765_v29 = vpop.xlane.xlu1 %4764 }
0x2c51   :  { %v4787_v3 = vsub.f32 %v4755_v51, %v4765_v29 }
0x2c52   :  { %v4768_v43 = vpop.xlane.xlu0 %4767 }
0x2c53   :  { %4855 = vrot.lane.b32.xlu0 %v7862_v16, %s6824_s17  ;;  %v4788_v4 = vsub.f32 %v4756_v61, %v4768_v43  ;;  %v4795_v50 = vmul.f32 1.442695, %v4787_v3 }
0x2c55   :  { %v4797_v46 = vmul.f32 1.442695, %v4788_v4  ;;  %6773 = vpow2.f32 %v4795_v50 }
0x2c57   :  { %6775 = vpow2.f32 %v4797_v46 }
0x2c5f   :  { %v6774_v31 = vpop.eup %6773 }
0x2c60   :  { %v4811_v42 = vsel %vm479_vm7, %v6774_v31, 0.0 }
0x2c61   :  { %v6776_v7 = vpop.eup %6775 }
0x2c62   :  { %v4814_v53 = vsel %vm479_vm7, %v6776_v7, 0.0 }
0x2c72   :  { %4812 = vadd.xlane.f32.xlu0 %v4811_v42 }
0x2c74   :  { %4815 = vadd.xlane.f32.xlu1 %v4814_v53 }
0x2cc2   :  { %v4771_v48 = vpop.xlane.xlu0 %4770 }
0x2cc3   :  { %v4789_v49 = vsub.f32 %v4757_v8, %v4771_v48 }
0x2cc4   :  { %v4774_v39 = vpop.xlane.xlu1 %4773 }
0x2cc5   :  { %v4799_v16 = vmul.f32 1.442695, %v4789_v49  ;;  %v4790_v52 = vsub.f32 %v4758_v6, %v4774_v39 }
0x2cc6   :  { %v4777_v27 = vpop.xlane.xlu0 %4776 }
0x2cc7   :  { %6777 = vpow2.f32 %v4799_v16  ;;  %v4801_v60 = vmul.f32 1.442695, %v4790_v52  ;;  %v4791_v54 = vsub.f32 %v4759_v21, %v4777_v27 }
0x2cc8   :  { %v4780_v57 = vpop.xlane.xlu1 %4779 }
0x2cc9   :  { %6779 = vpow2.f32 %v4801_v60  ;;  %v4803_v41 = vmul.f32 1.442695, %v4791_v54  ;;  %v4792_v44 = vsub.f32 %v4760_v23, %v4780_v57  ;;  %v6567_v54 = vld [vmem:[%s7620_s24 + $0x10] sm:$0xff]  }
0x2cca   :  { %v4783_v51 = vpop.xlane.xlu0 %4782 }
0x2ccb   :  { %6781 = vpow2.f32 %v4803_v41  ;;  %v4805_v45 = vmul.f32 1.442695, %v4792_v44  ;;  %v4793_v58 = vsub.f32 %v4761_v36, %v4783_v51  ;;  %v6568_v44 = vld [vmem:[%s7620_s24 + $0x18] sm:$0xff]  }
0x2ccc   :  { %v4786_v61 = vpop.xlane.xlu1 %4785 }
0x2ccd   :  { %6783 = vpow2.f32 %v4805_v45  ;;  %v4807_v2 = vmul.f32 1.442695, %v4793_v58  ;;  %v4794_v26 = vsub.f32 %v4762_v13, %v4786_v61 }
0x2cce   :  { %v4856_v62 = vpop.permute.xlu0 %4855 }
0x2ccf   :  { %6785 = vpow2.f32 %v4807_v2  ;;  %v4809_v63 = vmul.f32 1.442695, %v4794_v26  ;;  %6338 = vmatpush3.bf16.msra.mxu0 %v4856_v62 }
0x2cd0   :  { %v4903_v1 = vpop.permute.xlu1 %4902  ;;  %6349 = vmatprep.subr.bf16.mxu0 %v6817_v0 }
0x2cd1   :  { %v6778_v25 = vpop.eup %6777  ;;  %6787 = vpow2.f32 %v4809_v63  ;;  %6344 = vmatpush3.bf16.msra.mxu1 %v4903_v1 }
0x2cd2   :  { %v4817_v8 = vsel %vm479_vm7, %v6778_v25, 0.0  ;;  %6355 = vmatprep.subr.bf16.mxu1 %v6817_v0 }
0x2cd3   :  { %v6780_v55 = vpop.eup %6779  ;;  %4818 = vadd.xlane.f32.xlu0 %v4817_v8 }
0x2cd4   :  { %v4820_v9 = vsel %vm479_vm7, %v6780_v55, 0.0 }
0x2cd5   :  { %v6782_v10 = vpop.eup %6781  ;;  %4821 = vadd.xlane.f32.xlu1 %v4820_v9 }
0x2cd6   :  { %v4823_v6 = vsel %vm479_vm7, %v6782_v10, 0.0 }
0x2cd7   :  { %v6784_v12 = vpop.eup %6783  ;;  %4824 = vadd.xlane.f32.xlu0 %v4823_v6 }
0x2cd8   :  { %v4826_v28 = vsel %vm479_vm7, %v6784_v12, 0.0 }
0x2cd9   :  { %v6786_v14 = vpop.eup %6785  ;;  %4827 = vadd.xlane.f32.xlu1 %v4826_v28 }
0x2cda   :  { %v4829_v18 = vsel %vm479_vm7, %v6786_v14, 0.0 }
0x2cdb   :  { %v6788_v21 = vpop.eup %6787  ;;  %4830 = vadd.xlane.f32.xlu0 %v4829_v18 }
0x2cdc   :  { %v4832_v40 = vsel %vm479_vm7, %v6788_v21, 0.0 }
0x2cdd   :  { %4833 = vadd.xlane.f32.xlu1 %v4832_v40 }
0x2cee   :  { %4949 = vrot.lane.b32.xlu1 %v7879_v47, %s6824_s17 }
0x2cf1   :  { %4996 = vrot.lane.b32.xlu0 %v7889_v5, %s6824_s17 }
0x2cff   :  { %v4813_v20 = vpop.xlane.xlu0 %4812 }
0x2d00   :  { %6789 = vrcp.f32 %v4813_v20 }
0x2d01   :  { %v4816_v17 = vpop.xlane.xlu1 %4815 }
0x2d02   :  { %6791 = vrcp.f32 %v4816_v17 }
0x2d0a   :  { %v6790_v22 = vpop.eup %6789 }
0x2d0b   :  { %v4843_v24 = vmul.f32 %v6790_v22, %v6774_v31 }
0x2d0c   :  { %v6792_v23 = vpop.eup %6791 }
0x2d0d   :  { %v4844_v30 = vmul.f32 %v6792_v23, %v6776_v7 }
0x2d0f   :  { %v4851_v11 = vpack.c.bf16 %v4844_v30, %v4843_v24 }
0x2d11   :  { %6340 = vmatmul.mubr.msk.bf16.vlgmr.msra.gmra.mrb[124].mxu0 %vm479_vm7, %v4851_v11 }
0x2d12   :  { %6351 = vmatprep.mubr.msk.bf16.mxu0 %vm6819_vm0, %v6817_v0 }
0x2d60   :  { %v4819_v15 = vpop.xlane.xlu0 %4818 }
0x2d61   :  { %6793 = vrcp.f32 %v4819_v15 }
0x2d62   :  { %v4822_v47 = vpop.xlane.xlu1 %4821 }
0x2d63   :  { %6795 = vrcp.f32 %v4822_v47  ;;  %v5702_v47 = vld [vmem:[%s7641_s29 + $0x1] ss:$0 sm:$0xff] }
0x2d64   :  { %v4825_v36 = vpop.xlane.xlu0 %4824 }
0x2d65   :  { %6797 = vrcp.f32 %v4825_v36 }
0x2d66   :  { %v4828_v5 = vpop.xlane.xlu1 %4827 }
0x2d67   :  { %6799 = vrcp.f32 %v4828_v5 }
0x2d68   :  { %v4831_v34 = vpop.xlane.xlu0 %4830 }
0x2d69   :  { %6801 = vrcp.f32 %v4831_v34 }
0x2d6a   :  { %v4834_v35 = vpop.xlane.xlu1 %4833 }
0x2d6b   :  { %v6794_v19 = vpop.eup %6793  ;;  %6803 = vrcp.f32 %v4834_v35 }
0x2d6c   :  { %v4845_v37 = vmul.f32 %v6794_v19, %v6778_v25  ;;  %v4997_v31 = vpop.permute.xlu0 %4996 }
0x2d6d   :  { %v6796_v13 = vpop.eup %6795 }
0x2d6e   :  { %v4846_v38 = vmul.f32 %v6796_v13, %v6780_v55  ;;  %v4950_v29 = vpop.permute.xlu1 %4949 }
0x2d6f   :  { %v6798_v43 = vpop.eup %6797  ;;  %6350 = vmatpush3.bf16.msra.mxu0 %v4950_v29 }
0x2d70   :  { %v4852_v3 = vpack.c.bf16 %v4846_v38, %v4845_v37  ;;  %6361 = vmatprep.subr.bf16.mxu0 %v6817_v0  ;;  %v4847_v50 = vmul.f32 %v6798_v43, %v6782_v10 }
0x2d71   :  { %v6800_v4 = vpop.eup %6799 }
0x2d72   :  { %v4848_v46 = vmul.f32 %v6800_v4, %v6784_v12  ;;  %6346 = vmatmul.mubr.msk.bf16.vlgmr.msra.gmra.mrb[128].mxu1 %vm479_vm7, %v4852_v3 }
0x2d73   :  { %v6802_v7 = vpop.eup %6801  ;;  %6356 = vmatpush3.bf16.msra.mxu1 %v4997_v31  ;;  %6357 = vmatprep.mubr.msk.bf16.mxu1 %vm6819_vm0, %v6817_v0 }
0x2d74   :  { %v4853_v42 = vpack.c.bf16 %v4848_v46, %v4847_v50  ;;  %6369 = vmatprep.subr.bf16.mxu1 %v6817_v0  ;;  %v4849_v48 = vmul.f32 %v6802_v7, %v6786_v14 }
0x2d75   :  { %v6804_v53 = vpop.eup %6803 }
0x2d76   :  { %v4850_v49 = vmul.f32 %v6804_v53, %v6788_v21  ;;  %6352 = vmatmul.mubr.msk.bf16.vlgmr.msra.gmra.mrb[128].mxu0 %vm479_vm7, %v4853_v42 }
0x2d77   :  { %6365 = vmatprep.mubr.msk.bf16.mxu0 %vm6819_vm0, %v6817_v0  ;;  %6362 = vmatpush3.bf16.msra.mxu0 %v6567_v54 }
0x2d78   :  { %v4854_v39 = vpack.c.bf16 %v4850_v49, %v4849_v48  ;;  %6363 = vmatprep.subr.bf16.mxu0 %v6817_v0  ;;  %v6569_v48 = vld [vmem:[%s7653_s7 + $0x10] sm:$0xff]   ;;  %v6570_v49 = vld [vmem:[%s7653_s7 + $0x18] sm:$0xff]  }
0x2d7a   :  { %6358 = vmatmul.mubr.msk.bf16.vlgmr.msra.gmra.mrb[132].mxu1 %vm479_vm7, %v4854_v39  ;;  %v6571_v39 = vld [vmem:[%s7028_s30 + $0x20] sm:$0xff]  }
0x2d7b   :  { %6373 = vmatprep.mubr.msk.bf16.mxu1 %vm6819_vm0, %v6817_v0  ;;  %6364 = vmatpush3.bf16.msra.mxu0 %v6568_v44  ;;  %v5706_v44 = vld [vmem:[%s7666_s20 + $0x2] sm:$0x3] }
0x2d7c   :  { %6377 = vmatprep.subr.bf16.mxu0 %v6817_v0  ;;  %6370 = vmatpush3.bf16.msra.mxu1 %v6569_v48  ;;  %v5731_v48 = vld [vmem:[%s7704_s6 + $0x2] sm:$0x3] }
0x2d7d   :  { %6371 = vmatprep.subr.bf16.mxu1 %v6817_v0 }
0x2d80   :  { %6372 = vmatpush3.bf16.msra.mxu1 %v6570_v49  ;;  %v5376_v49 = vrot.slane %v5731_v48, %v7090_v56 }
0x2d81   :  { %6389 = vmatprep.subr.bf16.mxu1 %v6817_v0 }
0x2de4   :  { %v4895_v16 = vpop.f32.mrb[124].mxu0 }
0x2de5   :  { %v6341_v52 = vpop.f32.mrb[125].mxu0 }
0x2de6   :  { %v4898_v27 = vpop.f32.mrb[126].mxu0 }
0x2de7   :  { %v6342_v60 = vpop.f32.mrb[127].mxu0 }
0x2e45   :  { %v4942_v57 = vpop.f32.mrb[128].mxu1 }
0x2e46   :  { %v6347_v41 = vpop.f32.mrb[129].mxu1 }
0x2e47   :  { %v4945_v51 = vpop.f32.mrb[130].mxu1 }
0x2e48   :  { %v6512_v45 = vpack.i.bf16 %v4945_v51, %v4942_v57  ;;  %v6348_v58 = vpop.f32.mrb[131].mxu1 }
0x2e49   :  { %v4989_v61 = vpop.f32.mrb[128].mxu0 }
0x2e4a   :  { %v6353_v2 = vpop.f32.mrb[129].mxu0  ;;  %6513 = vrot.lane.b32.xlu1 %v6512_v45, %s6831_s5  ;;  %v5176_v45 = vrot.slane %v5706_v44, %v7090_v56 }
0x2e4b   :  { %v4992_v26 = vpop.f32.mrb[130].mxu0 }
0x2e4c   :  { %v6517_v62 = vpack.i.bf16 %v4992_v26, %v4989_v61  ;;  %v6354_v63 = vpop.f32.mrb[131].mxu0 }
0x2e4d   :  { %v5036_v1 = vpop.f32.mrb[132].mxu1 }
0x2e4e   :  { %6518 = vrot.lane.b32.xlu0 %v6517_v62, %s6828_s23  ;;  %v6359_v25 = vpop.f32.mrb[133].mxu1  ;;  %v5182_v62 = vrot.slane %v5706_v44, %v7094_v59 }
0x2e4f   :  { %v5039_v8 = vpop.f32.mrb[134].mxu1 }
0x2e50   :  { %v6522_v55 = vpack.i.bf16 %v5039_v8, %v5036_v1  ;;  %v6360_v9 = vpop.f32.mrb[135].mxu1 }
0x2e51   :  { %v6574_v9 = vld [vmem:[%s7028_s30 + $0x38] sm:$0xff]  }
0x2e52   :  { %6523 = vrot.lane.b32.xlu1 %v6522_v55, %s6829_s27  ;;  %v6573_v55 = vld [vmem:[%s7028_s30 + $0x30] sm:$0xff]   ;;  %s5526_s27 = sld [smem:[%s8021_s0 + %s6854_s22]]  }
0x2ebc   :  { %v6514_v10 = vpop.permute.xlu1 %6513 }
0x2ebd   :  { %v6516_v12 = vunpack.i.h.bf16 %v6514_v10  ;;  %v6515_v28 = vunpack.i.l.bf16 %v6514_v10  ;;  %v5712_v10 = vld [vmem:[%s7681_s4 + $0x1] ss:$0 sm:$0xff] }
0x2ebf   :  { %v5068_v40 = vsel %vm268_vm2, %v4898_v27, %v6516_v12  ;;  %v5067_v20 = vsel %vm268_vm2, %v4895_v16, %v6515_v28  ;;  %v6572_v16 = vld [vmem:[%s7028_s30 + $0x28] sm:$0xff]   ;;  %s6855_s30 = smov 31  }
0x2ec0   :  { %v6519_v6 = vpop.permute.xlu0 %6518  ;;  %s5528_s11 = sld [smem:[%s8021_s0 + %s6855_s30]]  }
0x2ec1   :  { %v6521_v14 = vunpack.i.h.bf16 %v6519_v6  ;;  %v6520_v18 = vunpack.i.l.bf16 %v6519_v6 }
0x2ec3   :  { %v5069_v23 = vsel %vm479_vm7, %v5067_v20, %v6520_v18  ;;  %v5070_v24 = vsel %vm479_vm7, %v5068_v40, %v6521_v14 }
0x2ec4   :  { %v6524_v21 = vpop.permute.xlu1 %6523 }
0x2ec5   :  { %v6526_v17 = vunpack.i.h.bf16 %v6524_v21  ;;  %v6525_v22 = vunpack.i.l.bf16 %v6524_v21 }
0x2ec7   :  { %v5072_v30 = vsel %vm788_vm8, %v5070_v24, %v6526_v17  ;;  %v5071_v11 = vsel %vm788_vm8, %v5069_v23, %v6525_v22  ;;  %v5725_v22 = vld [vmem:[%s7690_s9 + $0x1] ss:$0 sm:$0xff] }
0x2ec8   :  { %v5078_v15 = vpack.c.bf16 %v5072_v30, %v5071_v11 }
0x2eca   :  { %6366 = vmatmul.mubr.msk.bf16.vlgmr.msra.gmra.mrb[132].mxu0 %vm213_vm1, %v5078_v15 }
0x2ecb   :  { %6385 = vmatprep.mubr.msk.bf16.mxu0 %vm6819_vm0, %v6817_v0  ;;  %6378 = vmatpush3.bf16.msra.mxu0 %v6571_v39 }
0x2ecc   :  { %6379 = vmatprep.subr.bf16.mxu0 %v6817_v0 }
0x2ecf   :  { %6380 = vmatpush3.bf16.msra.mxu0 %v6572_v16 }
0x2ed0   :  { %6381 = vmatprep.subr.bf16.mxu0 %v6817_v0 }
0x2ed3   :  { %6382 = vmatpush3.bf16.msra.mxu0 %v6573_v55 }
0x2ed4   :  { %6383 = vmatprep.subr.bf16.mxu0 %v6817_v0 }
0x2ed7   :  { %6384 = vmatpush3.bf16.msra.mxu0 %v6574_v9  ;;  %v6575_v9 = vld [vmem:[%s5527_s18] sm:$0xff]  }
0x2f9d   :  { %v5136_v36 = vpop.f32.mrb[132].mxu0 }
0x2f9e   :  { %v5137_v5 = vadd.f32 %v5702_v47, %v5136_v36  ;;  %v6367_v34 = vpop.f32.mrb[133].mxu0 }
0x2f9f   :  { %v5139_v35 = vpop.f32.mrb[134].mxu0 }
0x2fa0   :  { %v5143_v19 = vadd.f32 %v5137_v5, %v7853_v32  ;;  %v5140_v13 = vadd.f32 %v5702_v47, %v5139_v35  ;;  %v6368_v37 = vpop.f32.mrb[135].mxu0 }
0x2fa2   :  { %v5144_v38 = vadd.f32 %v5140_v13, %v7855_v33  ;;  %v5147_v29 = vsel %vm213_vm1, %v5143_v19, 0.0 }
0x2fa3   :  { %5148 = vadd.xlane.f32.xlu0 %v5147_v29 }
0x2fa4   :  { %v5150_v43 = vsel %vm213_vm1, %v5144_v38, 0.0 }
0x2fa5   :  { %5151 = vadd.xlane.f32.xlu1 %v5150_v43 }
0x3030   :  { %v5149_v3 = vpop.xlane.xlu0 %5148 }
0x3031   :  { %v5153_v4 = vmul.f32 0.03125, %v5149_v3 }
0x3032   :  { %v5152_v50 = vpop.xlane.xlu1 %5151 }
0x3033   :  { %v5155_v46 = vsub.f32 %v5143_v19, %v5153_v4  ;;  %v5154_v31 = vmul.f32 0.03125, %v5152_v50 }
0x3035   :  { %v5156_v32 = vsub.f32 %v5144_v38, %v5154_v31  ;;  %v5157_v7 = vmul.f32 %v5155_v46, %v5155_v46 }
0x3037   :  { %v5159_v42 = vsel %vm213_vm1, %v5157_v7, 0.0  ;;  %v5158_v33 = vmul.f32 %v5156_v32, %v5156_v32 }
0x3038   :  { %5160 = vadd.xlane.f32.xlu0 %v5159_v42 }
0x3039   :  { %v5162_v53 = vsel %vm213_vm1, %v5158_v33, 0.0 }
0x303c   :  { %5163 = vadd.xlane.f32.xlu0 %v5162_v53 }
0x30c5   :  { %v5161_v52 = vpop.xlane.xlu0 %5160 }
0x30c6   :  { %v5165_v27 = vmul.f32 0.03125, %v5161_v52  ;;  %v5382_v52 = vrot.slane %v5731_v48, %v7094_v59 }
0x30c8   :  { %v5167_v60 = vadd.f32 1e-05, %v5165_v27 }
0x30c9   :  { %v5164_v54 = vpop.xlane.xlu0 %5163 }
0x30ca   :  { %6805 = vrsqrt.f32 %v5167_v60  ;;  %v5166_v57 = vmul.f32 0.03125, %v5164_v54 }
0x30cc   :  { %v5168_v41 = vadd.f32 1e-05, %v5166_v57 }
0x30ce   :  { %6807 = vrsqrt.f32 %v5168_v41 }
0x30d4   :  { %v6806_v51 = vpop.eup %6805 }
0x30d5   :  { %v5171_v58 = vmul.f32 %v6806_v51, %v5155_v46 }
0x30d7   :  { %v5177_v2 = vmul.f32 %v5176_v45, %v5171_v58 }
0x30d8   :  { %v6808_v61 = vpop.eup %6807 }
0x30d9   :  { %v5172_v26 = vmul.f32 %v6808_v61, %v5156_v32  ;;  %v5183_v1 = vadd.f32 %v5182_v62, %v5177_v2 }
0x30db   :  { %v5178_v63 = vmul.f32 %v5176_v45, %v5172_v26 }
0x30dd   :  { %v5184_v25 = vadd.f32 %v5182_v62, %v5178_v63 }
0x30df   :  { %v5190_v8 = vpack.c.bf16 %v5184_v25, %v5183_v1 }
0x30e1   :  { %6374 = vmatmul.mubr.msk.bf16.vlgmr.msra.gmra.mrb[136].mxu1 %vm213_vm1, %v5190_v8 }
0x30e2   :  { %6393 = vmatprep.mubr.msk.bf16.mxu1 %vm6819_vm0, %v6817_v0  ;;  %6390 = vmatpush3.bf16.msra.mxu1 %v6575_v9 }
0x30e3   :  { %6391 = vmatprep.subr.bf16.mxu1 %v6817_v0 }
0x31b4   :  { %v5248_v6 = vpop.f32.mrb[136].mxu1 }
0x31b5   :  { %v5249_v12 = vadd.f32 %v5712_v10, %v5248_v6  ;;  %v6375_v28 = vpop.f32.mrb[137].mxu1 }
0x31b6   :  { %v5251_v14 = vpop.f32.mrb[138].mxu1 }
0x31b7   :  { %v5252_v18 = vadd.f32 %v5712_v10, %v5251_v14  ;;  %v6376_v21 = vpop.f32.mrb[139].mxu1  ;;  %v5255_v40 = vmax.f32 %v5249_v12, 0.0  ;;  %v6576_v10 = vld [vmem:[%s5527_s18 + $0x8] sm:$0xff]  }
0x31b8   :  { %6392 = vmatpush3.bf16.msra.mxu1 %v6576_v10 }
0x31b9   :  { %v5256_v20 = vmax.f32 %v5252_v18, 0.0 }
0x31bb   :  { %v5257_v17 = vpack.c.bf16 %v5256_v20, %v5255_v40  ;;  %v5385_v40 = vld [vmem:[%s5526_s27] sm:$0x3] }
0x31bc   :  { %v5415_v20 = vrot.slane %v5385_v40, %v7090_v56  ;;  %v5732_v56 = vld [vmem:[%s5528_s11] ss:$0 sm:$0xff] }
0x31bd   :  { %6386 = vmatmul.mubr.msk.bf16.vlgmr.msra.gmra.mrb[136].mxu0 %vm1011_vm9, %v5257_v17 }
0x3290   :  { %v5336_v23 = vpop.f32.mrb[136].mxu0 }
0x3291   :  { %v5337_v24 = vadd.f32 %v5725_v22, %v5336_v23  ;;  %v6387_v30 = vpop.f32.mrb[137].mxu0 }
0x3292   :  { %v5339_v11 = vpop.f32.mrb[138].mxu0  ;;  %v5421_v30 = vrot.slane %v5385_v40, %v7094_v59 }
0x3293   :  { %v5343_v15 = vadd.f32 %v5337_v24, %v5183_v1  ;;  %v5340_v47 = vadd.f32 %v5725_v22, %v5339_v11  ;;  %v6388_v36 = vpop.f32.mrb[139].mxu0 }
0x3295   :  { %v5344_v5 = vadd.f32 %v5340_v47, %v5184_v25  ;;  %v5347_v34 = vsel %vm213_vm1, %v5343_v15, 0.0 }
0x3296   :  { %5348 = vadd.xlane.f32.xlu1 %v5347_v34 }
0x3297   :  { %v5350_v35 = vsel %vm213_vm1, %v5344_v5, 0.0 }
0x3298   :  { %5351 = vadd.xlane.f32.xlu0 %v5350_v35 }
0x3323   :  { %v5349_v19 = vpop.xlane.xlu1 %5348 }
0x3324   :  { %v5353_v13 = vmul.f32 0.03125, %v5349_v19 }
0x3325   :  { %v5352_v37 = vpop.xlane.xlu0 %5351 }
0x3326   :  { %v5355_v38 = vsub.f32 %v5343_v15, %v5353_v13  ;;  %v5354_v29 = vmul.f32 0.03125, %v5352_v37 }
0x3328   :  { %v5356_v43 = vsub.f32 %v5344_v5, %v5354_v29  ;;  %v5357_v3 = vmul.f32 %v5355_v38, %v5355_v38 }
0x332a   :  { %v5359_v4 = vsel %vm213_vm1, %v5357_v3, 0.0  ;;  %v5358_v50 = vmul.f32 %v5356_v43, %v5356_v43 }
0x332b   :  { %5360 = vadd.xlane.f32.xlu1 %v5359_v4 }
0x332c   :  { %v5362_v46 = vsel %vm213_vm1, %v5358_v50, 0.0 }
0x332d   :  { %5363 = vadd.xlane.f32.xlu0 %v5362_v46 }
0x33b8   :  { %v5361_v31 = vpop.xlane.xlu1 %5360 }
0x33b9   :  { %v5365_v32 = vmul.f32 0.03125, %v5361_v31 }
0x33ba   :  { %v5364_v7 = vpop.xlane.xlu0 %5363 }
0x33bb   :  { %v5367_v42 = vadd.f32 1e-05, %v5365_v32  ;;  %v5366_v33 = vmul.f32 0.03125, %v5364_v7 }
0x33bd   :  { %6809 = vrsqrt.f32 %v5367_v42  ;;  %v5368_v53 = vadd.f32 1e-05, %v5366_v33 }
0x33bf   :  { %6811 = vrsqrt.f32 %v5368_v53 }
0x33c7   :  { %v6810_v39 = vpop.eup %6809 }
0x33c8   :  { %v5371_v16 = vmul.f32 %v6810_v39, %v5355_v38 }
0x33c9   :  { %v6812_v27 = vpop.eup %6811 }
0x33ca   :  { %v5377_v60 = vmul.f32 %v5376_v49, %v5371_v16  ;;  %v5372_v54 = vmul.f32 %v6812_v27, %v5356_v43 }
0x33cc   :  { %v5383_v57 = vadd.f32 %v5382_v52, %v5377_v60  ;;  %v5378_v41 = vmul.f32 %v5376_v49, %v5372_v54 }
0x33ce   :  { %v5386_v44 = vsel %vm213_vm1, %v5383_v57, 0.0  ;;  %v5384_v51 = vadd.f32 %v5382_v52, %v5378_v41 }
0x33cf   :  { %5387 = vadd.xlane.f32.xlu1 %v5386_v44 }
0x33d0   :  { %v5389_v45 = vsel %vm213_vm1, %v5384_v51, 0.0 }
0x33d1   :  { %5390 = vadd.xlane.f32.xlu0 %v5389_v45 }
0x345c   :  { %v5388_v58 = vpop.xlane.xlu1 %5387 }
0x345d   :  { %v5392_v61 = vmul.f32 0.03125, %v5388_v58 }
0x345e   :  { %v5391_v2 = vpop.xlane.xlu0 %5390 }
0x345f   :  { %v5394_v26 = vsub.f32 %v5383_v57, %v5392_v61  ;;  %v5393_v62 = vmul.f32 0.03125, %v5391_v2 }
0x3461   :  { %v5395_v63 = vsub.f32 %v5384_v51, %v5393_v62  ;;  %v5396_v1 = vmul.f32 %v5394_v26, %v5394_v26 }
0x3463   :  { %v5398_v25 = vsel %vm213_vm1, %v5396_v1, 0.0  ;;  %v5397_v8 = vmul.f32 %v5395_v63, %v5395_v63 }
0x3464   :  { %5399 = vadd.xlane.f32.xlu1 %v5398_v25 }
0x3465   :  { %v5401_v55 = vsel %vm213_vm1, %v5397_v8, 0.0 }
0x3466   :  { %5402 = vadd.xlane.f32.xlu0 %v5401_v55 }
0x34f1   :  { %v5400_v6 = vpop.xlane.xlu1 %5399 }
0x34f2   :  { %v5404_v12 = vmul.f32 0.03125, %v5400_v6 }
0x34f3   :  { %v5403_v28 = vpop.xlane.xlu0 %5402 }
0x34f4   :  { %v5406_v14 = vadd.f32 1e-05, %v5404_v12  ;;  %v5405_v18 = vmul.f32 0.03125, %v5403_v28 }
0x34f6   :  { %6813 = vrsqrt.f32 %v5406_v14  ;;  %v5407_v21 = vadd.f32 1e-05, %v5405_v18 }
0x34f8   :  { %6815 = vrsqrt.f32 %v5407_v21 }
0x3500   :  { %v6814_v17 = vpop.eup %6813 }
0x3501   :  { %v5410_v22 = vmul.f32 %v6814_v17, %v5394_v26 }
0x3502   :  { %v6816_v0 = vpop.eup %6815 }
0x3503   :  { %v5416_v23 = vmul.f32 %v5415_v20, %v5410_v22  ;;  %v5411_v24 = vmul.f32 %v6816_v0, %v5395_v63 }
0x3505   :  { %v5417_v11 = vmul.f32 %v5415_v20, %v5411_v24  ;;  %v5422_v15 = vadd.f32 %v5421_v30, %v5416_v23 }
0x3507   :  { %v5423_v47 = vadd.f32 %v5421_v30, %v5417_v11 }
0x3509   :  { %v5428_v36 = vpack.c.bf16 %v5423_v47, %v5422_v15 }
0x350b   :  { %6394 = vmatmul.mubr.msk.bf16.vlgmr.msra.gmra.mrb[140].mxu1 %vm213_vm1, %v5428_v36 }
0x35de   :  { %v5485_v5 = vpop.f32.mrb[140].mxu1 }
0x35df   :  { %v5486_v34 = vadd.f32 %v5732_v56, %v5485_v5  ;;  %v6395_v59 = vpop.f32.mrb[141].mxu1 }
0x35e0   :  { %v5488_v35 = vpop.f32.mrb[142].mxu1 }
0x35e1   :  { %5492 = vst [vmem:[%s5529_s8] sm:$0xff] %v5486_v34  ;;  %v5489_v19 = vadd.f32 %v5732_v56, %v5488_v35  ;;  %v6396_v13 = vpop.f32.mrb[143].mxu1 }
0x35e3   :  { %5493 = vst [vmem:[%s5529_s8 + $0x8] sm:$0xff] %v5489_v19 }

</bundles_post_ra>
